<compile_context>
chip_gen: v5e
topology: v5e:2x2
jax: 0.10.0
libtpu: 0.0.40
codegen_flags: <defaults>
</compile_context>

<pallas_src>
import jax
import jax.numpy as jnp
from jax.experimental import pallas as pl
from jax.experimental.pallas import tpu as pltpu

DIMENSION = 1                       # cfg.DIMENSION
GLOVE_IN, GLOVE_OUT = 50, 5
RES_VOCAB, RES_DIM = 3, 8
GENDER_VOCAB = 2
CAT_DIM = 15 + DIMENSION            # 5 + 8 + DIMENSION + 1 + 1
H1, H2, NCLS = 512, 256, 5
NCLS_PAD = 128                      # lane-dense class dim for the logp store
K_AUG = GLOVE_IN + RES_VOCAB + GENDER_VOCAB + 2   # 57 real input columns
K_PAD = 64                          # padded K for the fused fc1 matmul


def _round_up(n, m):
    return ((n + m - 1) // m) * m


def hybrid_kernel(x_ref, w1_ref, b1_ref, w2_ref, b2_ref, w3_ref, b3_ref,
                  logp_ref, fc2_ref):
    f32 = jnp.float32

    # fc1: single dense (TM,64) x (64,512) bf16 matmul (front-end fully folded),
    # f32 accumulation, f32 bias add, f32 tanh (v5e has no bf16 VPU/EUP).
    pre1 = jnp.dot(x_ref[...], w1_ref[...], preferred_element_type=f32)
    h1 = jnp.tanh(pre1 + b1_ref[...])
    # TODO(synk): F.dropout(p=0.5) is identity in eval; a training-mode kernel
    # would mask with pltpu.prng_seed / pltpu.prng_random_bits.

    # fc2 + tanh (bf16 operands, f32 accumulation)
    pre2 = jnp.dot(h1.astype(jnp.bfloat16), w2_ref[...],
                   preferred_element_type=f32) + b2_ref[...]
    fc2 = jnp.tanh(pre2)
    fc2_bf16 = fc2.astype(jnp.bfloat16)
    fc2_ref[...] = fc2_bf16                      # bf16 writeback (halves HBM bytes)

    # fc3 + log_softmax.  w3 is bf16 and lane-padded to 128 classes; padded
    # biases are -1e30 (f32) so exp underflows to 0 and max/sum are unaffected.
    pre3 = jnp.dot(fc2_bf16, w3_ref[...],
                   preferred_element_type=f32) + b3_ref[...]
    m = jnp.max(pre3, axis=-1, keepdims=True)
    z = pre3 - m
    lse = jnp.log(jnp.sum(jnp.exp(z), axis=-1, keepdims=True))
    logp_ref[...] = (z - lse).astype(logp_ref.dtype)


def init_params(key):
    """Deterministic synthetic parameters (PyTorch-like uniform init for linears)."""
    ks = jax.random.split(key, 8)

    def lin(k, fan_in, fan_out):
        kw, kb = jax.random.split(k)
        bound = 1.0 / float(fan_in) ** 0.5
        w = jax.random.uniform(kw, (fan_in, fan_out), jnp.float32, -bound, bound)
        b = jax.random.uniform(kb, (1, fan_out), jnp.float32, -bound, bound)
        return w, b

    p = {}
    p["wg"], p["bg"] = lin(ks[0], GLOVE_IN, GLOVE_OUT)
    p["embr"] = jax.random.normal(ks[1], (RES_VOCAB, RES_DIM), jnp.float32)
    p["wb"], p["bb"] = lin(ks[2], 1, DIMENSION)
    p["embg"] = jax.random.normal(ks[3], (GENDER_VOCAB, 1), jnp.float32)
    p["wa"], p["ba"] = lin(ks[4], 1, 1)
    p["w1"], p["b1"] = lin(ks[5], CAT_DIM, H1)
    p["w2"], p["b2"] = lin(ks[6], H1, H2)
    p["w3"], p["b3"] = lin(ks[7], H2, NCLS)
    return p


def fold_params(p):
    """One-time weight transform: fold the whole front-end into fc1's weight.

    Fused weight row order matches the augmented input column order:
      [x1 (50) | onehot(x2) (3) | onehot(x4) (2) | x3 | x5 | zero-pad (7)]
    """
    assert DIMENSION == 1
    w1 = p["w1"]                                         # (16, 512)
    wg1 = p["wg"] @ w1[0:5, :]                           # (50, 512) glove
    er1 = p["embr"] @ w1[5:13, :]                        # (3, 512)  res embedding
    eg1 = p["embg"] @ w1[14:15, :]                       # (2, 512)  gender embedding
    wb1 = p["wb"][0, 0] * w1[13:14, :]                   # (1, 512)  x3 scale
    wa1 = p["wa"][0, 0] * w1[15:16, :]                   # (1, 512)  x5 scale
    b1a = (p["b1"] + p["bg"] @ w1[0:5, :]
           + p["bb"][0, 0] * w1[13:14, :]
           + p["ba"][0, 0] * w1[15:16, :])               # (1, 512)  all const terms

    w1f = jnp.concatenate([wg1, er1, eg1, wb1, wa1], axis=0)      # (57, 512)
    w1f = jnp.pad(w1f, ((0, K_PAD - K_AUG), (0, 0)))              # (64, 512)

    w3p = jnp.pad(p["w3"], ((0, 0), (0, NCLS_PAD - NCLS)))
    b3p = jnp.pad(p["b3"], ((0, 0), (0, NCLS_PAD - NCLS)), constant_values=-1e30)

    return dict(
        w1f=w1f.astype(jnp.bfloat16),        # fused fc1 weight (bf16 MXU operand)
        b1a=b1a.astype(jnp.float32),         # kept f32 (accuracy of the bias add)
        w2=p["w2"].astype(jnp.bfloat16),
        b2=p["b2"].astype(jnp.float32),
        w3=w3p.astype(jnp.bfloat16),         # bf16 operands for fc3 too
        b3=b3p.astype(jnp.float32),          # -1e30 pad kept f32
    )


def _build_augmented_input(x1, x2, x3, x4, x5, b_pad):
    """(B, 57) = [x1 | onehot(x2) | onehot(x4) | x3 | x5], padded to (B_pad, 64) bf16."""
    B = x1.shape[0]
    oh_res = jax.nn.one_hot(x2.reshape(-1), RES_VOCAB, dtype=jnp.float32)
    oh_gen = jax.nn.one_hot(x4.reshape(-1), GENDER_VOCAB, dtype=jnp.float32)
    x_aug = jnp.concatenate(
        [x1.astype(jnp.float32), oh_res, oh_gen,
         x3.reshape(B, 1).astype(jnp.float32),
         x5.reshape(B, 1).astype(jnp.float32)], axis=1)              # (B, 57)
    x_aug = jnp.pad(x_aug, ((0, b_pad - B), (0, K_PAD - K_AUG)))
    return x_aug.astype(jnp.bfloat16)


def hybrid_forward(folded, x1, x2, x3, x4, x5, *, tm=1024):
    """Batch-tiled Pallas forward.  `folded` = fold_params(raw_params).

    Returns (logp[B, 5] bf16, fc2[B, 256] bf16).
    """
    B = x1.shape[0]
    # Clamp the tile to the (256-rounded) batch so tiny batches don't pad to a
    # full 1024-row tile; 256 keeps MXU-friendly row counts on all generations.
    TM = min(tm, _round_up(B, 256))
    nb = pl.cdiv(B, TM)
    B_pad = nb * TM

    x_aug = _build_augmented_input(x1, x2, x3, x4, x5, B_pad)        # (B_pad, 64) bf16

    weights = (folded["w1f"], folded["b1a"], folded["w2"], folded["b2"],
               folded["w3"], folded["b3"])

    # batch-blocked activations; weights resident across grid steps
    in_specs = [pl.BlockSpec((TM, K_PAD), lambda i: (i, 0))]
    in_specs += [pl.BlockSpec(tuple(w.shape), lambda i: (0, 0)) for w in weights]

    out_shapes = (jax.ShapeDtypeStruct((B_pad, NCLS_PAD), jnp.bfloat16),
                  jax.ShapeDtypeStruct((B_pad, H2), jnp.bfloat16))
    out_specs = (pl.BlockSpec((TM, NCLS_PAD), lambda i: (i, 0)),
                 pl.BlockSpec((TM, H2), lambda i: (i, 0)))

    flops = 2 * B_pad * (K_PAD * H1 + H1 * H2 + H2 * NCLS_PAD)
    transcendentals = B_pad * (H1 + H2 + NCLS_PAD + 1)               # tanh + exp + log
    bytes_w = sum(int(w.size) * w.dtype.itemsize for w in weights)
    bytes_accessed = (int(x_aug.size) * 2 + bytes_w
                      + B_pad * (NCLS_PAD + H2) * 2)                 # bf16 outputs

    logp_pad, fc2_pad = pl.pallas_call(
        hybrid_kernel,
        out_shape=out_shapes,
        grid=(nb,),
        in_specs=in_specs,
        out_specs=out_specs,
        compiler_params=pltpu.CompilerParams(
            dimension_semantics=("parallel",),
            vmem_limit_bytes=48 * 1024 * 1024),
        cost_estimate=pl.CostEstimate(flops=flops,
                                      transcendentals=transcendentals,
                                      bytes_accessed=bytes_accessed),
    )(x_aug, *weights)

    return logp_pad[:B, :NCLS], fc2_pad[:B, :]


def hybrid_forward_ref(params, x1, x2, x3, x4, x5):
    """Pure-JAX reference (mirrors the PyTorch forward in eval mode)."""
    B = x1.shape[0]
    glove = x1 @ params["wg"] + params["bg"]
    res = params["embr"][x2.reshape(-1)]
    bit = x3 @ params["wb"] + params["bb"]
    gender = params["embg"][x4.reshape(-1)].reshape(B, 1)
    age = x5 @ params["wa"] + params["ba"]
    h = jnp.concatenate([glove, res, bit, gender, age], axis=1)
    h = jnp.tanh(h @ params["w1"] + params["b1"])
    fc2 = jnp.tanh(h @ params["w2"] + params["b2"])
    logits = fc2 @ params["w3"] + params["b3"]
    return jax.nn.log_softmax(logits, axis=1), fc2


if __name__ == "__main__":
    key = jax.random.PRNGKey(0)
    kp, k1, k2, k3, k4, k5 = jax.random.split(key, 6)
    B = 8
    params = init_params(kp)
    folded = fold_params(params)          # one-time weight transform

    x1 = jax.random.normal(k1, (B, GLOVE_IN), jnp.float32)
    x2 = jax.random.randint(k2, (B,), 0, RES_VOCAB, jnp.int32)
    x3 = jax.random.normal(k3, (B, 1), jnp.float32)
    x4 = jax.random.randint(k4, (B,), 0, GENDER_VOCAB, jnp.int32)
    x5 = jax.random.normal(k5, (B, 1), jnp.float32)

    logp, fc2 = hybrid_forward(folded, x1, x2, x3, x4, x5)
    jax.block_until_ready((logp, fc2))

    # sanity check against the pure-JAX f32 reference (tolerance absorbs bf16
    # matmul operands, folded-weight rounding, and the bf16 output stores)
    logp_r, fc2_r = hybrid_forward_ref(params, x1, x2, x3, x4, x5)
    assert jnp.max(jnp.abs(logp.astype(jnp.float32) - logp_r)) < 6e-2
    assert jnp.max(jnp.abs(fc2.astype(jnp.float32) - fc2_r)) < 3e-2

    print("KERNEL_OK")
</pallas_src>

<mosaic_0001>
module attributes {stable_mosaic.version = 11 : i64} {
  func.func @hybrid_kernel(%arg0: i32, %arg1: memref<256x64xbf16, #tpu.memory_space<vmem>>, %arg2: memref<64x512xbf16, #tpu.memory_space<vmem>>, %arg3: memref<1x512xf32, #tpu.memory_space<vmem>>, %arg4: memref<512x256xbf16, #tpu.memory_space<vmem>>, %arg5: memref<1x256xf32, #tpu.memory_space<vmem>>, %arg6: memref<256x128xbf16, #tpu.memory_space<vmem>>, %arg7: memref<1x128xf32, #tpu.memory_space<vmem>>, %arg8: memref<256x128xbf16, #tpu.memory_space<vmem>>, %arg9: memref<256x256xbf16, #tpu.memory_space<vmem>>) attributes {dimension_semantics = [#tpu.dimension_semantics<parallel>], iteration_bounds = array<i64: 1>, scalar_prefetch = 0 : i64, scratch_operands = 0 : i64, tpu.core_type = #tpu.core_type<tc>, window_params = [{transform_indices = @transform_0, window_bounds = array<i64: 256, 64>}, {pipeline_mode = #tpu.pipeline_mode<synchronous>, transform_indices = @transform_1, window_bounds = array<i64: 64, 512>}, {pipeline_mode = #tpu.pipeline_mode<synchronous>, transform_indices = @transform_2, window_bounds = array<i64: 1, 512>}, {pipeline_mode = #tpu.pipeline_mode<synchronous>, transform_indices = @transform_3, window_bounds = array<i64: 512, 256>}, {pipeline_mode = #tpu.pipeline_mode<synchronous>, transform_indices = @transform_4, window_bounds = array<i64: 1, 256>}, {pipeline_mode = #tpu.pipeline_mode<synchronous>, transform_indices = @transform_5, window_bounds = array<i64: 256, 128>}, {pipeline_mode = #tpu.pipeline_mode<synchronous>, transform_indices = @transform_6, window_bounds = array<i64: 1, 128>}, {transform_indices = @transform_7, window_bounds = array<i64: 256, 128>}, {transform_indices = @transform_8, window_bounds = array<i64: 256, 256>}]} {
    %c0 = arith.constant 0 : index
    %c0_0 = arith.constant 0 : index
    %0 = vector.load %arg1[%c0, %c0_0] : memref<256x64xbf16, #tpu.memory_space<vmem>>, vector<256x64xbf16>
    %c0_1 = arith.constant 0 : index
    %c0_2 = arith.constant 0 : index
    %1 = vector.load %arg2[%c0_1, %c0_2] : memref<64x512xbf16, #tpu.memory_space<vmem>>, vector<64x512xbf16>
    %cst = arith.constant dense<0.000000e+00> : vector<256x512xf32>
    %2 = tpu.matmul %0, %1, %cst {dimension_numbers = #tpu.dot_dimension_numbers<[1], [0], [0], [1], [0, 0, 1, 1], [], []>} : vector<256x64xbf16>, vector<64x512xbf16>, vector<256x512xf32> -> vector<256x512xf32>
    %c0_3 = arith.constant 0 : index
    %c0_4 = arith.constant 0 : index
    %3 = vector.load %arg3[%c0_3, %c0_4] : memref<1x512xf32, #tpu.memory_space<vmem>>, vector<1x512xf32>
    %4 = vector.broadcast %3 : vector<1x512xf32> to vector<256x512xf32>
    %5 = arith.addf %2, %4 : vector<256x512xf32>
    %6 = math.tanh %5 : vector<256x512xf32>
    %7 = arith.truncf %6 : vector<256x512xf32> to vector<256x512xbf16>
    %c0_5 = arith.constant 0 : index
    %c0_6 = arith.constant 0 : index
    %8 = vector.load %arg4[%c0_5, %c0_6] : memref<512x256xbf16, #tpu.memory_space<vmem>>, vector<512x256xbf16>
    %cst_7 = arith.constant dense<0.000000e+00> : vector<256x256xf32>
    %9 = tpu.matmul %7, %8, %cst_7 {dimension_numbers = #tpu.dot_dimension_numbers<[1], [0], [0], [1], [0, 0, 1, 1], [], []>} : vector<256x512xbf16>, vector<512x256xbf16>, vector<256x256xf32> -> vector<256x256xf32>
    %c0_8 = arith.constant 0 : index
    %c0_9 = arith.constant 0 : index
    %10 = vector.load %arg5[%c0_8, %c0_9] : memref<1x256xf32, #tpu.memory_space<vmem>>, vector<1x256xf32>
    %11 = vector.broadcast %10 : vector<1x256xf32> to vector<256x256xf32>
    %12 = arith.addf %9, %11 : vector<256x256xf32>
    %13 = math.tanh %12 : vector<256x256xf32>
    %14 = arith.truncf %13 : vector<256x256xf32> to vector<256x256xbf16>
    %c0_10 = arith.constant 0 : index
    %c0_11 = arith.constant 0 : index
    %15 = vector.load %arg9[%c0_10, %c0_11] : memref<256x256xbf16, #tpu.memory_space<vmem>>, vector<256x256xbf16>
    tpu.vector_store %arg9[%c0_10, %c0_11], %14 {strides = array<i32>} : memref<256x256xbf16, #tpu.memory_space<vmem>>, vector<256x256xbf16>,
    %c0_12 = arith.constant 0 : index
    %c0_13 = arith.constant 0 : index
    %16 = vector.load %arg6[%c0_12, %c0_13] : memref<256x128xbf16, #tpu.memory_space<vmem>>, vector<256x128xbf16>
    %cst_14 = arith.constant dense<0.000000e+00> : vector<256x128xf32>
    %17 = tpu.matmul %14, %16, %cst_14 {dimension_numbers = #tpu.dot_dimension_numbers<[1], [0], [0], [1], [0, 0, 1, 1], [], []>} : vector<256x256xbf16>, vector<256x128xbf16>, vector<256x128xf32> -> vector<256x128xf32>
    %c0_15 = arith.constant 0 : index
    %c0_16 = arith.constant 0 : index
    %18 = vector.load %arg7[%c0_15, %c0_16] : memref<1x128xf32, #tpu.memory_space<vmem>>, vector<1x128xf32>
    %19 = vector.broadcast %18 : vector<1x128xf32> to vector<256x128xf32>
    %20 = arith.addf %17, %19 : vector<256x128xf32>
    %cst_17 = arith.constant dense<0xFF800000> : vector<256xf32>
    %21 = vector.multi_reduction <maximumf>, %20, %cst_17 [1] : vector<256x128xf32> to vector<256xf32>
    %22 = vector.shape_cast %21 : vector<256xf32> to vector<256x1xf32>
    %23 = vector.broadcast %22 : vector<256x1xf32> to vector<256x128xf32>
    %24 = arith.subf %20, %23 : vector<256x128xf32>
    %25 = math.exp %24 : vector<256x128xf32>
    %cst_18 = arith.constant dense<0.000000e+00> : vector<256xf32>
    %26 = vector.multi_reduction <add>, %25, %cst_18 [1] : vector<256x128xf32> to vector<256xf32>
    %27 = vector.shape_cast %26 : vector<256xf32> to vector<256x1xf32>
    %28 = math.log %27 : vector<256x1xf32>
    %29 = vector.broadcast %28 : vector<256x1xf32> to vector<256x128xf32>
    %30 = arith.subf %24, %29 : vector<256x128xf32>
    %31 = arith.truncf %30 : vector<256x128xf32> to vector<256x128xbf16>
    %c0_19 = arith.constant 0 : index
    %c0_20 = arith.constant 0 : index
    %32 = vector.load %arg8[%c0_19, %c0_20] : memref<256x128xbf16, #tpu.memory_space<vmem>>, vector<256x128xbf16>
    tpu.vector_store %arg8[%c0_19, %c0_20], %31 {strides = array<i32>} : memref<256x128xbf16, #tpu.memory_space<vmem>>, vector<256x128xbf16>,
    return
  }
  func.func @transform_0(%arg0: i32) -> (i32, i32) {
    %c0_i32 = arith.constant 0 : i32
    %c0_i32_0 = arith.constant 0 : i32
    return %arg0, %c0_i32 : i32, i32
  }
  func.func @transform_1(%arg0: i32) -> (i32, i32) {
    %c0_i32 = arith.constant 0 : i32
    %c0_i32_0 = arith.constant 0 : i32
    %c0_i32_1 = arith.constant 0 : i32
    return %c0_i32, %c0_i32_0 : i32, i32
  }
  func.func @transform_2(%arg0: i32) -> (i32, i32) {
    %c0_i32 = arith.constant 0 : i32
    %c0_i32_0 = arith.constant 0 : i32
    %c0_i32_1 = arith.constant 0 : i32
    return %c0_i32, %c0_i32_0 : i32, i32
  }
  func.func @transform_3(%arg0: i32) -> (i32, i32) {
    %c0_i32 = arith.constant 0 : i32
    %c0_i32_0 = arith.constant 0 : i32
    %c0_i32_1 = arith.constant 0 : i32
    return %c0_i32, %c0_i32_0 : i32, i32
  }
  func.func @transform_4(%arg0: i32) -> (i32, i32) {
    %c0_i32 = arith.constant 0 : i32
    %c0_i32_0 = arith.constant 0 : i32
    %c0_i32_1 = arith.constant 0 : i32
    return %c0_i32, %c0_i32_0 : i32, i32
  }
  func.func @transform_5(%arg0: i32) -> (i32, i32) {
    %c0_i32 = arith.constant 0 : i32
    %c0_i32_0 = arith.constant 0 : i32
    %c0_i32_1 = arith.constant 0 : i32
    return %c0_i32, %c0_i32_0 : i32, i32
  }
  func.func @transform_6(%arg0: i32) -> (i32, i32) {
    %c0_i32 = arith.constant 0 : i32
    %c0_i32_0 = arith.constant 0 : i32
    %c0_i32_1 = arith.constant 0 : i32
    return %c0_i32, %c0_i32_0 : i32, i32
  }
  func.func @transform_7(%arg0: i32) -> (i32, i32) {
    %c0_i32 = arith.constant 0 : i32
    %c0_i32_0 = arith.constant 0 : i32
    return %arg0, %c0_i32 : i32, i32
  }
  func.func @transform_8(%arg0: i32) -> (i32, i32) {
    %c0_i32 = arith.constant 0 : i32
    %c0_i32_0 = arith.constant 0 : i32
    return %arg0, %c0_i32 : i32, i32
  }
}

</mosaic_0001>

<bundles_post_ra>
// kernel: tpu_custom_call.1
= control target key start
LH: loop header
LB: loop body
LE: loop exit
PB: predicated region body
PF: predicated region fallthrough
CT: control target
= control target key end

     0   :  { %14 = vsyncpa [#allocation3], 0  ;;  %s5812_s0 = inlined_call_operand.vmem [shape: bf16[256,64], index: 0, kind: input, shape index: {}]   ;;  %s5813_s1 = inlined_call_operand.vmem [shape: bf16[64,512], index: 1, kind: input, shape index: {}]   ;;  %s5814_s2 = inlined_call_operand.vmem [shape: f32[1,512], index: 2, kind: input, shape index: {}]   ;;  %s5815_s3 = inlined_call_operand.hbm [shape: bf16[512,256], index: 3, kind: input, shape index: {}]   ;;  %s5816_s4 = inlined_call_operand.vmem [shape: f32[1,256], index: 4, kind: input, shape index: {}]   ;;  %s5817_s5 = inlined_call_operand.hbm [shape: bf16[256,128], index: 5, kind: input, shape index: {}]   ;;  %s5818_s6 = inlined_call_operand.vmem [shape: f32[1,128], index: 6, kind: input, shape index: {}]   ;;  %s5819_s7 = inlined_call_operand.hbm [shape: bf16[256,128], index: 7, kind: output, shape index: {0}]   ;;  %s5820_s8 = inlined_call_operand.hbm [shape: bf16[256,256], index: 8, kind: output, shape index: {1}]  }
   0x1   :  { %15 = vsyncpa [#allocation6], 0 }
   0x2   :  { %16 = vsyncpa [#allocation4], 0 }
   0x3   :  { %17 = vsyncpa [#allocation9], 0  ;;  %s28_s29 = sshll.u32 %s5815_s3, 4  ;;  %s4360_s30 = smov [#allocation2]   ;;  %s29_s29 = int_to_ptr.hbm [resolvable:$true] %s28_s29 }
   0x4   :  { %s30_s9 = sshll.u32 %s4360_s30, 4  ;;  %s43_s12 = sshll.u32 %s5817_s5, 4  ;;  %s31_s9 = int_to_ptr.vmem [resolvable:$true] %s30_s9  ;;  %s44_s12 = int_to_ptr.hbm [resolvable:$true] %s43_s12 }
   0x5   :  { %s4361_s13 = smov 128   ;;  %s4362_s14 = smov 8  }
   0x6   :  { %36 = dma.hbm_to_vmem [thread:$0]  %s29_s29, 8192, %s31_s9, [#allocation3], %s4361_s13, %s4361_s13, %s4362_s14  }
   0x7   :  { %s4363_s15 = smov [#allocation5]   ;;  %s4364_s17 = smov 64  }
   0x8   :  { %s45_s16 = sshll.u32 %s4363_s15, 4  ;;  %s4365_s3 = smov 4   ;;  %s46_s16 = int_to_ptr.vmem [resolvable:$true] %s45_s16 }
   0x9   :  { %51 = dma.hbm_to_vmem [thread:$0]  %s44_s12, 2048, %s46_s16, [#allocation6], %s4364_s17, %s4364_s17, %s4365_s3  }
   0xa   :  { %4352 = dma.done.wait [#allocation3], 8192  }
   0xb   :  { %4353 = vsyncadd [#allocation3], 4294959104 }
   0xc   :  { %4354 = dma.done.wait [#allocation6], 2048  }
   0xd   :  { %4355 = vsyncadd [#allocation6], 4294965248  ;;  %v3114_v0 = vld [vmem:[%s5813_s1 + $0x60] sm:$0xf]  ;;  %v3542_v1 = vld [vmem:[%s5813_s1 + $0x6c] sm:$0xf0] }
   0xe   :  { %v3540_v2 = vld [vmem:[%s5813_s1 + $0x64] sm:$0xf]  ;;  %v3115_v3 = vor.u32 %v3542_v1, %v3114_v0  ;;  %v3116_v4 = vld [vmem:[%s5813_s1 + $0x70] sm:$0xf0]  ;;  %v3098_v5 = vld [vmem:[%s5813_s1 + $0x40] sm:$0xf] }
   0xf   :  { %v3538_v6 = vld [vmem:[%s5813_s1 + $0x4c] sm:$0xf0]  ;;  %v3119_v7 = vor.u32 %v3540_v2, %v3116_v4  ;;  %v3536_v8 = vld [vmem:[%s5813_s1 + $0x44] sm:$0xf]  ;;  %v3100_v9 = vld [vmem:[%s5813_s1 + $0x50] sm:$0xf0] }
  0x10   :  { %334 = vmatpush.bf16.msra.mxu0 %v3115_v3  ;;  %3719 = vmatpush.bf16.msra.mxu2 %v3115_v3  ;;  %v3099_v10 = vor.u32 %v3538_v6, %v3098_v5  ;;  %v3103_v11 = vor.u32 %v3536_v8, %v3100_v9  ;;  %v3082_v12 = vld [vmem:[%s5813_s1 + $0x20] sm:$0xf]  ;;  %v3534_v13 = vld [vmem:[%s5813_s1 + $0x2c] sm:$0xf0]  ;;  %v3532_v14 = vld [vmem:[%s5813_s1 + $0x24] sm:$0xf] }
  0x11   :  { %423 = vmatpush.bf16.msra.mxu1 %v3119_v7  ;;  %3723 = vmatpush.bf16.msra.mxu3 %v3119_v7  ;;  %v3084_v15 = vld [vmem:[%s5813_s1 + $0x30] sm:$0xf0]  ;;  %v3083_v16 = vor.u32 %v3534_v13, %v3082_v12  ;;  %v3066_v18 = vld [vmem:[%s5813_s1] sm:$0xf]  ;;  %v3530_v19 = vld [vmem:[%s5813_s1 + $0xc] sm:$0xf0] }
  0x12   :  { %v3087_v17 = vor.u32 %v3532_v14, %v3084_v15  ;;  %v3528_v20 = vld [vmem:[%s5813_s1 + $0x4] sm:$0xf]  ;;  %v3068_v21 = vld [vmem:[%s5813_s1 + $0x10] sm:$0xf0]  ;;  %v3122_v22 = vld [vmem:[%s5813_s1 + $0x68] sm:$0xf]  ;;  %v3067_v26 = vor.u32 %v3530_v19, %v3066_v18 }
  0x13   :  { %v3543_v23 = vld [vmem:[%s5813_s1 + $0x74] sm:$0xf0]  ;;  %v3541_v24 = vld [vmem:[%s5813_s1 + $0x6c] sm:$0xf]  ;;  %v3124_v25 = vld [vmem:[%s5813_s1 + $0x78] sm:$0xf0]  ;;  %v3071_v27 = vor.u32 %v3528_v20, %v3068_v21 }
  0x14   :  { %335 = vmatpush.bf16.msra.mxu0 %v3099_v10  ;;  %3720 = vmatpush.bf16.msra.mxu2 %v3099_v10  ;;  %v3123_v28 = vor.u32 %v3543_v23, %v3122_v22  ;;  %v3127_v29 = vor.u32 %v3541_v24, %v3124_v25  ;;  %v4488_v30 = vld [vmem:[%s5812_s0] sm:$0xff]  ;;  %vm281_vm0 = vcmask 523264   ;;  %v3106_v32 = vld [vmem:[%s5813_s1 + $0x48] sm:$0xf]  ;;  %v3539_v33 = vld [vmem:[%s5813_s1 + $0x54] sm:$0xf0] }
  0x15   :  { %424 = vmatpush.bf16.msra.mxu1 %v3103_v11  ;;  %3724 = vmatpush.bf16.msra.mxu3 %v3103_v11  ;;  %v4493_v31 = vld [vmem:[%s5812_s0 + $0x40] sm:$0xff]  ;;  %v3537_v34 = vld [vmem:[%s5813_s1 + $0x4c] sm:$0xf]  ;;  %v3107_v35 = vor.u32 %v3539_v33, %v3106_v32  ;;  %v3108_v36 = vld [vmem:[%s5813_s1 + $0x58] sm:$0xf0]  ;;  %s2981_s11 = sshll.u32 %s5820_s8, 4  ;;  %s2982_s11 = int_to_ptr.hbm [resolvable:$true] %s2981_s11 }
  0x16   :  { %v3111_v37 = vor.u32 %v3537_v34, %v3108_v36  ;;  %v4518_v38 = vld [vmem:[%s5812_s0 + $0x8] sm:$0xff]  ;;  %v4532_v40 = vld [vmem:[%s5812_s0 + $0x10] sm:$0xff]  ;;  %v3535_v43 = vld [vmem:[%s5813_s1 + $0x34] sm:$0xf0]  ;;  %s4367_s8 = smov [#allocation7]   ;;  %s2968_s12 = sshll.u32 %s5819_s7, 4  ;;  %s2969_s12 = int_to_ptr.hbm [resolvable:$true] %s2968_s12 }
  0x17   :  { %v3521_v39 = vld [vmem:[%s5812_s0 + $0x48] sm:$0xff]  ;;  %v3522_v41 = vld [vmem:[%s5812_s0 + $0x50] sm:$0xff]  ;;  %v3092_v46 = vld [vmem:[%s5813_s1 + $0x38] sm:$0xf0] }
  0x18   :  { %336 = vmatpush.bf16.msra.mxu0 %v3083_v16  ;;  %3721 = vmatpush.bf16.msra.mxu2 %v3083_v16  ;;  %v3090_v42 = vld [vmem:[%s5813_s1 + $0x28] sm:$0xf]  ;;  %v3533_v44 = vld [vmem:[%s5813_s1 + $0x2c] sm:$0xf]  ;;  %v4558_v48 = vld [vmem:[%s5812_s0 + $0x18] sm:$0xff] }
  0x19   :  { %425 = vmatpush.bf16.msra.mxu1 %v3087_v17  ;;  %3725 = vmatpush.bf16.msra.mxu3 %v3087_v17  ;;  %v3091_v45 = vor.u32 %v3535_v43, %v3090_v42  ;;  %v3095_v47 = vor.u32 %v3533_v44, %v3092_v46  ;;  %v3523_v49 = vld [vmem:[%s5812_s0 + $0x58] sm:$0xff]  ;;  %v4572_v50 = vld [vmem:[%s5812_s0 + $0x20] sm:$0xff]  ;;  %v3074_v52 = vld [vmem:[%s5813_s1 + $0x8] sm:$0xf] }
  0x1a   :  { %v3524_v51 = vld [vmem:[%s5812_s0 + $0x60] sm:$0xff]  ;;  %v3531_v53 = vld [vmem:[%s5813_s1 + $0x14] sm:$0xf0]  ;;  %v3529_v54 = vld [vmem:[%s5813_s1 + $0xc] sm:$0xf] }
  0x1b   :  { %v3075_v55 = vor.u32 %v3531_v53, %v3074_v52  ;;  %v3076_v56 = vld [vmem:[%s5813_s1 + $0x18] sm:$0xf0]  ;;  %v4598_v58 = vld [vmem:[%s5812_s0 + $0x28] sm:$0xff]  ;;  %v3250_v60 = vld [vmem:[#allocation2 + $0x70] sm:$0xf] }
  0x1c   :  { %337 = vmatpush.bf16.msra.mxu0 %v3067_v26  ;;  %3722 = vmatpush.bf16.msra.mxu2 %v3067_v26  ;;  %v3079_v57 = vor.u32 %v3529_v54, %v3076_v56  ;;  %v3525_v59 = vld [vmem:[%s5812_s0 + $0x68] sm:$0xff]  ;;  %v3559_v61 = vld [vmem:[#allocation2 + $0x74] sm:$0xf0]  ;;  %v3314_v62 = vld [vmem:[#allocation2 + $0xf0] sm:$0xf] }
  0x1d   :  { %426 = vmatpush.bf16.msra.mxu1 %v3071_v27  ;;  %3726 = vmatpush.bf16.msra.mxu3 %v3071_v27  ;;  %v3251_v63 = vor.u32 %v3559_v61, %v3250_v60  ;;  %v3575_v0 = vld [vmem:[#allocation2 + $0xf4] sm:$0xf0]  ;;  %v3242_v1 = vld [vmem:[#allocation2 + $0x60] sm:$0xf]  ;;  %v3557_v2 = vld [vmem:[#allocation2 + $0x64] sm:$0xf0] }
  0x1e   :  { %v3315_v3 = vor.u32 %v3575_v0, %v3314_v62  ;;  %v3306_v4 = vld [vmem:[#allocation2 + $0xe0] sm:$0xf]  ;;  %v3573_v5 = vld [vmem:[#allocation2 + $0xe4] sm:$0xf0]  ;;  %v3243_v6 = vor.u32 %v3557_v2, %v3242_v1  ;;  %v3234_v8 = vld [vmem:[#allocation2 + $0x50] sm:$0xf] }
  0x1f   :  { %3128 = vmatmul.msk.bf16.vlgmr.msra.gmra.mxu0 %vm281_vm0, %v4488_v30  ;;  %3136 = vmatmul.msk.bf16.vlgmr.msra.gmra.mxu2 %vm281_vm0, %v4493_v31  ;;  %v3307_v7 = vor.u32 %v3573_v5, %v3306_v4  ;;  %v3555_v9 = vld [vmem:[#allocation2 + $0x54] sm:$0xf0]  ;;  %v3298_v10 = vld [vmem:[#allocation2 + $0xd0] sm:$0xf]  ;;  %v3226_v16 = vld [vmem:[#allocation2 + $0x40] sm:$0xf] }
  0x20   :  { %512 = vmatpush.bf16.msrb.mxu2 %v3123_v28  ;;  %3144 = vmatmul.msk.bf16.vlgmr.msra.gmra.mxu1 %vm281_vm0, %v4488_v30  ;;  %v3571_v11 = vld [vmem:[#allocation2 + $0xd4] sm:$0xf0]  ;;  %v3235_v12 = vor.u32 %v3555_v9, %v3234_v8  ;;  %v4612_v14 = vld [vmem:[%s5812_s0 + $0x30] sm:$0xff]  ;;  %v3553_v17 = vld [vmem:[#allocation2 + $0x44] sm:$0xf0] }
  0x21   :  { %601 = vmatpush.bf16.msrb.mxu3 %v3127_v29  ;;  %1268 = vmatpush.bf16.msrb.mxu0 %v3251_v63  ;;  %v3299_v13 = vor.u32 %v3571_v11, %v3298_v10  ;;  %v3526_v15 = vld [vmem:[%s5812_s0 + $0x70] sm:$0xff]  ;;  %v3290_v18 = vld [vmem:[#allocation2 + $0xc0] sm:$0xf]  ;;  %v3227_v19 = vor.u32 %v3553_v17, %v3226_v16  ;;  %v3569_v20 = vld [vmem:[#allocation2 + $0xc4] sm:$0xf0] }
  0x22   :  { %3152 = vmatmul.msk.bf16.vlgmr.msra.gmra.mxu3 %vm281_vm0, %v4493_v31  ;;  %1357 = vmatpush.bf16.msrb.mxu1 %v3315_v3  ;;  %v3291_v21 = vor.u32 %v3569_v20, %v3290_v18  ;;  %v3218_v22 = vld [vmem:[#allocation2 + $0x30] sm:$0xf]  ;;  %v3551_v23 = vld [vmem:[#allocation2 + $0x34] sm:$0xf0]  ;;  %v3210_v36 = vld [vmem:[#allocation2 + $0x20] sm:$0xf] }
  0x23   :  { %v3378_v24 = vld [vmem:[#allocation2 + $0x170] sm:$0xf]  ;;  %v3591_v25 = vld [vmem:[#allocation2 + $0x174] sm:$0xf0]  ;;  %v3219_v26 = vor.u32 %v3551_v23, %v3218_v22  ;;  %v3565_v42 = vld [vmem:[#allocation2 + $0xa4] sm:$0xf0] }
  0x24   :  { %513 = vmatpush.bf16.msrb.mxu2 %v3107_v35  ;;  %v3282_v27 = vld [vmem:[#allocation2 + $0xb0] sm:$0xf]  ;;  %v3379_v28 = vor.u32 %v3591_v25, %v3378_v24  ;;  %v3567_v29 = vld [vmem:[#allocation2 + $0xb4] sm:$0xf0]  ;;  %v3194_v54 = vld [vmem:[#allocation2] sm:$0xf] }
  0x25   :  { %602 = vmatpush.bf16.msrb.mxu3 %v3111_v37  ;;  %1269 = vmatpush.bf16.msrb.mxu0 %v3243_v6  ;;  %v3442_v32 = vld [vmem:[#allocation2 + $0x1f0] sm:$0xf]  ;;  %v3607_v33 = vld [vmem:[#allocation2 + $0x1f4] sm:$0xf0]  ;;  %v3283_v34 = vor.u32 %v3567_v29, %v3282_v27  ;;  %v3549_v37 = vld [vmem:[#allocation2 + $0x24] sm:$0xf0] }
  0x26   :  { %1358 = vmatpush.bf16.msrb.mxu1 %v3307_v7  ;;  %v3443_v35 = vor.u32 %v3607_v33, %v3442_v32  ;;  %v3202_v44 = vld [vmem:[#allocation2 + $0x10] sm:$0xf]  ;;  %v4626_v52 = vld [vmem:[%s5812_s0 + $0x38] sm:$0xff]  ;;  %v3258_v56 = vld [vmem:[#allocation2 + $0x80] sm:$0xf] }
  0x27   :  { %v3266_v46 = vld [vmem:[#allocation2 + $0x90] sm:$0xf]  ;;  %v3527_v53 = vld [vmem:[%s5812_s0 + $0x78] sm:$0xff]  ;;  %v4640_v61 = vld [vmem:[%s5814_s2] sm:$0xf] }
  0x28   :  { %514 = vmatpush.bf16.msrb.mxu2 %v3091_v45  ;;  %v3547_v45 = vld [vmem:[#allocation2 + $0x14] sm:$0xf0]  ;;  %v4643_v0 = vperm.slane %v4640_v61, 1  ;;  %v4646_v1 = vperm.slane %v4640_v61, 0  ;;  %v3370_v2 = vld [vmem:[#allocation2 + $0x160] sm:$0xf] }
  0x29   :  { %603 = vmatpush.bf16.msrb.mxu3 %v3095_v47  ;;  %1270 = vmatpush.bf16.msrb.mxu0 %v3235_v12  ;;  %v3203_v47 = vor.u32 %v3547_v45, %v3202_v44  ;;  %v3589_v3 = vld [vmem:[#allocation2 + $0x164] sm:$0xf0]  ;;  %v3434_v6 = vld [vmem:[#allocation2 + $0x1e0] sm:$0xf] }
  0x2a   :  { %1359 = vmatpush.bf16.msrb.mxu1 %v3299_v13  ;;  %v3371_v5 = vor.u32 %v3589_v3, %v3370_v2  ;;  %v3605_v7 = vld [vmem:[#allocation2 + $0x1e4] sm:$0xf0] }
  0x2b   :  { %v3435_v10 = vor.u32 %v3605_v7, %v3434_v6 }
  0x2c   :  { %515 = vmatpush.bf16.msrb.mxu2 %v3075_v55  ;;  %v3545_v55 = vld [vmem:[#allocation2 + $0x4] sm:$0xf0] }
  0x2d   :  { %604 = vmatpush.bf16.msrb.mxu3 %v3079_v57  ;;  %1271 = vmatpush.bf16.msrb.mxu0 %v3227_v19  ;;  %v3195_v57 = vor.u32 %v3545_v55, %v3194_v54 }
  0x2e   :  { %1360 = vmatpush.bf16.msrb.mxu1 %v3291_v21 }
  0x2f   :  { %3129 = vmatmul.msk.bf16.gmra.mxu0 %vm281_vm0, %v4518_v38  ;;  %3137 = vmatmul.msk.bf16.gmra.mxu2 %vm281_vm0, %v3521_v39 }
  0x30   :  { %3145 = vmatmul.msk.bf16.gmra.mxu1 %vm281_vm0, %v4518_v38  ;;  %1446 = vmatpush.bf16.msra.mxu2 %v3379_v28 }
  0x31   :  { %1272 = vmatpush.bf16.msrb.mxu0 %v3219_v26  ;;  %1535 = vmatpush.bf16.msra.mxu3 %v3443_v35 }
  0x32   :  { %3153 = vmatmul.msk.bf16.gmra.mxu3 %vm281_vm0, %v3521_v39  ;;  %v3274_v39 = vld [vmem:[#allocation2 + $0xa0] sm:$0xf]  ;;  %1361 = vmatpush.bf16.msrb.mxu1 %v3283_v34 }
  0x33   :  { %v3275_v43 = vor.u32 %v3565_v42, %v3274_v39 }
  0x34   :  { %1447 = vmatpush.bf16.msra.mxu2 %v3371_v5  ;;  %v3587_v5 = vld [vmem:[#allocation2 + $0x154] sm:$0xf0] }
  0x35   :  { %1536 = vmatpush.bf16.msra.mxu3 %v3435_v10  ;;  %v3603_v10 = vld [vmem:[#allocation2 + $0x1d4] sm:$0xf0] }
  0x36   :  { %1362 = vmatpush.bf16.msrb.mxu1 %v3275_v43 }
  0x3f   :  { %3130 = vmatmul.msk.bf16.gmra.mxu0 %vm281_vm0, %v4532_v40  ;;  %3138 = vmatmul.msk.bf16.gmra.mxu2 %vm281_vm0, %v3522_v41 }
  0x40   :  { %3146 = vmatmul.msk.bf16.gmra.mxu1 %vm281_vm0, %v4532_v40 }
  0x42   :  { %3154 = vmatmul.msk.bf16.gmra.mxu3 %vm281_vm0, %v3522_v41  ;;  %v3211_v41 = vor.u32 %v3549_v37, %v3210_v36 }
  0x44   :  { %1273 = vmatpush.bf16.msrb.mxu0 %v3211_v41 }
  0x48   :  { %1274 = vmatpush.bf16.msrb.mxu0 %v3203_v47 }
  0x4c   :  { %1275 = vmatpush.bf16.msrb.mxu0 %v3195_v57 }
  0x4f   :  { %3131 = vmatmul.msk.bf16.gmra.mxu0 %vm281_vm0, %v4558_v48  ;;  %3139 = vmatmul.msk.bf16.gmra.mxu2 %vm281_vm0, %v3523_v49 }
  0x50   :  { %3147 = vmatmul.msk.bf16.gmra.mxu1 %vm281_vm0, %v4558_v48 }
  0x52   :  { %3155 = vmatmul.msk.bf16.gmra.mxu3 %vm281_vm0, %v3523_v49  ;;  %v3563_v49 = vld [vmem:[#allocation2 + $0x94] sm:$0xf0] }
  0x5f   :  { %3132 = vmatmul.msk.bf16.gmra.mxu0 %vm281_vm0, %v4572_v50  ;;  %3140 = vmatmul.msk.bf16.gmra.mxu2 %vm281_vm0, %v3524_v51 }
  0x60   :  { %3148 = vmatmul.msk.bf16.gmra.mxu1 %vm281_vm0, %v4572_v50 }
  0x62   :  { %3156 = vmatmul.msk.bf16.gmra.mxu3 %vm281_vm0, %v3524_v51  ;;  %v3267_v51 = vor.u32 %v3563_v49, %v3266_v46 }
  0x64   :  { %1363 = vmatpush.bf16.msrb.mxu1 %v3267_v51 }
  0x6f   :  { %3133 = vmatmul.msk.bf16.gmra.mxu0 %vm281_vm0, %v4598_v58  ;;  %3141 = vmatmul.msk.bf16.gmra.mxu2 %vm281_vm0, %v3525_v59 }
  0x70   :  { %3149 = vmatmul.msk.bf16.gmra.mxu1 %vm281_vm0, %v4598_v58 }
  0x72   :  { %3157 = vmatmul.msk.bf16.gmra.mxu3 %vm281_vm0, %v3525_v59  ;;  %v3561_v59 = vld [vmem:[#allocation2 + $0x84] sm:$0xf0] }
  0x73   :  { %v3259_v60 = vor.u32 %v3561_v59, %v3258_v56 }
  0x75   :  { %1364 = vmatpush.bf16.msrb.mxu1 %v3259_v60 }
  0x7f   :  { %3134 = vmatmul.msk.bf16.gmra.mxu0 %vm281_vm0, %v4612_v14  ;;  %3142 = vmatmul.msk.bf16.gmra.mxu2 %vm281_vm0, %v3526_v15 }
  0x80   :  { %3150 = vmatmul.msk.bf16.gmra.mxu1 %vm281_vm0, %v4612_v14 }
  0x82   :  { %3158 = vmatmul.msk.bf16.gmra.mxu3 %vm281_vm0, %v3526_v15 }
  0x8f   :  { %3135 = vmatmul.msk.bf16.gmra.mxu0 %vm281_vm0, %v4626_v52  ;;  %3143 = vmatmul.msk.bf16.gmra.mxu2 %vm281_vm0, %v3527_v53 }
  0x90   :  { %3151 = vmatmul.msk.bf16.gmra.mxu1 %vm281_vm0, %v4626_v52 }
  0x92   :  { %3159 = vmatmul.msk.bf16.gmra.mxu3 %vm281_vm0, %v3527_v53 }
  0x9c   :  { %v339_v62 = vpop.f32.mrf.mxu0 }
  0x9d   :  { %v428_v63 = vpop.f32.mrf.mxu1  ;;  %v340_v4 = vadd.f32 %v339_v62, %v4646_v1 }
  0x9e   :  { %v429_v8 = vadd.f32 %v428_v63, %v4643_v0 }
  0x9f   :  { %3160 = vmatmul.msk.bf16.vlgmr.msrb.gmra.mxu2 %vm281_vm0, %v4488_v30  ;;  %3736 = vtanh.f32 %v340_v4  ;;  %v3362_v4 = vld [vmem:[#allocation2 + $0x150] sm:$0xf] }
  0xa0   :  { %3738 = vtanh.f32 %v429_v8  ;;  %v3363_v8 = vor.u32 %v3587_v5, %v3362_v4 }
  0xa2   :  { %3176 = vmatmul.msk.bf16.vlgmr.msrb.gmra.mxu3 %vm281_vm0, %v4488_v30  ;;  %v379_v9 = vpop.f32.mrf.mxu2  ;;  %1448 = vmatpush.bf16.msra.mxu2 %v3363_v8 }
  0xa3   :  { %v380_v16 = vadd.f32 %v379_v9, %v4646_v1  ;;  %v3426_v9 = vld [vmem:[#allocation2 + $0x1d0] sm:$0xf] }
  0xa4   :  { %v341_v12 = vpop.f32.mrf.mxu0 }
  0xa5   :  { %v468_v11 = vpop.f32.mrf.mxu3  ;;  %v342_v13 = vadd.f32 %v341_v12, %v4646_v1  ;;  %v430_v15 = vpop.f32.mrf.mxu1 }
  0xa6   :  { %v431_v30 = vadd.f32 %v430_v15, %v4643_v0  ;;  %v469_v17 = vadd.f32 %v468_v11, %v4643_v0  ;;  %v3737_v19 = vpop.eup %3736  ;;  %v3427_v15 = vor.u32 %v3603_v10, %v3426_v9 }
  0xa7   :  { %3740 = vtanh.f32 %v342_v13  ;;  %v3739_v22 = vpop.eup %3738 }
  0xa8   :  { %3742 = vtanh.f32 %v431_v30  ;;  %1537 = vmatpush.bf16.msra.mxu3 %v3427_v15 }
  0xa9   :  { %3744 = vtanh.f32 %v380_v16 }
  0xaa   :  { %v381_v18 = vpop.f32.mrf.mxu2  ;;  %3746 = vtanh.f32 %v469_v17 }
  0xab   :  { %v382_v20 = vadd.f32 %v381_v18, %v4646_v1 }
  0xac   :  { %v344_v24 = vpop.f32.mrf.mxu0 }
  0xad   :  { %v470_v21 = vpop.f32.mrf.mxu3  ;;  %v3741_v25 = vpop.eup %3740  ;;  %3748 = vtanh.f32 %v382_v20  ;;  %v345_v33 = vadd.f32 %v344_v24, %v4646_v1 }
  0xae   :  { %v471_v23 = vadd.f32 %v470_v21, %v4643_v0  ;;  %v433_v26 = vpop.f32.mrf.mxu1  ;;  %v3743_v27 = vpop.eup %3742  ;;  %v4660_v28 = vpack.c.bf16 %v3741_v25, %v3737_v19 }
  0xaf   :  { %3161 = vmatmul.msk.bf16.gmra.mxu2 %vm281_vm0, %v4518_v38  ;;  %v4664_v29 = vpack.c.bf16 %v3743_v27, %v3739_v22  ;;  %v3745_v32 = vpop.eup %3744  ;;  %v434_v35 = vadd.f32 %v433_v26, %v4643_v0 }
  0xb0   :  { %3750 = vtanh.f32 %v471_v23  ;;  %1276 = vmatmul.bf16.vlgmr.msrb.gmra.mxu0 %v4660_v28  ;;  %v3747_v34 = vpop.eup %3746 }
  0xb1   :  { %1365 = vmatmul.bf16.vlgmr.msrb.gmra.mxu1 %v4664_v29  ;;  %3752 = vtanh.f32 %v345_v33 }
  0xb2   :  { %3177 = vmatmul.msk.bf16.gmra.mxu3 %vm281_vm0, %v4518_v38  ;;  %v384_v36 = vpop.f32.mrf.mxu2  ;;  %3754 = vtanh.f32 %v434_v35 }
  0xb3   :  { %v3749_v37 = vpop.eup %3748  ;;  %v385_v47 = vadd.f32 %v384_v36, %v4646_v1 }
  0xb4   :  { %v346_v42 = vpop.f32.mrf.mxu0  ;;  %v4672_v43 = vpack.c.bf16 %v3749_v37, %v3745_v32 }
  0xb5   :  { %v473_v39 = vpop.f32.mrf.mxu3  ;;  %v347_v38 = vadd.f32 %v346_v42, %v4646_v1 }
  0xb6   :  { %v3751_v41 = vpop.eup %3750  ;;  %v435_v44 = vpop.f32.mrf.mxu1  ;;  %v474_v49 = vadd.f32 %v473_v39, %v4643_v0 }
  0xb7   :  { %v4675_v45 = vpack.c.bf16 %v3751_v41, %v3747_v34  ;;  %v436_v46 = vadd.f32 %v435_v44, %v4643_v0  ;;  %3756 = vtanh.f32 %v347_v38  ;;  %v3753_v53 = vpop.eup %3752 }
  0xb8   :  { %v3755_v56 = vpop.eup %3754 }
  0xb9   :  { %3758 = vtanh.f32 %v436_v46 }
  0xba   :  { %v386_v51 = vpop.f32.mrf.mxu2  ;;  %3760 = vtanh.f32 %v385_v47 }
  0xbb   :  { %v387_v54 = vadd.f32 %v386_v51, %v4646_v1  ;;  %3762 = vtanh.f32 %v474_v49 }
  0xbc   :  { %v349_v59 = vpop.f32.mrf.mxu0 }
  0xbd   :  { %v475_v55 = vpop.f32.mrf.mxu3  ;;  %v3757_v60 = vpop.eup %3756  ;;  %3764 = vtanh.f32 %v387_v54  ;;  %v350_v7 = vadd.f32 %v349_v59, %v4646_v1 }
  0xbe   :  { %v476_v57 = vadd.f32 %v475_v55, %v4643_v0  ;;  %v438_v62 = vpop.f32.mrf.mxu1  ;;  %v4682_v2 = vpack.c.bf16 %v3757_v60, %v3753_v53 }
  0xbf   :  { %v3759_v63 = vpop.eup %3758  ;;  %3162 = vmatmul.msk.bf16.gmra.mxu2 %vm281_vm0, %v4532_v40  ;;  %v439_v12 = vadd.f32 %v438_v62, %v4643_v0 }
  0xc0   :  { %3766 = vtanh.f32 %v476_v57  ;;  %v4686_v3 = vpack.c.bf16 %v3759_v63, %v3755_v56  ;;  %1281 = vmatmul.bf16.gmra.mxu0 %v4682_v2  ;;  %v3761_v6 = vpop.eup %3760 }
  0xc1   :  { %v3763_v11 = vpop.eup %3762  ;;  %3768 = vtanh.f32 %v350_v7 }
  0xc2   :  { %3178 = vmatmul.msk.bf16.gmra.mxu3 %vm281_vm0, %v4532_v40  ;;  %1370 = vmatmul.bf16.gmra.mxu1 %v4686_v3  ;;  %v389_v13 = vpop.f32.mrf.mxu2  ;;  %3770 = vtanh.f32 %v439_v12 }
  0xc3   :  { %v3765_v30 = vpop.eup %3764  ;;  %v390_v23 = vadd.f32 %v389_v13, %v4646_v1 }
  0xc4   :  { %v351_v17 = vpop.f32.mrf.mxu0  ;;  %v4694_v18 = vpack.c.bf16 %v3765_v30, %v3761_v6 }
  0xc5   :  { %v478_v16 = vpop.f32.mrf.mxu3  ;;  %v352_v19 = vadd.f32 %v351_v17, %v4646_v1 }
  0xc6   :  { %v3767_v40 = vpop.eup %3766  ;;  %v440_v20 = vpop.f32.mrf.mxu1  ;;  %v479_v24 = vadd.f32 %v478_v16, %v4643_v0  ;;  %v3354_v16 = vld [vmem:[#allocation2 + $0x140] sm:$0xf] }
  0xc7   :  { %v4697_v21 = vpack.c.bf16 %v3767_v40, %v3763_v11  ;;  %v441_v22 = vadd.f32 %v440_v20, %v4643_v0  ;;  %3772 = vtanh.f32 %v352_v19  ;;  %v3769_v26 = vpop.eup %3768  ;;  %v3585_v40 = vld [vmem:[#allocation2 + $0x144] sm:$0xf0] }
  0xc8   :  { %v3771_v33 = vpop.eup %3770  ;;  %v3355_v20 = vor.u32 %v3585_v40, %v3354_v16 }
  0xc9   :  { %3774 = vtanh.f32 %v441_v22  ;;  %v3418_v22 = vld [vmem:[#allocation2 + $0x1c0] sm:$0xf] }
  0xca   :  { %v391_v25 = vpop.f32.mrf.mxu2  ;;  %3776 = vtanh.f32 %v390_v23  ;;  %v3601_v23 = vld [vmem:[#allocation2 + $0x1c4] sm:$0xf0]  ;;  %1449 = vmatpush.bf16.msra.mxu2 %v3355_v20 }
  0xcb   :  { %v392_v27 = vadd.f32 %v391_v25, %v4646_v1  ;;  %3778 = vtanh.f32 %v479_v24 }
  0xcc   :  { %v354_v35 = vpop.f32.mrf.mxu0 }
  0xcd   :  { %v480_v32 = vpop.f32.mrf.mxu3  ;;  %v3773_v36 = vpop.eup %3772  ;;  %3780 = vtanh.f32 %v392_v27  ;;  %v355_v44 = vadd.f32 %v354_v35, %v4646_v1  ;;  %v3419_v27 = vor.u32 %v3601_v23, %v3418_v22 }
  0xce   :  { %v481_v34 = vadd.f32 %v480_v32, %v4643_v0  ;;  %v443_v37 = vpop.f32.mrf.mxu1  ;;  %v4704_v41 = vpack.c.bf16 %v3773_v36, %v3769_v26 }
  0xcf   :  { %v3775_v39 = vpop.eup %3774  ;;  %3163 = vmatmul.msk.bf16.gmra.mxu2 %vm281_vm0, %v4558_v48  ;;  %v444_v47 = vadd.f32 %v443_v37, %v4643_v0  ;;  %1538 = vmatpush.bf16.msra.mxu3 %v3419_v27 }
  0xd0   :  { %3782 = vtanh.f32 %v481_v34  ;;  %v4708_v42 = vpack.c.bf16 %v3775_v39, %v3771_v33  ;;  %1286 = vmatmul.bf16.gmra.mxu0 %v4704_v41  ;;  %v3777_v38 = vpop.eup %3776 }
  0xd1   :  { %v3779_v46 = vpop.eup %3778  ;;  %3784 = vtanh.f32 %v355_v44 }
  0xd2   :  { %3179 = vmatmul.msk.bf16.gmra.mxu3 %vm281_vm0, %v4558_v48  ;;  %1375 = vmatmul.bf16.gmra.mxu1 %v4708_v42  ;;  %v394_v49 = vpop.f32.mrf.mxu2  ;;  %3786 = vtanh.f32 %v444_v47 }
  0xd3   :  { %v3781_v51 = vpop.eup %3780  ;;  %v395_v62 = vadd.f32 %v394_v49, %v4646_v1 }
  0xd4   :  { %v356_v55 = vpop.f32.mrf.mxu0  ;;  %v4716_v56 = vpack.c.bf16 %v3781_v51, %v3777_v38 }
  0xd5   :  { %v483_v53 = vpop.f32.mrf.mxu3  ;;  %v357_v48 = vadd.f32 %v356_v55, %v4646_v1 }
  0xd6   :  { %v3783_v54 = vpop.eup %3782  ;;  %5854 = vst [vmem:[#allocation14_spill] sm:$0xff] %v4716_v56  ;;  %v445_v57 = vpop.f32.mrf.mxu1  ;;  %v484_v63 = vadd.f32 %v483_v53, %v4643_v0 }
  0xd7   :  { %v4719_v59 = vpack.c.bf16 %v3783_v54, %v3779_v46  ;;  %v446_v60 = vadd.f32 %v445_v57, %v4643_v0  ;;  %3788 = vtanh.f32 %v357_v48  ;;  %v3785_v5 = vpop.eup %3784 }
  0xd8   :  { %v3787_v8 = vpop.eup %3786 }
  0xd9   :  { %5855 = vst [vmem:[#allocation15_spill] sm:$0xff] %v4719_v59  ;;  %3790 = vtanh.f32 %v446_v60 }
  0xda   :  { %v396_v4 = vpop.f32.mrf.mxu2  ;;  %3792 = vtanh.f32 %v395_v62 }
  0xdb   :  { %v397_v6 = vadd.f32 %v396_v4, %v4646_v1  ;;  %3794 = vtanh.f32 %v484_v63 }
  0xdc   :  { %v359_v10 = vpop.f32.mrf.mxu0 }
  0xdd   :  { %v485_v7 = vpop.f32.mrf.mxu3  ;;  %v3789_v11 = vpop.eup %3788  ;;  %3796 = vtanh.f32 %v397_v6  ;;  %v360_v19 = vadd.f32 %v359_v10, %v4646_v1 }
  0xde   :  { %v486_v9 = vadd.f32 %v485_v7, %v4643_v0  ;;  %v448_v12 = vpop.f32.mrf.mxu1  ;;  %v4726_v15 = vpack.c.bf16 %v3789_v11, %v3785_v5 }
  0xdf   :  { %v3791_v13 = vpop.eup %3790  ;;  %3164 = vmatmul.msk.bf16.gmra.mxu2 %vm281_vm0, %v4572_v50  ;;  %v449_v25 = vadd.f32 %v448_v12, %v4643_v0 }
  0xe0   :  { %3798 = vtanh.f32 %v486_v9  ;;  %v4730_v30 = vpack.c.bf16 %v3791_v13, %v3787_v8  ;;  %1291 = vmatmul.bf16.gmra.mxu0 %v4726_v15  ;;  %v3793_v17 = vpop.eup %3792 }
  0xe1   :  { %v3795_v24 = vpop.eup %3794  ;;  %3800 = vtanh.f32 %v360_v19 }
  0xe2   :  { %3180 = vmatmul.msk.bf16.gmra.mxu3 %vm281_vm0, %v4572_v50  ;;  %1380 = vmatmul.bf16.gmra.mxu1 %v4730_v30  ;;  %v399_v26 = vpop.f32.mrf.mxu2  ;;  %3802 = vtanh.f32 %v449_v25 }
  0xe3   :  { %v3797_v32 = vpop.eup %3796  ;;  %v400_v44 = vadd.f32 %v399_v26, %v4646_v1 }
  0xe4   :  { %v361_v34 = vpop.f32.mrf.mxu0  ;;  %v4738_v35 = vpack.c.bf16 %v3797_v32, %v3793_v17 }
  0xe5   :  { %v488_v33 = vpop.f32.mrf.mxu3  ;;  %v362_v36 = vadd.f32 %v361_v34, %v4646_v1 }
  0xe6   :  { %v3799_v50 = vpop.eup %3798  ;;  %5856 = vst [vmem:[#allocation16_spill] sm:$0xff] %v4738_v35  ;;  %v450_v37 = vpop.f32.mrf.mxu1  ;;  %v489_v46 = vadd.f32 %v488_v33, %v4643_v0 }
  0xe7   :  { %v4741_v39 = vpack.c.bf16 %v3799_v50, %v3795_v24  ;;  %v451_v38 = vadd.f32 %v450_v37, %v4643_v0  ;;  %3804 = vtanh.f32 %v362_v36  ;;  %v3801_v49 = vpop.eup %3800 }
  0xe8   :  { %v3803_v54 = vpop.eup %3802 }
  0xe9   :  { %5857 = vst [vmem:[#allocation17_spill] sm:$0xff] %v4741_v39  ;;  %3806 = vtanh.f32 %v451_v38 }
  0xea   :  { %v401_v47 = vpop.f32.mrf.mxu2  ;;  %3808 = vtanh.f32 %v400_v44  ;;  %v3346_v44 = vld [vmem:[#allocation2 + $0x130] sm:$0xf] }
  0xeb   :  { %v402_v51 = vadd.f32 %v401_v47, %v4646_v1  ;;  %3810 = vtanh.f32 %v489_v46  ;;  %v3583_v46 = vld [vmem:[#allocation2 + $0x134] sm:$0xf0] }
  0xec   :  { %v364_v48 = vpop.f32.mrf.mxu0 }
  0xed   :  { %v490_v53 = vpop.f32.mrf.mxu3  ;;  %v3805_v57 = vpop.eup %3804  ;;  %3812 = vtanh.f32 %v402_v51  ;;  %v365_v6 = vadd.f32 %v364_v48, %v4646_v1  ;;  %v3347_v51 = vor.u32 %v3583_v46, %v3346_v44 }
  0xee   :  { %v491_v55 = vadd.f32 %v490_v53, %v4643_v0  ;;  %v453_v60 = vpop.f32.mrf.mxu1  ;;  %v4748_v63 = vpack.c.bf16 %v3805_v57, %v3801_v49  ;;  %v3410_v53 = vld [vmem:[#allocation2 + $0x1b0] sm:$0xf] }
  0xef   :  { %v3807_v62 = vpop.eup %3806  ;;  %3165 = vmatmul.msk.bf16.gmra.mxu2 %vm281_vm0, %v4598_v58  ;;  %v454_v8 = vadd.f32 %v453_v60, %v4643_v0 }
  0xf0   :  { %3814 = vtanh.f32 %v491_v55  ;;  %v4752_v4 = vpack.c.bf16 %v3807_v62, %v3803_v54  ;;  %1296 = vmatmul.bf16.gmra.mxu0 %v4748_v63  ;;  %v3809_v5 = vpop.eup %3808  ;;  %v3599_v54 = vld [vmem:[#allocation2 + $0x1b4] sm:$0xf0]  ;;  %1450 = vmatpush.bf16.msra.mxu2 %v3347_v51 }
  0xf1   :  { %v3811_v7 = vpop.eup %3810  ;;  %3816 = vtanh.f32 %v365_v6  ;;  %v3411_v60 = vor.u32 %v3599_v54, %v3410_v53 }
  0xf2   :  { %3181 = vmatmul.msk.bf16.gmra.mxu3 %vm281_vm0, %v4598_v58  ;;  %1385 = vmatmul.bf16.gmra.mxu1 %v4752_v4  ;;  %v404_v9 = vpop.f32.mrf.mxu2  ;;  %3818 = vtanh.f32 %v454_v8 }
  0xf3   :  { %v3813_v10 = vpop.eup %3812  ;;  %v405_v20 = vadd.f32 %v404_v9, %v4646_v1  ;;  %1539 = vmatpush.bf16.msra.mxu3 %v3411_v60 }
  0xf4   :  { %v366_v13 = vpop.f32.mrf.mxu0  ;;  %v4760_v16 = vpack.c.bf16 %v3813_v10, %v3809_v5 }
  0xf5   :  { %v493_v11 = vpop.f32.mrf.mxu3  ;;  %v367_v58 = vadd.f32 %v366_v13, %v4646_v1 }
  0xf6   :  { %v3815_v12 = vpop.eup %3814  ;;  %5858 = vst [vmem:[#allocation18_spill] sm:$0xff] %v4760_v16  ;;  %v455_v40 = vpop.f32.mrf.mxu1  ;;  %v494_v22 = vadd.f32 %v493_v11, %v4643_v0 }
  0xf7   :  { %v4763_v17 = vpack.c.bf16 %v3815_v12, %v3811_v7  ;;  %v456_v19 = vadd.f32 %v455_v40, %v4643_v0  ;;  %3820 = vtanh.f32 %v367_v58  ;;  %v3817_v24 = vpop.eup %3816 }
  0xf8   :  { %v3819_v27 = vpop.eup %3818 }
  0xf9   :  { %5859 = vst [vmem:[#allocation19_spill] sm:$0xff] %v4763_v17  ;;  %3822 = vtanh.f32 %v456_v19 }
  0xfa   :  { %v406_v23 = vpop.f32.mrf.mxu2  ;;  %3824 = vtanh.f32 %v405_v20 }
  0xfb   :  { %v407_v25 = vadd.f32 %v406_v23, %v4646_v1  ;;  %3826 = vtanh.f32 %v494_v22 }
  0xfc   :  { %v369_v33 = vpop.f32.mrf.mxu0 }
  0xfd   :  { %v495_v26 = vpop.f32.mrf.mxu3  ;;  %v3821_v50 = vpop.eup %3820  ;;  %3828 = vtanh.f32 %v407_v25  ;;  %v370_v49 = vadd.f32 %v369_v33, %v4646_v1 }
  0xfe   :  { %v496_v32 = vadd.f32 %v495_v26, %v4643_v0  ;;  %v458_v34 = vpop.f32.mrf.mxu1  ;;  %v4770_v37 = vpack.c.bf16 %v3821_v50, %v3817_v24 }
  0xff   :  { %v3823_v36 = vpop.eup %3822  ;;  %3166 = vmatmul.msk.bf16.gmra.mxu2 %vm281_vm0, %v4612_v14  ;;  %v459_v48 = vadd.f32 %v458_v34, %v4643_v0 }
 0x100   :  { %3830 = vtanh.f32 %v496_v32  ;;  %v4774_v38 = vpack.c.bf16 %v3823_v36, %v3819_v27  ;;  %1301 = vmatmul.bf16.gmra.mxu0 %v4770_v37  ;;  %v3825_v47 = vpop.eup %3824 }
 0x101   :  { %v3827_v55 = vpop.eup %3826  ;;  %3832 = vtanh.f32 %v370_v49 }
 0x102   :  { %3182 = vmatmul.msk.bf16.gmra.mxu3 %vm281_vm0, %v4612_v14  ;;  %1390 = vmatmul.bf16.gmra.mxu1 %v4774_v38  ;;  %v409_v57 = vpop.f32.mrf.mxu2  ;;  %3834 = vtanh.f32 %v459_v48 }
 0x103   :  { %v3829_v62 = vpop.eup %3828  ;;  %v410_v12 = vadd.f32 %v409_v57, %v4646_v1 }
 0x104   :  { %v371_v6 = vpop.f32.mrf.mxu0  ;;  %v4782_v7 = vpack.c.bf16 %v3829_v62, %v3825_v47 }
 0x105   :  { %v498_v5 = vpop.f32.mrf.mxu3  ;;  %v372_v8 = vadd.f32 %v371_v6, %v4646_v1 }
 0x106   :  { %v3831_v14 = vpop.eup %3830  ;;  %5860 = vst [vmem:[#allocation20_spill] sm:$0xff] %v4782_v7  ;;  %v460_v9 = vpop.f32.mrf.mxu1  ;;  %v499_v13 = vadd.f32 %v498_v5, %v4643_v0 }
 0x107   :  { %v4785_v10 = vpack.c.bf16 %v3831_v14, %v3827_v55  ;;  %v461_v11 = vadd.f32 %v460_v9, %v4643_v0  ;;  %3836 = vtanh.f32 %v372_v8  ;;  %v3833_v40 = vpop.eup %3832 }
 0x108   :  { %v3835_v22 = vpop.eup %3834 }
 0x109   :  { %5861 = vst [vmem:[#allocation21_spill] sm:$0xff] %v4785_v10  ;;  %3838 = vtanh.f32 %v461_v11 }
 0x10a   :  { %v411_v58 = vpop.f32.mrf.mxu2  ;;  %3840 = vtanh.f32 %v410_v12 }
 0x10b   :  { %v412_v19 = vadd.f32 %v411_v58, %v4646_v1  ;;  %3842 = vtanh.f32 %v499_v13 }
 0x10c   :  { %v374_v24 = vpop.f32.mrf.mxu0 }
 0x10d   :  { %v500_v20 = vpop.f32.mrf.mxu3  ;;  %v3837_v25 = vpop.eup %3836  ;;  %3844 = vtanh.f32 %v412_v19  ;;  %v375_v34 = vadd.f32 %v374_v24, %v4646_v1  ;;  %v3252_v19 = vld [vmem:[#allocation2 + $0x78] sm:$0xf0] }
 0x10e   :  { %v501_v23 = vadd.f32 %v500_v20, %v4643_v0  ;;  %v463_v26 = vpop.f32.mrf.mxu1  ;;  %v4792_v32 = vpack.c.bf16 %v3837_v25, %v3833_v40  ;;  %v3558_v40 = vld [vmem:[#allocation2 + $0x74] sm:$0xf] }
 0x10f   :  { %v3839_v27 = vpop.eup %3838  ;;  %3167 = vmatmul.msk.bf16.gmra.mxu2 %vm281_vm0, %v4626_v52  ;;  %v464_v44 = vadd.f32 %v463_v26, %v4643_v0  ;;  %v3581_v26 = vld [vmem:[#allocation2 + $0x124] sm:$0xf0] }
 0x110   :  { %3846 = vtanh.f32 %v501_v23  ;;  %v4796_v33 = vpack.c.bf16 %v3839_v27, %v3835_v22  ;;  %1306 = vmatmul.bf16.gmra.mxu0 %v4792_v32  ;;  %v3841_v50 = vpop.eup %3840  ;;  %v3255_v22 = vor.u32 %v3558_v40, %v3252_v19  ;;  %v3338_v23 = vld [vmem:[#allocation2 + $0x120] sm:$0xf] }
 0x111   :  { %v3843_v36 = vpop.eup %3842  ;;  %3848 = vtanh.f32 %v375_v34  ;;  %v3402_v27 = vld [vmem:[#allocation2 + $0x1a0] sm:$0xf] }
 0x112   :  { %3183 = vmatmul.msk.bf16.gmra.mxu3 %vm281_vm0, %v4626_v52  ;;  %1395 = vmatmul.bf16.gmra.mxu1 %v4796_v33  ;;  %v414_v46 = vpop.f32.mrf.mxu2  ;;  %3850 = vtanh.f32 %v464_v44  ;;  %v3339_v44 = vor.u32 %v3581_v26, %v3338_v23 }
 0x113   :  { %v3845_v47 = vpop.eup %3844  ;;  %v415_v60 = vadd.f32 %v414_v46, %v4646_v1  ;;  %1624 = vmatpush.bf16.msra.mxu0 %v3255_v22 }
 0x114   :  { %v376_v53 = vpop.f32.mrf.mxu0  ;;  %v4804_v54 = vpack.c.bf16 %v3845_v47, %v3841_v50  ;;  %v3597_v50 = vld [vmem:[#allocation2 + $0x1a4] sm:$0xf0]  ;;  %1451 = vmatpush.bf16.msra.mxu2 %v3339_v44 }
 0x115   :  { %v503_v49 = vpop.f32.mrf.mxu3  ;;  %v377_v52 = vadd.f32 %v376_v53, %v4646_v1  ;;  %v3403_v46 = vor.u32 %v3597_v50, %v3402_v27  ;;  %v4828_v53 = vperm.slane %v4640_v61, 3 }
 0x116   :  { %v3847_v51 = vpop.eup %3846  ;;  %v465_v55 = vpop.f32.mrf.mxu1  ;;  %v504_v62 = vadd.f32 %v503_v49, %v4643_v0 }
 0x117   :  { %v4807_v48 = vpack.c.bf16 %v3847_v51, %v3843_v36  ;;  %v466_v57 = vadd.f32 %v465_v55, %v4643_v0  ;;  %3852 = vtanh.f32 %v377_v52  ;;  %v3849_v14 = vpop.eup %3848  ;;  %1540 = vmatpush.bf16.msra.mxu3 %v3403_v46 }
 0x118   :  { %v3851_v9 = vpop.eup %3850 }
 0x119   :  { %3854 = vtanh.f32 %v466_v57 }
 0x11a   :  { %v416_v5 = vpop.f32.mrf.mxu2  ;;  %3856 = vtanh.f32 %v415_v60 }
 0x11b   :  { %v417_v6 = vadd.f32 %v416_v5, %v4646_v1  ;;  %3858 = vtanh.f32 %v504_v62  ;;  %v3316_v1 = vld [vmem:[#allocation2 + $0xf8] sm:$0xf0]  ;;  %v942_v62 = vld [vmem:[%s5816_s4] sm:$0x3] }
 0x11d   :  { %v505_v8 = vpop.f32.mrf.mxu3  ;;  %v3853_v12 = vpop.eup %3852  ;;  %3860 = vtanh.f32 %v417_v6 }
 0x11e   :  { %v506_v11 = vadd.f32 %v505_v8, %v4643_v0  ;;  %v4814_v58 = vpack.c.bf16 %v3853_v12, %v3849_v14  ;;  %v3574_v0 = vld [vmem:[#allocation2 + $0xf4] sm:$0xf]  ;;  %v4841_v8 = vperm.slane %v942_v62, 0 }
 0x11f   :  { %v3855_v13 = vpop.eup %3854  ;;  %3168 = vmatmul.msk.bf16.gmra.mxu2 %vm281_vm0, %v4493_v31  ;;  %v3319_v25 = vor.u32 %v3574_v0, %v3316_v1 }
 0x120   :  { %3862 = vtanh.f32 %v506_v11  ;;  %v4818_v20 = vpack.c.bf16 %v3855_v13, %v3851_v9  ;;  %1311 = vmatmul.bf16.gmra.mxu0 %v4814_v58  ;;  %v3857_v24 = vpop.eup %3856  ;;  %v4248_v13 = vld [vmem:[%s5812_s0 + $0x48] sm:$0xff] }
 0x121   :  { %v3859_v34 = vpop.eup %3858  ;;  %1713 = vmatpush.bf16.msra.mxu1 %v3319_v25 }
 0x122   :  { %3184 = vmatmul.msk.bf16.gmra.mxu3 %vm281_vm0, %v4493_v31  ;;  %1400 = vmatmul.bf16.gmra.mxu1 %v4818_v20  ;;  %v517_v36 = vpop.f32.mrf.mxu2  ;;  %v4825_v31 = vperm.slane %v4640_v61, 2 }
 0x123   :  { %v3861_v47 = vpop.eup %3860 }
 0x124   :  { %v4830_v52 = vpack.c.bf16 %v3861_v47, %v3857_v24  ;;  %v518_v57 = vadd.f32 %v517_v36, %v4825_v31 }
 0x125   :  { %v606_v49 = vpop.f32.mrf.mxu3 }
 0x126   :  { %v3863_v51 = vpop.eup %3862  ;;  %5862 = vst [vmem:[#allocation22_spill] sm:$0xff] %v4830_v52  ;;  %v607_v60 = vadd.f32 %v606_v49, %v4828_v53  ;;  %3864 = vtanh.f32 %v518_v57 }
 0x127   :  { %v4832_v55 = vpack.c.bf16 %v3863_v51, %v3859_v34 }
 0x128   :  { %3866 = vtanh.f32 %v607_v60 }
 0x129   :  { %5863 = vst [vmem:[#allocation23_spill] sm:$0xff] %v4832_v55 }
 0x12a   :  { %v519_v5 = vpop.f32.mrf.mxu2 }
 0x12b   :  { %v520_v14 = vadd.f32 %v519_v5, %v4825_v31 }
 0x12c   :  { %v3865_v19 = vpop.eup %3864 }
 0x12d   :  { %v608_v61 = vpop.f32.mrf.mxu3  ;;  %3868 = vtanh.f32 %v520_v14  ;;  %v1277_v9 = vpop.f32.mrf.mxu0  ;;  %v3556_v14 = vld [vmem:[#allocation2 + $0x64] sm:$0xf] }
 0x12e   :  { %v609_v6 = vadd.f32 %v608_v61, %v4828_v53  ;;  %v1278_v11 = vadd.f32 %v1277_v9, %v4841_v8  ;;  %v1366_v12 = vpop.f32.mrf.mxu1  ;;  %v3867_v22 = vpop.eup %3866  ;;  %v3244_v61 = vld [vmem:[#allocation2 + $0x68] sm:$0xf0] }
 0x12f   :  { %3169 = vmatmul.msk.bf16.gmra.mxu2 %vm281_vm0, %v4248_v13  ;;  %v3247_v9 = vor.u32 %v3556_v14, %v3244_v61 }
 0x130   :  { %3870 = vtanh.f32 %v609_v6  ;;  %v4848_v40 = vadd.f32 %v1366_v12, %v1278_v11  ;;  %1316 = vmatmul.bf16.gmra.mxu0 %v4672_v43  ;;  %v4249_v6 = vld [vmem:[%s5812_s0 + $0x50] sm:$0xff]  ;;  %v3572_v12 = vld [vmem:[#allocation2 + $0xe4] sm:$0xf] }
 0x131   :  { %1625 = vmatpush.bf16.msra.mxu0 %v3247_v9 }
 0x132   :  { %3185 = vmatmul.msk.bf16.gmra.mxu3 %vm281_vm0, %v4248_v13  ;;  %1405 = vmatmul.bf16.gmra.mxu1 %v4675_v45  ;;  %v522_v0 = vpop.f32.mrf.mxu2  ;;  %v3308_v13 = vld [vmem:[#allocation2 + $0xe8] sm:$0xf0] }
 0x133   :  { %v3869_v1 = vpop.eup %3868  ;;  %v523_v36 = vadd.f32 %v522_v0, %v4825_v31  ;;  %v3311_v0 = vor.u32 %v3572_v12, %v3308_v13 }
 0x134   :  { %v4853_v25 = vpack.c.bf16 %v3869_v1, %v3865_v19  ;;  %v3330_v19 = vld [vmem:[#allocation2 + $0x110] sm:$0xf]  ;;  %v3579_v1 = vld [vmem:[#allocation2 + $0x114] sm:$0xf0] }
 0x135   :  { %v611_v23 = vpop.f32.mrf.mxu3  ;;  %v1279_v27 = vpop.f32.mrf.mxu0  ;;  %3872 = vtanh.f32 %v523_v36  ;;  %1714 = vmatpush.bf16.msra.mxu1 %v3311_v0 }
 0x136   :  { %v3871_v24 = vpop.eup %3870  ;;  %5864 = vst [vmem:[#allocation24_spill] sm:$0xff] %v4853_v25  ;;  %v1280_v50 = vadd.f32 %v1279_v27, %v4841_v8  ;;  %v1368_v34 = vpop.f32.mrf.mxu1  ;;  %v612_v44 = vadd.f32 %v611_v23, %v4828_v53  ;;  %v3394_v23 = vld [vmem:[#allocation2 + $0x190] sm:$0xf] }
 0x137   :  { %v4855_v26 = vpack.c.bf16 %v3871_v24, %v3867_v22  ;;  %v3595_v24 = vld [vmem:[#allocation2 + $0x194] sm:$0xf0] }
 0x138   :  { %v4860_v46 = vadd.f32 %v1368_v34, %v1280_v50  ;;  %3874 = vtanh.f32 %v612_v44  ;;  %v3331_v34 = vor.u32 %v3579_v1, %v3330_v19  ;;  %v3395_v36 = vor.u32 %v3595_v24, %v3394_v23  ;;  %v4250_v23 = vld [vmem:[%s5812_s0 + $0x58] sm:$0xff] }
 0x139   :  { %5865 = vst [vmem:[#allocation25_spill] sm:$0xff] %v4855_v26 }
 0x13a   :  { %v524_v47 = vpop.f32.mrf.mxu2  ;;  %1452 = vmatpush.bf16.msra.mxu2 %v3331_v34  ;;  %1541 = vmatpush.bf16.msra.mxu3 %v3395_v36 }
 0x13b   :  { %v525_v49 = vadd.f32 %v524_v47, %v4825_v31  ;;  %v3873_v22 = vpop.eup %3872 }
 0x13d   :  { %v613_v51 = vpop.f32.mrf.mxu3  ;;  %3876 = vtanh.f32 %v525_v49  ;;  %v1282_v60 = vpop.f32.mrf.mxu0 }
 0x13e   :  { %v614_v57 = vadd.f32 %v613_v51, %v4828_v53  ;;  %v1283_v62 = vadd.f32 %v1282_v60, %v4841_v8  ;;  %v3875_v27 = vpop.eup %3874 }
 0x13f   :  { %v1371_v5 = vpop.f32.mrf.mxu1  ;;  %3170 = vmatmul.msk.bf16.gmra.mxu2 %vm281_vm0, %v4249_v6 }
 0x140   :  { %3878 = vtanh.f32 %v614_v57  ;;  %v4869_v11 = vadd.f32 %v1371_v5, %v1283_v62  ;;  %1321 = vmatmul.bf16.gmra.mxu0 %v4694_v18 }
 0x142   :  { %3186 = vmatmul.msk.bf16.gmra.mxu3 %vm281_vm0, %v4249_v6  ;;  %1410 = vmatmul.bf16.gmra.mxu1 %v4697_v21  ;;  %v527_v50 = vpop.f32.mrf.mxu2 }
 0x143   :  { %v3877_v44 = vpop.eup %3876  ;;  %v528_v14 = vadd.f32 %v527_v50, %v4825_v31 }
 0x144   :  { %v4874_v51 = vpack.c.bf16 %v3877_v44, %v3873_v22 }
 0x145   :  { %v616_v47 = vpop.f32.mrf.mxu3  ;;  %v1284_v57 = vpop.f32.mrf.mxu0  ;;  %3880 = vtanh.f32 %v528_v14 }
 0x146   :  { %v3879_v49 = vpop.eup %3878  ;;  %v1285_v62 = vadd.f32 %v1284_v57, %v4841_v8  ;;  %v617_v61 = vadd.f32 %v616_v47, %v4828_v53 }
 0x147   :  { %v4876_v60 = vpack.c.bf16 %v3879_v49, %v3875_v27  ;;  %v1373_v5 = vpop.f32.mrf.mxu1 }
 0x148   :  { %v4881_v6 = vadd.f32 %v1373_v5, %v1285_v62  ;;  %3882 = vtanh.f32 %v617_v61 }
 0x149   :  { %5866 = vst [vmem:[#allocation26_spill] sm:$0xff] %v4876_v60 }
 0x14a   :  { %v529_v9 = vpop.f32.mrf.mxu2 }
 0x14b   :  { %v530_v12 = vadd.f32 %v529_v9, %v4825_v31  ;;  %v3881_v27 = vpop.eup %3880 }
 0x14d   :  { %v618_v13 = vpop.f32.mrf.mxu3  ;;  %3884 = vtanh.f32 %v530_v12  ;;  %v1287_v22 = vpop.f32.mrf.mxu0 }
 0x14e   :  { %v619_v19 = vadd.f32 %v618_v13, %v4828_v53  ;;  %v1288_v0 = vadd.f32 %v1287_v22, %v4841_v8  ;;  %v3883_v50 = vpop.eup %3882 }
 0x14f   :  { %v1376_v1 = vpop.f32.mrf.mxu1  ;;  %3171 = vmatmul.msk.bf16.gmra.mxu2 %vm281_vm0, %v4250_v23 }
 0x150   :  { %3886 = vtanh.f32 %v619_v19  ;;  %v4890_v24 = vadd.f32 %v1376_v1, %v1288_v0  ;;  %1326 = vmatmul.bf16.gmra.mxu0 %v4716_v56  ;;  %v3564_v56 = vld [vmem:[#allocation2 + $0xa4] sm:$0xf] }
 0x152   :  { %3187 = vmatmul.msk.bf16.gmra.mxu3 %vm281_vm0, %v4250_v23  ;;  %1415 = vmatmul.bf16.gmra.mxu1 %v4719_v59  ;;  %v532_v34 = vpop.f32.mrf.mxu2 }
 0x153   :  { %v3885_v36 = vpop.eup %3884  ;;  %v533_v61 = vadd.f32 %v532_v34, %v4825_v31  ;;  %v3236_v34 = vld [vmem:[#allocation2 + $0x58] sm:$0xf0] }
 0x154   :  { %v4895_v49 = vpack.c.bf16 %v3885_v36, %v3881_v27  ;;  %v4251_v36 = vld [vmem:[%s5812_s0 + $0x60] sm:$0xff] }
 0x155   :  { %v621_v44 = vpop.f32.mrf.mxu3  ;;  %v1289_v57 = vpop.f32.mrf.mxu0  ;;  %3888 = vtanh.f32 %v533_v61 }
 0x156   :  { %v3887_v47 = vpop.eup %3886  ;;  %5867 = vst [vmem:[#allocation27_spill] sm:$0xff] %v4895_v49  ;;  %v1290_v5 = vadd.f32 %v1289_v57, %v4841_v8  ;;  %v622_v9 = vadd.f32 %v621_v44, %v4828_v53  ;;  %v3570_v57 = vld [vmem:[#allocation2 + $0xd4] sm:$0xf] }
 0x157   :  { %v4897_v62 = vpack.c.bf16 %v3887_v47, %v3883_v50  ;;  %v1378_v14 = vpop.f32.mrf.mxu1  ;;  %v3554_v50 = vld [vmem:[#allocation2 + $0x54] sm:$0xf] }
 0x158   :  { %v4902_v12 = vadd.f32 %v1378_v14, %v1290_v5  ;;  %3890 = vtanh.f32 %v622_v9  ;;  %v3239_v44 = vor.u32 %v3554_v50, %v3236_v34  ;;  %v3300_v5 = vld [vmem:[#allocation2 + $0xd8] sm:$0xf0]  ;;  %v3322_v14 = vld [vmem:[#allocation2 + $0x100] sm:$0xf] }
 0x159   :  { %5868 = vst [vmem:[#allocation28_spill] sm:$0xff] %v4897_v62  ;;  %v3303_v9 = vor.u32 %v3570_v57, %v3300_v5 }
 0x15a   :  { %5869 = vst [vmem:[#allocation29_spill] sm:$0xff] %v4902_v12  ;;  %v534_v13 = vpop.f32.mrf.mxu2  ;;  %1626 = vmatpush.bf16.msra.mxu0 %v3239_v44  ;;  %v3276_v12 = vld [vmem:[#allocation2 + $0xa8] sm:$0xf0] }
 0x15b   :  { %v535_v19 = vadd.f32 %v534_v13, %v4825_v31  ;;  %v3889_v61 = vpop.eup %3888  ;;  %v3577_v13 = vld [vmem:[#allocation2 + $0x104] sm:$0xf0]  ;;  %1715 = vmatpush.bf16.msra.mxu1 %v3303_v9 }
 0x15c   :  { %v3323_v50 = vor.u32 %v3577_v13, %v3322_v14 }
 0x15d   :  { %v623_v22 = vpop.f32.mrf.mxu3  ;;  %3892 = vtanh.f32 %v535_v19  ;;  %v1292_v1 = vpop.f32.mrf.mxu0  ;;  %v3386_v19 = vld [vmem:[#allocation2 + $0x180] sm:$0xf] }
 0x15e   :  { %v624_v0 = vadd.f32 %v623_v22, %v4828_v53  ;;  %v1293_v23 = vadd.f32 %v1292_v1, %v4841_v8  ;;  %v3593_v22 = vld [vmem:[#allocation2 + $0x184] sm:$0xf0]  ;;  %1453 = vmatpush.bf16.msra.mxu2 %v3323_v50 }
 0x15f   :  { %v1381_v27 = vpop.f32.mrf.mxu1  ;;  %3172 = vmatmul.msk.bf16.gmra.mxu2 %vm281_vm0, %v4251_v36 }
 0x160   :  { %3894 = vtanh.f32 %v624_v0  ;;  %v4911_v47 = vadd.f32 %v1381_v27, %v1293_v23  ;;  %1331 = vmatmul.bf16.gmra.mxu0 %v4738_v35  ;;  %v3891_v0 = vpop.eup %3890  ;;  %v3387_v23 = vor.u32 %v3593_v22, %v3386_v19 }
 0x162   :  { %5870 = vst [vmem:[#allocation30_spill] sm:$0xff] %v4911_v47  ;;  %3188 = vmatmul.msk.bf16.gmra.mxu3 %vm281_vm0, %v4251_v36  ;;  %1420 = vmatmul.bf16.gmra.mxu1 %v4741_v39  ;;  %v537_v1 = vpop.f32.mrf.mxu2 }
 0x163   :  { %v3893_v27 = vpop.eup %3892  ;;  %1542 = vmatpush.bf16.msra.mxu3 %v3387_v23  ;;  %v538_v5 = vadd.f32 %v537_v1, %v4825_v31  ;;  %v4252_v1 = vld [vmem:[%s5812_s0 + $0x68] sm:$0xff] }
 0x164   :  { %v4916_v35 = vpack.c.bf16 %v3893_v27, %v3889_v61 }
 0x165   :  { %v626_v34 = vpop.f32.mrf.mxu3  ;;  %v1294_v47 = vpop.f32.mrf.mxu0  ;;  %3896 = vtanh.f32 %v538_v5 }
 0x166   :  { %v3895_v36 = vpop.eup %3894  ;;  %v1295_v44 = vadd.f32 %v1294_v47, %v4841_v8  ;;  %v627_v39 = vadd.f32 %v626_v34, %v4828_v53 }
 0x167   :  { %v4918_v59 = vpack.c.bf16 %v3895_v36, %v3891_v0  ;;  %v1383_v57 = vpop.f32.mrf.mxu1 }
 0x168   :  { %v4923_v14 = vadd.f32 %v1383_v57, %v1295_v44  ;;  %3898 = vtanh.f32 %v627_v39 }
 0x169   :  { %5871 = vst [vmem:[#allocation31_spill] sm:$0xff] %v4918_v59 }
 0x16a   :  { %5872 = vst [vmem:[#allocation32_spill] sm:$0xff] %v4923_v14  ;;  %v539_v13 = vpop.f32.mrf.mxu2 }
 0x16b   :  { %v540_v9 = vadd.f32 %v539_v13, %v4825_v31  ;;  %v3897_v39 = vpop.eup %3896 }
 0x16d   :  { %v628_v19 = vpop.f32.mrf.mxu3  ;;  %3900 = vtanh.f32 %v540_v9  ;;  %v1297_v22 = vpop.f32.mrf.mxu0 }
 0x16e   :  { %v629_v61 = vadd.f32 %v628_v19, %v4828_v53  ;;  %v1298_v47 = vadd.f32 %v1297_v22, %v4841_v8  ;;  %v3899_v23 = vpop.eup %3898 }
 0x16f   :  { %v1386_v0 = vpop.f32.mrf.mxu1  ;;  %3173 = vmatmul.msk.bf16.gmra.mxu2 %vm281_vm0, %v4252_v1 }
 0x170   :  { %3902 = vtanh.f32 %v629_v61  ;;  %v4932_v50 = vadd.f32 %v1386_v0, %v1298_v47  ;;  %1336 = vmatmul.bf16.gmra.mxu0 %v4760_v16  ;;  %v3552_v16 = vld [vmem:[#allocation2 + $0x44] sm:$0xf] }
 0x172   :  { %5873 = vst [vmem:[#allocation33_spill] sm:$0xff] %v4932_v50  ;;  %3189 = vmatmul.msk.bf16.gmra.mxu3 %vm281_vm0, %v4252_v1  ;;  %1425 = vmatmul.bf16.gmra.mxu1 %v4763_v17  ;;  %v542_v27 = vpop.f32.mrf.mxu2 }
 0x173   :  { %v3901_v34 = vpop.eup %3900  ;;  %v543_v61 = vadd.f32 %v542_v27, %v4825_v31 }
 0x174   :  { %v4937_v57 = vpack.c.bf16 %v3901_v34, %v3897_v39  ;;  %v3228_v39 = vld [vmem:[#allocation2 + $0x48] sm:$0xf0]  ;;  %v3568_v34 = vld [vmem:[#allocation2 + $0xc4] sm:$0xf] }
 0x175   :  { %v631_v36 = vpop.f32.mrf.mxu3  ;;  %v1299_v5 = vpop.f32.mrf.mxu0  ;;  %3904 = vtanh.f32 %v543_v61  ;;  %v3550_v61 = vld [vmem:[#allocation2 + $0x34] sm:$0xf] }
 0x176   :  { %v3903_v44 = vpop.eup %3902  ;;  %5874 = vst [vmem:[#allocation34_spill] sm:$0xff] %v4937_v57  ;;  %v1300_v9 = vadd.f32 %v1299_v5, %v4841_v8  ;;  %v632_v22 = vadd.f32 %v631_v36, %v4828_v53  ;;  %v3292_v5 = vld [vmem:[#allocation2 + $0xc8] sm:$0xf0] }
 0x177   :  { %v4939_v13 = vpack.c.bf16 %v3903_v44, %v3899_v23  ;;  %v1388_v19 = vpop.f32.mrf.mxu1  ;;  %v3231_v44 = vor.u32 %v3552_v16, %v3228_v39  ;;  %v3295_v27 = vor.u32 %v3568_v34, %v3292_v5  ;;  %v3284_v39 = vld [vmem:[#allocation2 + $0xb8] sm:$0xf0]  ;;  %v3606_v5 = vld [vmem:[#allocation2 + $0x1f4] sm:$0xf] }
 0x178   :  { %v4944_v47 = vadd.f32 %v1388_v19, %v1300_v9  ;;  %3906 = vtanh.f32 %v632_v22  ;;  %v4253_v19 = vld [vmem:[%s5812_s0 + $0x70] sm:$0xff]  ;;  %v3220_v22 = vld [vmem:[#allocation2 + $0x38] sm:$0xf0] }
 0x179   :  { %5875 = vst [vmem:[#allocation35_spill] sm:$0xff] %v4939_v13  ;;  %1627 = vmatpush.bf16.msra.mxu0 %v3231_v44  ;;  %1716 = vmatpush.bf16.msra.mxu1 %v3295_v27  ;;  %v3444_v27 = vld [vmem:[#allocation2 + $0x1f8] sm:$0xf0] }
 0x17a   :  { %5876 = vst [vmem:[#allocation36_spill] sm:$0xff] %v4944_v47  ;;  %v544_v0 = vpop.f32.mrf.mxu2 }
 0x17b   :  { %v545_v1 = vadd.f32 %v544_v0, %v4825_v31  ;;  %v3590_v0 = vld [vmem:[#allocation2 + $0x174] sm:$0xf]  ;;  %v3905_v34 = vpop.eup %3904 }
 0x17d   :  { %v633_v17 = vpop.f32.mrf.mxu3  ;;  %3908 = vtanh.f32 %v545_v1  ;;  %v1302_v50 = vpop.f32.mrf.mxu0  ;;  %v3223_v1 = vor.u32 %v3550_v61, %v3220_v22 }
 0x17e   :  { %v634_v23 = vadd.f32 %v633_v17, %v4828_v53  ;;  %v1303_v36 = vadd.f32 %v1302_v50, %v4841_v8  ;;  %v3566_v17 = vld [vmem:[#allocation2 + $0xb4] sm:$0xf]  ;;  %v3380_v50 = vld [vmem:[#allocation2 + $0x178] sm:$0xf0]  ;;  %v3907_v47 = vpop.eup %3906 }
 0x17f   :  { %v1391_v9 = vpop.f32.mrf.mxu1  ;;  %3174 = vmatmul.msk.bf16.gmra.mxu2 %vm281_vm0, %v4253_v19  ;;  %v3287_v44 = vor.u32 %v3566_v17, %v3284_v39  ;;  %1628 = vmatpush.bf16.msra.mxu0 %v3223_v1 }
 0x180   :  { %3910 = vtanh.f32 %v634_v23  ;;  %v4953_v16 = vadd.f32 %v1391_v9, %v1303_v36  ;;  %1341 = vmatmul.bf16.gmra.mxu0 %v4782_v7  ;;  %v3383_v23 = vor.u32 %v3590_v0, %v3380_v50  ;;  %v3447_v36 = vor.u32 %v3606_v5, %v3444_v27  ;;  %v3212_v7 = vld [vmem:[#allocation2 + $0x28] sm:$0xf0]  ;;  %v3204_v5 = vld [vmem:[#allocation2 + $0x18] sm:$0xf0]  ;;  %v3562_v27 = vld [vmem:[#allocation2 + $0x94] sm:$0xf] }
 0x181   :  { %1717 = vmatpush.bf16.msra.mxu1 %v3287_v44  ;;  %v3279_v0 = vor.u32 %v3564_v56, %v3276_v12  ;;  %v3546_v44 = vld [vmem:[#allocation2 + $0x14] sm:$0xf] }
 0x182   :  { %5877 = vst [vmem:[#allocation37_spill] sm:$0xff] %v4953_v16  ;;  %3190 = vmatmul.msk.bf16.gmra.mxu3 %vm281_vm0, %v4253_v19  ;;  %1430 = vmatmul.bf16.gmra.mxu1 %v4785_v10  ;;  %v547_v14 = vpop.f32.mrf.mxu2  ;;  %v3548_v19 = vld [vmem:[#allocation2 + $0x24] sm:$0xf] }
 0x183   :  { %v3909_v9 = vpop.eup %3908  ;;  %1802 = vmatpush.bf16.msrb.mxu2 %v3383_v23  ;;  %1891 = vmatpush.bf16.msrb.mxu3 %v3447_v36  ;;  %v3215_v22 = vor.u32 %v3548_v19, %v3212_v7  ;;  %v548_v23 = vadd.f32 %v547_v14, %v4825_v31  ;;  %v3196_v14 = vld [vmem:[#allocation2 + $0x8] sm:$0xf0] }
 0x184   :  { %v4958_v10 = vpack.c.bf16 %v3909_v9, %v3905_v34  ;;  %v3207_v34 = vor.u32 %v3546_v44, %v3204_v5  ;;  %v3268_v9 = vld [vmem:[#allocation2 + $0x98] sm:$0xf0] }
 0x185   :  { %v636_v16 = vpop.f32.mrf.mxu3  ;;  %v1304_v17 = vpop.f32.mrf.mxu0  ;;  %1629 = vmatpush.bf16.msra.mxu0 %v3215_v22  ;;  %1718 = vmatpush.bf16.msra.mxu1 %v3279_v0  ;;  %v3271_v19 = vor.u32 %v3562_v27, %v3268_v9  ;;  %3912 = vtanh.f32 %v548_v23  ;;  %v3560_v22 = vld [vmem:[#allocation2 + $0x84] sm:$0xf]  ;;  %v4254_v23 = vld [vmem:[%s5812_s0 + $0x78] sm:$0xff] }
 0x186   :  { %v3911_v61 = vpop.eup %3910  ;;  %v1305_v1 = vadd.f32 %v1304_v17, %v4841_v8  ;;  %v637_v36 = vadd.f32 %v636_v16, %v4828_v53  ;;  %v3260_v16 = vld [vmem:[#allocation2 + $0x88] sm:$0xf0] }
 0x187   :  { %v4960_v50 = vpack.c.bf16 %v3911_v61, %v3907_v47  ;;  %v1393_v39 = vpop.f32.mrf.mxu1  ;;  %v3544_v61 = vld [vmem:[#allocation2 + $0x4] sm:$0xf] }
 0x188   :  { %v4965_v7 = vadd.f32 %v1393_v39, %v1305_v1  ;;  %3914 = vtanh.f32 %v637_v36  ;;  %v3199_v0 = vor.u32 %v3544_v61, %v3196_v14  ;;  %v3263_v39 = vor.u32 %v3560_v22, %v3260_v16 }
 0x189   :  { %5878 = vst [vmem:[#allocation38_spill] sm:$0xff] %v4960_v50  ;;  %1630 = vmatpush.bf16.msra.mxu0 %v3207_v34  ;;  %1719 = vmatpush.bf16.msra.mxu1 %v3271_v19 }
 0x18a   :  { %v549_v56 = vpop.f32.mrf.mxu2 }
 0x18b   :  { %v550_v12 = vadd.f32 %v549_v56, %v4825_v31  ;;  %v3913_v36 = vpop.eup %3912 }
 0x18d   :  { %v638_v47 = vpop.f32.mrf.mxu3  ;;  %3916 = vtanh.f32 %v550_v12  ;;  %v1307_v1 = vpop.f32.mrf.mxu0  ;;  %1631 = vmatpush.bf16.msra.mxu0 %v3199_v0  ;;  %1720 = vmatpush.bf16.msra.mxu1 %v3263_v39 }
 0x18e   :  { %v639_v17 = vadd.f32 %v638_v47, %v4828_v53  ;;  %v1308_v44 = vadd.f32 %v1307_v1, %v4841_v8  ;;  %v3915_v34 = vpop.eup %3914 }
 0x18f   :  { %v1396_v5 = vpop.f32.mrf.mxu1  ;;  %3175 = vmatmul.msk.bf16.gmra.mxu2 %vm281_vm0, %v4254_v23 }
 0x190   :  { %3918 = vtanh.f32 %v639_v17  ;;  %v4974_v27 = vadd.f32 %v1396_v5, %v1308_v44  ;;  %1346 = vmatmul.bf16.gmra.mxu0 %v4804_v54 }
 0x192   :  { %3191 = vmatmul.msk.bf16.gmra.mxu3 %vm281_vm0, %v4254_v23  ;;  %1435 = vmatmul.bf16.gmra.mxu1 %v4807_v48  ;;  %v552_v9 = vpop.f32.mrf.mxu2 }
 0x193   :  { %v3917_v19 = vpop.eup %3916  ;;  %v553_v0 = vadd.f32 %v552_v9, %v4825_v31 }
 0x194   :  { %v4979_v47 = vpack.c.bf16 %v3917_v19, %v3913_v36 }
 0x195   :  { %v641_v56 = vpop.f32.mrf.mxu3  ;;  %v1309_v61 = vpop.f32.mrf.mxu0  ;;  %3920 = vtanh.f32 %v553_v0  ;;  %v3436_v0 = vld [vmem:[#allocation2 + $0x1e8] sm:$0xf0] }
 0x196   :  { %v3919_v12 = vpop.eup %3918  ;;  %5879 = vst [vmem:[#allocation39_spill] sm:$0xff] %v4979_v47  ;;  %v1310_v22 = vadd.f32 %v1309_v61, %v4841_v8  ;;  %v642_v16 = vadd.f32 %v641_v56, %v4828_v53  ;;  %v3588_v56 = vld [vmem:[#allocation2 + $0x164] sm:$0xf] }
 0x197   :  { %v4981_v14 = vpack.c.bf16 %v3919_v12, %v3915_v34  ;;  %v1398_v17 = vpop.f32.mrf.mxu1  ;;  %v3372_v12 = vld [vmem:[#allocation2 + $0x168] sm:$0xf0] }
 0x198   :  { %v4986_v1 = vadd.f32 %v1398_v17, %v1310_v22  ;;  %3922 = vtanh.f32 %v642_v16  ;;  %v3375_v22 = vor.u32 %v3588_v56, %v3372_v12  ;;  %v3604_v17 = vld [vmem:[#allocation2 + $0x1e4] sm:$0xf] }
 0x199   :  { %5880 = vst [vmem:[#allocation40_spill] sm:$0xff] %v4981_v14 }
 0x19a   :  { %v554_v39 = vpop.f32.mrf.mxu2  ;;  %1803 = vmatpush.bf16.msrb.mxu2 %v3375_v22 }
 0x19b   :  { %v555_v44 = vadd.f32 %v554_v39, %v4825_v31  ;;  %v3921_v61 = vpop.eup %3920 }
 0x19d   :  { %v643_v5 = vpop.f32.mrf.mxu3  ;;  %3924 = vtanh.f32 %v555_v44  ;;  %v1312_v36 = vpop.f32.mrf.mxu0  ;;  %v3439_v44 = vor.u32 %v3604_v17, %v3436_v0 }
 0x19e   :  { %v644_v23 = vadd.f32 %v643_v5, %v4828_v53  ;;  %v1313_v34 = vadd.f32 %v1312_v36, %v4841_v8  ;;  %v3923_v16 = vpop.eup %3922 }
 0x19f   :  { %v1401_v19 = vpop.f32.mrf.mxu1  ;;  %1454 = vmatmul.bf16.vlgmr.msra.gmra.mxu2 %v4853_v25  ;;  %1892 = vmatpush.bf16.msrb.mxu3 %v3439_v44 }
 0x1a0   :  { %3926 = vtanh.f32 %v644_v23  ;;  %v4992_v9 = vadd.f32 %v1401_v19, %v1313_v34  ;;  %1351 = vmatmul.bf16.gmra.mxu0 %v4830_v52 }
 0x1a2   :  { %1543 = vmatmul.bf16.vlgmr.msra.gmra.mxu3 %v4855_v26  ;;  %1440 = vmatmul.bf16.gmra.mxu1 %v4832_v55  ;;  %v557_v39 = vpop.f32.mrf.mxu2 }
 0x1a3   :  { %v3925_v5 = vpop.eup %3924  ;;  %v558_v56 = vadd.f32 %v557_v39, %v4825_v31 }
 0x1a4   :  { %v4997_v34 = vpack.c.bf16 %v3925_v5, %v3921_v61 }
 0x1a5   :  { %v646_v23 = vpop.f32.mrf.mxu3  ;;  %v1314_v19 = vpop.f32.mrf.mxu0  ;;  %3928 = vtanh.f32 %v558_v56 }
 0x1a6   :  { %v3927_v36 = vpop.eup %3926  ;;  %v1315_v26 = vadd.f32 %v1314_v19, %v4841_v8  ;;  %v647_v12 = vadd.f32 %v646_v23, %v4828_v53 }
 0x1a7   :  { %v4999_v52 = vpack.c.bf16 %v3927_v36, %v3923_v16  ;;  %v1403_v25 = vpop.f32.mrf.mxu1 }
 0x1a8   :  { %v5004_v55 = vadd.f32 %v1403_v25, %v1315_v26  ;;  %3930 = vtanh.f32 %v647_v12 }
 0x1a9   :  { %5881 = vst [vmem:[#allocation41_spill] sm:$0xff] %v4999_v52 }
 0x1aa   :  { %v559_v17 = vpop.f32.mrf.mxu2 }
 0x1ab   :  { %v560_v22 = vadd.f32 %v559_v17, %v4825_v31  ;;  %v3929_v25 = vpop.eup %3928 }
 0x1ad   :  { %v648_v0 = vpop.f32.mrf.mxu3  ;;  %3932 = vtanh.f32 %v560_v22  ;;  %v1317_v16 = vpop.f32.mrf.mxu0 }
 0x1ae   :  { %v649_v61 = vadd.f32 %v648_v0, %v4828_v53  ;;  %v1318_v44 = vadd.f32 %v1317_v16, %v4841_v8  ;;  %v3931_v26 = vpop.eup %3930 }
 0x1af   :  { %v1406_v5 = vpop.f32.mrf.mxu1  ;;  %1459 = vmatmul.bf16.gmra.mxu2 %v4874_v51 }
 0x1b0   :  { %3934 = vtanh.f32 %v649_v61  ;;  %v5010_v39 = vadd.f32 %v1406_v5, %v1318_v44  ;;  %1632 = vmatmul.bf16.vlgmr.msra.gmra.mxu0 %v4660_v28 }
 0x1b2   :  { %1548 = vmatmul.bf16.gmra.mxu3 %v4876_v60  ;;  %1721 = vmatmul.bf16.vlgmr.msra.gmra.mxu1 %v4664_v29  ;;  %v562_v23 = vpop.f32.mrf.mxu2 }
 0x1b3   :  { %v3933_v36 = vpop.eup %3932  ;;  %v563_v16 = vadd.f32 %v562_v23, %v4825_v31 }
 0x1b4   :  { %v5015_v12 = vpack.c.bf16 %v3933_v36, %v3929_v25 }
 0x1b5   :  { %v651_v19 = vpop.f32.mrf.mxu3  ;;  %v1319_v17 = vpop.f32.mrf.mxu0  ;;  %3936 = vtanh.f32 %v563_v16  ;;  %v3428_v16 = vld [vmem:[#allocation2 + $0x1d8] sm:$0xf0] }
 0x1b6   :  { %v3935_v56 = vpop.eup %3934  ;;  %5882 = vst [vmem:[#allocation42_spill] sm:$0xff] %v5015_v12  ;;  %v1320_v0 = vadd.f32 %v1319_v17, %v4841_v8  ;;  %v652_v28 = vadd.f32 %v651_v19, %v4828_v53  ;;  %v3586_v19 = vld [vmem:[#allocation2 + $0x154] sm:$0xf]  ;;  %v3364_v17 = vld [vmem:[#allocation2 + $0x158] sm:$0xf0] }
 0x1b7   :  { %v5017_v22 = vpack.c.bf16 %v3935_v56, %v3931_v26  ;;  %v1408_v61 = vpop.f32.mrf.mxu1 }
 0x1b8   :  { %v5022_v44 = vadd.f32 %v1408_v61, %v1320_v0  ;;  %3938 = vtanh.f32 %v652_v28  ;;  %v3602_v61 = vld [vmem:[#allocation2 + $0x1d4] sm:$0xf] }
 0x1b9   :  { %5883 = vst [vmem:[#allocation43_spill] sm:$0xff] %v5017_v22 }
 0x1ba   :  { %v564_v29 = vpop.f32.mrf.mxu2 }
 0x1bb   :  { %v565_v5 = vadd.f32 %v564_v29, %v4825_v31  ;;  %v3937_v0 = vpop.eup %3936 }
 0x1bd   :  { %v653_v60 = vpop.f32.mrf.mxu3  ;;  %3940 = vtanh.f32 %v565_v5  ;;  %v1322_v26 = vpop.f32.mrf.mxu0  ;;  %v3431_v5 = vor.u32 %v3602_v61, %v3428_v16 }
 0x1be   :  { %v654_v25 = vadd.f32 %v653_v60, %v4828_v53  ;;  %v1323_v36 = vadd.f32 %v1322_v26, %v4841_v8  ;;  %v3367_v60 = vor.u32 %v3586_v19, %v3364_v17  ;;  %v3939_v28 = vpop.eup %3938 }
 0x1bf   :  { %v1411_v56 = vpop.f32.mrf.mxu1  ;;  %1464 = vmatmul.bf16.gmra.mxu2 %v4895_v49  ;;  %1893 = vmatpush.bf16.msrb.mxu3 %v3431_v5 }
 0x1c0   :  { %3942 = vtanh.f32 %v654_v25  ;;  %v5028_v23 = vadd.f32 %v1411_v56, %v1323_v36  ;;  %1637 = vmatmul.bf16.gmra.mxu0 %v4682_v2  ;;  %1804 = vmatpush.bf16.msrb.mxu2 %v3367_v60 }
 0x1c2   :  { %5884 = vst [vmem:[#allocation44_spill] sm:$0xff] %v5028_v23  ;;  %1553 = vmatmul.bf16.gmra.mxu3 %v4897_v62  ;;  %1726 = vmatmul.bf16.gmra.mxu1 %v4686_v3  ;;  %v567_v29 = vpop.f32.mrf.mxu2 }
 0x1c3   :  { %v3941_v25 = vpop.eup %3940  ;;  %v568_v3 = vadd.f32 %v567_v29, %v4825_v31 }
 0x1c4   :  { %v5033_v56 = vpack.c.bf16 %v3941_v25, %v3937_v0 }
 0x1c5   :  { %v656_v26 = vpop.f32.mrf.mxu3  ;;  %v1324_v62 = vpop.f32.mrf.mxu0  ;;  %3944 = vtanh.f32 %v568_v3 }
 0x1c6   :  { %v3943_v36 = vpop.eup %3942  ;;  %v1325_v49 = vadd.f32 %v1324_v62, %v4841_v8  ;;  %v657_v19 = vadd.f32 %v656_v26, %v4828_v53 }
 0x1c7   :  { %v5035_v2 = vpack.c.bf16 %v3943_v36, %v3939_v28  ;;  %v1413_v23 = vpop.f32.mrf.mxu1 }
 0x1c8   :  { %v5040_v17 = vadd.f32 %v1413_v23, %v1325_v49  ;;  %3946 = vtanh.f32 %v657_v19 }
 0x1ca   :  { %v569_v61 = vpop.f32.mrf.mxu2 }
 0x1cb   :  { %v570_v60 = vadd.f32 %v569_v61, %v4825_v31  ;;  %v3945_v49 = vpop.eup %3944 }
 0x1cd   :  { %v658_v16 = vpop.f32.mrf.mxu3  ;;  %3948 = vtanh.f32 %v570_v60  ;;  %v1327_v28 = vpop.f32.mrf.mxu0 }
 0x1ce   :  { %v659_v0 = vadd.f32 %v658_v16, %v4828_v53  ;;  %v1328_v62 = vadd.f32 %v1327_v28, %v4841_v8  ;;  %v3947_v23 = vpop.eup %3946 }
 0x1cf   :  { %v1416_v5 = vpop.f32.mrf.mxu1  ;;  %1469 = vmatmul.bf16.gmra.mxu2 %v4916_v35 }
 0x1d0   :  { %3950 = vtanh.f32 %v659_v0  ;;  %v5046_v29 = vadd.f32 %v1416_v5, %v1328_v62  ;;  %1642 = vmatmul.bf16.gmra.mxu0 %v4704_v41 }
 0x1d2   :  { %1558 = vmatmul.bf16.gmra.mxu3 %v4918_v59  ;;  %1731 = vmatmul.bf16.gmra.mxu1 %v4708_v42  ;;  %v572_v25 = vpop.f32.mrf.mxu2 }
 0x1d3   :  { %v3949_v26 = vpop.eup %3948  ;;  %v573_v28 = vadd.f32 %v572_v25, %v4825_v31 }
 0x1d4   :  { %v5051_v19 = vpack.c.bf16 %v3949_v26, %v3945_v49 }
 0x1d5   :  { %v661_v36 = vpop.f32.mrf.mxu3  ;;  %v1329_v61 = vpop.f32.mrf.mxu0  ;;  %3952 = vtanh.f32 %v573_v28  ;;  %v3420_v28 = vld [vmem:[#allocation2 + $0x1c8] sm:$0xf0] }
 0x1d6   :  { %v3951_v3 = vpop.eup %3950  ;;  %v1330_v16 = vadd.f32 %v1329_v61, %v4841_v8  ;;  %v662_v41 = vadd.f32 %v661_v36, %v4828_v53  ;;  %v3584_v36 = vld [vmem:[#allocation2 + $0x144] sm:$0xf]  ;;  %v3356_v61 = vld [vmem:[#allocation2 + $0x148] sm:$0xf0] }
 0x1d7   :  { %v5053_v60 = vpack.c.bf16 %v3951_v3, %v3947_v23  ;;  %v1418_v0 = vpop.f32.mrf.mxu1 }
 0x1d8   :  { %v5058_v62 = vadd.f32 %v1418_v0, %v1330_v16  ;;  %3954 = vtanh.f32 %v662_v41  ;;  %v3600_v0 = vld [vmem:[#allocation2 + $0x1c4] sm:$0xf] }
 0x1d9   :  { %5885 = vst [vmem:[#allocation45_spill] sm:$0xff] %v5053_v60 }
 0x1da   :  { %v574_v42 = vpop.f32.mrf.mxu2 }
 0x1db   :  { %v575_v5 = vadd.f32 %v574_v42, %v4825_v31  ;;  %v3953_v16 = vpop.eup %3952 }
 0x1dd   :  { %v663_v59 = vpop.f32.mrf.mxu3  ;;  %3956 = vtanh.f32 %v575_v5  ;;  %v1332_v23 = vpop.f32.mrf.mxu0  ;;  %v3423_v5 = vor.u32 %v3600_v0, %v3420_v28 }
 0x1de   :  { %v664_v49 = vadd.f32 %v663_v59, %v4828_v53  ;;  %v1333_v26 = vadd.f32 %v1332_v23, %v4841_v8  ;;  %v3359_v59 = vor.u32 %v3584_v36, %v3356_v61  ;;  %v3955_v41 = vpop.eup %3954 }
 0x1df   :  { %v1421_v3 = vpop.f32.mrf.mxu1  ;;  %1474 = vmatmul.bf16.gmra.mxu2 %v4937_v57  ;;  %1894 = vmatpush.bf16.msrb.mxu3 %v3423_v5 }
 0x1e0   :  { %3958 = vtanh.f32 %v664_v49  ;;  %v5064_v25 = vadd.f32 %v1421_v3, %v1333_v26  ;;  %1647 = vmatmul.bf16.gmra.mxu0 %v4726_v15  ;;  %1805 = vmatpush.bf16.msrb.mxu2 %v3359_v59 }
 0x1e2   :  { %5886 = vst [vmem:[#allocation46_spill] sm:$0xff] %v5064_v25  ;;  %1563 = vmatmul.bf16.gmra.mxu3 %v4939_v13  ;;  %1736 = vmatmul.bf16.gmra.mxu1 %v4730_v30  ;;  %v577_v42 = vpop.f32.mrf.mxu2 }
 0x1e3   :  { %v3957_v49 = vpop.eup %3956  ;;  %v578_v30 = vadd.f32 %v577_v42, %v4825_v31 }
 0x1e4   :  { %v5069_v3 = vpack.c.bf16 %v3957_v49, %v3953_v16 }
 0x1e5   :  { %v666_v23 = vpop.f32.mrf.mxu3  ;;  %v1334_v13 = vpop.f32.mrf.mxu0  ;;  %3960 = vtanh.f32 %v578_v30 }
 0x1e6   :  { %v3959_v26 = vpop.eup %3958  ;;  %5887 = vst [vmem:[#allocation47_spill] sm:$0xff] %v5069_v3  ;;  %v1335_v57 = vadd.f32 %v1334_v13, %v4841_v8  ;;  %v667_v36 = vadd.f32 %v666_v23, %v4828_v53 }
 0x1e7   :  { %v5071_v15 = vpack.c.bf16 %v3959_v26, %v3955_v41  ;;  %v1423_v25 = vpop.f32.mrf.mxu1 }
 0x1e8   :  { %v5076_v61 = vadd.f32 %v1423_v25, %v1335_v57  ;;  %3962 = vtanh.f32 %v667_v36 }
 0x1e9   :  { %5888 = vst [vmem:[#allocation48_spill] sm:$0xff] %v5071_v15 }
 0x1ea   :  { %v579_v0 = vpop.f32.mrf.mxu2 }
 0x1eb   :  { %v580_v59 = vadd.f32 %v579_v0, %v4825_v31  ;;  %v3961_v57 = vpop.eup %3960 }
 0x1ed   :  { %v668_v28 = vpop.f32.mrf.mxu3  ;;  %3964 = vtanh.f32 %v580_v59  ;;  %v1337_v41 = vpop.f32.mrf.mxu0 }
 0x1ee   :  { %v669_v16 = vadd.f32 %v668_v28, %v4828_v53  ;;  %v1338_v13 = vadd.f32 %v1337_v41, %v4841_v8  ;;  %v3963_v25 = vpop.eup %3962 }
 0x1ef   :  { %v1426_v5 = vpop.f32.mrf.mxu1  ;;  %1479 = vmatmul.bf16.gmra.mxu2 %v4958_v10 }
 0x1f0   :  { %3966 = vtanh.f32 %v669_v16  ;;  %v5082_v42 = vadd.f32 %v1426_v5, %v1338_v13  ;;  %1652 = vmatmul.bf16.gmra.mxu0 %v4748_v63 }
 0x1f2   :  { %1568 = vmatmul.bf16.gmra.mxu3 %v4960_v50  ;;  %1741 = vmatmul.bf16.gmra.mxu1 %v4752_v4  ;;  %v582_v49 = vpop.f32.mrf.mxu2 }
 0x1f3   :  { %v3965_v23 = vpop.eup %3964  ;;  %v583_v41 = vadd.f32 %v582_v49, %v4825_v31 }
 0x1f4   :  { %v5087_v36 = vpack.c.bf16 %v3965_v23, %v3961_v57 }
 0x1f5   :  { %v671_v26 = vpop.f32.mrf.mxu3  ;;  %v1339_v0 = vpop.f32.mrf.mxu0  ;;  %3968 = vtanh.f32 %v583_v41  ;;  %v3412_v41 = vld [vmem:[#allocation2 + $0x1b8] sm:$0xf0] }
 0x1f6   :  { %v3967_v30 = vpop.eup %3966  ;;  %5889 = vst [vmem:[#allocation49_spill] sm:$0xff] %v5087_v36  ;;  %v1340_v28 = vadd.f32 %v1339_v0, %v4841_v8  ;;  %v672_v63 = vadd.f32 %v671_v26, %v4828_v53  ;;  %v3582_v26 = vld [vmem:[#allocation2 + $0x134] sm:$0xf]  ;;  %v3348_v0 = vld [vmem:[#allocation2 + $0x138] sm:$0xf0] }
 0x1f7   :  { %v5089_v59 = vpack.c.bf16 %v3967_v30, %v3963_v25  ;;  %v1428_v16 = vpop.f32.mrf.mxu1 }
 0x1f8   :  { %v5094_v13 = vadd.f32 %v1428_v16, %v1340_v28  ;;  %3970 = vtanh.f32 %v672_v63  ;;  %v3598_v16 = vld [vmem:[#allocation2 + $0x1b4] sm:$0xf] }
 0x1f9   :  { %5890 = vst [vmem:[#allocation50_spill] sm:$0xff] %v5089_v59 }
 0x1fa   :  { %v584_v4 = vpop.f32.mrf.mxu2 }
 0x1fb   :  { %v585_v5 = vadd.f32 %v584_v4, %v4825_v31  ;;  %v3969_v28 = vpop.eup %3968 }
 0x1fd   :  { %v673_v50 = vpop.f32.mrf.mxu3  ;;  %3972 = vtanh.f32 %v585_v5  ;;  %v1342_v25 = vpop.f32.mrf.mxu0  ;;  %v3415_v5 = vor.u32 %v3598_v16, %v3412_v41 }
 0x1fe   :  { %v674_v57 = vadd.f32 %v673_v50, %v4828_v53  ;;  %v1343_v23 = vadd.f32 %v1342_v25, %v4841_v8  ;;  %v3351_v50 = vor.u32 %v3582_v26, %v3348_v0  ;;  %v3971_v63 = vpop.eup %3970 }
 0x1ff   :  { %v1431_v30 = vpop.f32.mrf.mxu1  ;;  %1484 = vmatmul.bf16.gmra.mxu2 %v4979_v47  ;;  %1895 = vmatpush.bf16.msrb.mxu3 %v3415_v5 }
 0x200   :  { %3974 = vtanh.f32 %v674_v57  ;;  %v5100_v49 = vadd.f32 %v1431_v30, %v1343_v23  ;;  %1657 = vmatmul.bf16.gmra.mxu0 %v4770_v37  ;;  %1806 = vmatpush.bf16.msrb.mxu2 %v3351_v50 }
 0x202   :  { %5891 = vst [vmem:[#allocation51_spill] sm:$0xff] %v5100_v49  ;;  %1573 = vmatmul.bf16.gmra.mxu3 %v4981_v14  ;;  %1746 = vmatmul.bf16.gmra.mxu1 %v4774_v38  ;;  %v587_v4 = vpop.f32.mrf.mxu2 }
 0x203   :  { %v3973_v57 = vpop.eup %3972  ;;  %v588_v38 = vadd.f32 %v587_v4, %v4825_v31 }
 0x204   :  { %v5105_v30 = vpack.c.bf16 %v3973_v57, %v3969_v28 }
 0x205   :  { %v676_v25 = vpop.f32.mrf.mxu3  ;;  %v1344_v14 = vpop.f32.mrf.mxu0  ;;  %3976 = vtanh.f32 %v588_v38 }
 0x206   :  { %v3975_v23 = vpop.eup %3974  ;;  %v1345_v47 = vadd.f32 %v1344_v14, %v4841_v8  ;;  %v677_v26 = vadd.f32 %v676_v25, %v4828_v53 }
 0x207   :  { %v5107_v37 = vpack.c.bf16 %v3975_v23, %v3971_v63  ;;  %v1433_v49 = vpop.f32.mrf.mxu1 }
 0x208   :  { %v5112_v0 = vadd.f32 %v1433_v49, %v1345_v47  ;;  %3978 = vtanh.f32 %v677_v26 }
 0x20a   :  { %v589_v16 = vpop.f32.mrf.mxu2 }
 0x20b   :  { %v590_v50 = vadd.f32 %v589_v16, %v4825_v31  ;;  %v3977_v47 = vpop.eup %3976 }
 0x20d   :  { %v678_v41 = vpop.f32.mrf.mxu3  ;;  %3980 = vtanh.f32 %v590_v50  ;;  %v1347_v63 = vpop.f32.mrf.mxu0 }
 0x20e   :  { %v679_v28 = vadd.f32 %v678_v41, %v4828_v53  ;;  %v1348_v14 = vadd.f32 %v1347_v63, %v4841_v8  ;;  %v3979_v49 = vpop.eup %3978 }
 0x20f   :  { %v1436_v5 = vpop.f32.mrf.mxu1  ;;  %1489 = vmatmul.bf16.gmra.mxu2 %v4997_v34 }
 0x210   :  { %3982 = vtanh.f32 %v679_v28  ;;  %v5118_v4 = vadd.f32 %v1436_v5, %v1348_v14  ;;  %1662 = vmatmul.bf16.gmra.mxu0 %v4792_v32 }
 0x212   :  { %1578 = vmatmul.bf16.gmra.mxu3 %v4999_v52  ;;  %1751 = vmatmul.bf16.gmra.mxu1 %v4796_v33  ;;  %v592_v57 = vpop.f32.mrf.mxu2 }
 0x213   :  { %v3981_v25 = vpop.eup %3980  ;;  %v593_v63 = vadd.f32 %v592_v57, %v4825_v31  ;;  %v3615_v57 = vld [vmem:[#allocation5 + $0x38] sm:$0xff] }
 0x214   :  { %v5123_v26 = vpack.c.bf16 %v3981_v25, %v3977_v47  ;;  %2400 = vmatpush.bf16.msrb.mxu0 %v3615_v57 }
 0x215   :  { %v681_v23 = vpop.f32.mrf.mxu3  ;;  %v1349_v16 = vpop.f32.mrf.mxu0  ;;  %3984 = vtanh.f32 %v593_v63  ;;  %v3404_v63 = vld [vmem:[#allocation2 + $0x1a8] sm:$0xf0] }
 0x216   :  { %v3983_v38 = vpop.eup %3982  ;;  %5892 = vst [vmem:[#allocation52_spill] sm:$0xff] %v5123_v26  ;;  %v1350_v41 = vadd.f32 %v1349_v16, %v4841_v8  ;;  %v682_v32 = vadd.f32 %v681_v23, %v4828_v53  ;;  %v3580_v16 = vld [vmem:[#allocation2 + $0x124] sm:$0xf] }
 0x217   :  { %v5125_v50 = vpack.c.bf16 %v3983_v38, %v3979_v49  ;;  %v1438_v28 = vpop.f32.mrf.mxu1 }
 0x218   :  { %v5130_v14 = vadd.f32 %v1438_v28, %v1350_v41  ;;  %3986 = vtanh.f32 %v682_v32  ;;  %v3340_v41 = vld [vmem:[#allocation2 + $0x128] sm:$0xf0] }
 0x219   :  { %5893 = vst [vmem:[#allocation53_spill] sm:$0xff] %v5125_v50 }
 0x21a   :  { %v594_v33 = vpop.f32.mrf.mxu2 }
 0x21b   :  { %v595_v5 = vadd.f32 %v594_v33, %v4825_v31  ;;  %v3623_v31 = vld [vmem:[#allocation5 + $0x78] sm:$0xff]  ;;  %v3985_v28 = vpop.eup %3984 }
 0x21c   :  { %2489 = vmatpush.bf16.msrb.mxu1 %v3623_v31 }
 0x21d   :  { %v683_v52 = vpop.f32.mrf.mxu3  ;;  %3988 = vtanh.f32 %v595_v5  ;;  %v1352_v49 = vpop.f32.mrf.mxu0 }
 0x21e   :  { %v684_v47 = vadd.f32 %v683_v52, %v4828_v53  ;;  %v1353_v25 = vadd.f32 %v1352_v49, %v4841_v8  ;;  %v3343_v53 = vor.u32 %v3580_v16, %v3340_v41  ;;  %v3596_v52 = vld [vmem:[#allocation2 + $0x1a4] sm:$0xf]  ;;  %v3987_v32 = vpop.eup %3986 }
 0x21f   :  { %v1441_v38 = vpop.f32.mrf.mxu1  ;;  %1494 = vmatmul.bf16.gmra.mxu2 %v5015_v12  ;;  %v3407_v5 = vor.u32 %v3596_v52, %v3404_v63 }
 0x220   :  { %3990 = vtanh.f32 %v684_v47  ;;  %v5136_v23 = vadd.f32 %v1441_v38, %v1353_v25  ;;  %1667 = vmatmul.bf16.gmra.mxu0 %v4814_v58  ;;  %1807 = vmatpush.bf16.msrb.mxu2 %v3343_v53 }
 0x221   :  { %1896 = vmatpush.bf16.msrb.mxu3 %v3407_v5 }
 0x222   :  { %1583 = vmatmul.bf16.gmra.mxu3 %v5017_v22  ;;  %1756 = vmatmul.bf16.gmra.mxu1 %v4818_v20  ;;  %v1455_v33 = vpop.f32.mrf.mxu2 }
 0x223   :  { %v3989_v47 = vpop.eup %3988  ;;  %v1456_v49 = vadd.f32 %v1455_v33, %v4848_v40  ;;  %v4255_v40 = vld [vmem:[%s5816_s4] sm:$0x3] }
 0x224   :  { %v5142_v38 = vpack.c.bf16 %v3989_v47, %v3985_v28  ;;  %v5154_v53 = vperm.slane %v4255_v40, 1 }
 0x225   :  { %v1544_v25 = vpop.f32.mrf.mxu3  ;;  %v1354_v20 = vpop.f32.mrf.mxu0 }
 0x226   :  { %v3991_v58 = vpop.eup %3990  ;;  %5894 = vst [vmem:[#allocation54_spill] sm:$0xff] %v5142_v38  ;;  %v5144_v22 = vadd.f32 %v1544_v25, %v1456_v49  ;;  %v1355_v16 = vadd.f32 %v1354_v20, %v4841_v8 }
 0x227   :  { %v5146_v57 = vpack.c.bf16 %v3991_v58, %v3987_v32  ;;  %v1443_v41 = vpop.f32.mrf.mxu1 }
 0x228   :  { %v5149_v12 = vadd.f32 %v1443_v41, %v1355_v16  ;;  %3992 = vtanh.f32 %v5144_v22 }
 0x229   :  { %5895 = vst [vmem:[#allocation55_spill] sm:$0xff] %v5146_v57 }
 0x22a   :  { %v1457_v31 = vpop.f32.mrf.mxu2 }
 0x22b   :  { %v1458_v28 = vadd.f32 %v1457_v31, %v4860_v46 }
 0x22d   :  { %v1546_v52 = vpop.f32.mrf.mxu3  ;;  %v1633_v33 = vpop.f32.mrf.mxu0 }
 0x22e   :  { %v5157_v63 = vadd.f32 %v1546_v52, %v1458_v28  ;;  %v1634_v32 = vadd.f32 %v1633_v33, %v5154_v53 }
 0x22f   :  { %v1722_v5 = vpop.f32.mrf.mxu1  ;;  %1499 = vmatmul.bf16.gmra.mxu2 %v5033_v56 }
 0x230   :  { %v5161_v8 = vadd.f32 %v1722_v5, %v1634_v32  ;;  %1672 = vmatmul.bf16.gmra.mxu0 %v4672_v43  ;;  %v3622_v5 = vld [vmem:[#allocation5 + $0x70] sm:$0xff] }
 0x231   :  { %2490 = vmatpush.bf16.msrb.mxu1 %v3622_v5 }
 0x232   :  { %1588 = vmatmul.bf16.gmra.mxu3 %v5035_v2  ;;  %1761 = vmatmul.bf16.gmra.mxu1 %v4675_v45  ;;  %v1460_v47 = vpop.f32.mrf.mxu2 }
 0x233   :  { %v1461_v46 = vadd.f32 %v1460_v47, %v4869_v11  ;;  %v3614_v11 = vld [vmem:[#allocation5 + $0x30] sm:$0xff] }
 0x234   :  { %v3578_v47 = vld [vmem:[#allocation2 + $0x114] sm:$0xf]  ;;  %2401 = vmatpush.bf16.msrb.mxu0 %v3614_v11  ;;  %v5896_v11 = vld [vmem:[#allocation29_spill] sm:$0xff] }
 0x235   :  { %v1549_v49 = vpop.f32.mrf.mxu3  ;;  %v1635_v58 = vpop.f32.mrf.mxu0 }
 0x236   :  { %v5167_v25 = vadd.f32 %v1549_v49, %v1461_v46  ;;  %v1636_v20 = vadd.f32 %v1635_v58, %v5154_v53  ;;  %v3332_v46 = vld [vmem:[#allocation2 + $0x118] sm:$0xf0]  ;;  %v3594_v49 = vld [vmem:[#allocation2 + $0x194] sm:$0xf] }
 0x237   :  { %v1724_v16 = vpop.f32.mrf.mxu1  ;;  %v3396_v58 = vld [vmem:[#allocation2 + $0x198] sm:$0xf0] }
 0x238   :  { %v5170_v41 = vadd.f32 %v1724_v16, %v1636_v20  ;;  %v3399_v16 = vor.u32 %v3594_v49, %v3396_v58  ;;  %v5898_v58 = vld [vmem:[#allocation14_spill] sm:$0xff] }
 0x23a   :  { %v1462_v31 = vpop.f32.mrf.mxu2  ;;  %1897 = vmatpush.bf16.msrb.mxu3 %v3399_v16 }
 0x23b   :  { %v1463_v40 = vadd.f32 %v1462_v31, %v4881_v6  ;;  %v3335_v6 = vor.u32 %v3578_v47, %v3332_v46 }
 0x23d   :  { %v1551_v28 = vpop.f32.mrf.mxu3  ;;  %v1638_v43 = vpop.f32.mrf.mxu0  ;;  %1808 = vmatpush.bf16.msrb.mxu2 %v3335_v6 }
 0x23e   :  { %v5173_v52 = vadd.f32 %v1551_v28, %v1463_v40  ;;  %v1639_v45 = vadd.f32 %v1638_v43, %v5154_v53 }
 0x23f   :  { %v1727_v33 = vpop.f32.mrf.mxu1  ;;  %1504 = vmatmul.bf16.gmra.mxu2 %v5051_v19 }
 0x240   :  { %v5177_v32 = vadd.f32 %v1727_v33, %v1639_v45  ;;  %1677 = vmatmul.bf16.gmra.mxu0 %v4694_v18 }
 0x242   :  { %1593 = vmatmul.bf16.gmra.mxu3 %v5053_v60  ;;  %1766 = vmatmul.bf16.gmra.mxu1 %v4697_v21  ;;  %v1465_v20 = vpop.f32.mrf.mxu2 }
 0x243   :  { %v1466_v31 = vadd.f32 %v1465_v20, %v4890_v24  ;;  %v5899_v20 = vld [vmem:[#allocation15_spill] sm:$0xff] }
 0x245   :  { %v1554_v40 = vpop.f32.mrf.mxu3  ;;  %v1640_v18 = vpop.f32.mrf.mxu0 }
 0x246   :  { %v5183_v28 = vadd.f32 %v1554_v40, %v1466_v31  ;;  %v1641_v43 = vadd.f32 %v1640_v18, %v5154_v53  ;;  %v5900_v31 = vld [vmem:[#allocation30_spill] sm:$0xff] }
 0x247   :  { %v1729_v45 = vpop.f32.mrf.mxu1 }
 0x248   :  { %v5186_v33 = vadd.f32 %v1729_v45, %v1641_v43 }
 0x24a   :  { %v1467_v21 = vpop.f32.mrf.mxu2 }
 0x24b   :  { %v1468_v47 = vadd.f32 %v1467_v21, %v5896_v11 }
 0x24d   :  { %v1556_v46 = vpop.f32.mrf.mxu3  ;;  %v1643_v5 = vpop.f32.mrf.mxu0 }
 0x24e   :  { %v5189_v60 = vadd.f32 %v1556_v46, %v1468_v47  ;;  %v1644_v24 = vadd.f32 %v1643_v5, %v5154_v53  ;;  %v5902_v5 = vld [vmem:[#allocation32_spill] sm:$0xff] }
 0x24f   :  { %v1732_v49 = vpop.f32.mrf.mxu1  ;;  %1509 = vmatmul.bf16.gmra.mxu2 %v5069_v3 }
 0x250   :  { %5897 = vst [vmem:[#allocation29_spill] sm:$0xff] %v5189_v60  ;;  %v5193_v6 = vadd.f32 %v1732_v49, %v1644_v24  ;;  %1682 = vmatmul.bf16.gmra.mxu0 %v5898_v58 }
 0x252   :  { %1598 = vmatmul.bf16.gmra.mxu3 %v5071_v15  ;;  %1771 = vmatmul.bf16.gmra.mxu1 %v5899_v20  ;;  %v1470_v16 = vpop.f32.mrf.mxu2 }
 0x253   :  { %v1471_v40 = vadd.f32 %v1470_v16, %v5900_v31  ;;  %v3613_v16 = vld [vmem:[#allocation5 + $0x28] sm:$0xff] }
 0x254   :  { %2402 = vmatpush.bf16.msrb.mxu0 %v3613_v16 }
 0x255   :  { %v1559_v18 = vpop.f32.mrf.mxu3  ;;  %v1645_v45 = vpop.f32.mrf.mxu0 }
 0x256   :  { %v5199_v43 = vadd.f32 %v1559_v18, %v1471_v40  ;;  %v1646_v21 = vadd.f32 %v1645_v45, %v5154_v53  ;;  %v5905_v40 = vld [vmem:[#allocation16_spill] sm:$0xff]  ;;  %v3621_v18 = vld [vmem:[#allocation5 + $0x68] sm:$0xff]  ;;  %v3576_v45 = vld [vmem:[#allocation2 + $0x104] sm:$0xf] }
 0x257   :  { %v1734_v11 = vpop.f32.mrf.mxu1  ;;  %2491 = vmatpush.bf16.msrb.mxu1 %v3621_v18 }
 0x258   :  { %5901 = vst [vmem:[#allocation14_spill] sm:$0xff] %v5199_v43  ;;  %v5202_v47 = vadd.f32 %v1734_v11, %v1646_v21  ;;  %v3324_v21 = vld [vmem:[#allocation2 + $0x108] sm:$0xf0]  ;;  %v5906_v11 = vld [vmem:[#allocation17_spill] sm:$0xff] }
 0x25a   :  { %v1472_v46 = vpop.f32.mrf.mxu2 }
 0x25b   :  { %v1473_v24 = vadd.f32 %v1472_v46, %v5902_v5  ;;  %v3327_v46 = vor.u32 %v3576_v45, %v3324_v21  ;;  %v3592_v5 = vld [vmem:[#allocation2 + $0x184] sm:$0xf]  ;;  %v5908_v45 = vld [vmem:[#allocation36_spill] sm:$0xff] }
 0x25d   :  { %v1561_v49 = vpop.f32.mrf.mxu3  ;;  %v1648_v58 = vpop.f32.mrf.mxu0  ;;  %1809 = vmatpush.bf16.msrb.mxu2 %v3327_v46  ;;  %v5909_v46 = vld [vmem:[#allocation18_spill] sm:$0xff] }
 0x25e   :  { %v5205_v15 = vadd.f32 %v1561_v49, %v1473_v24  ;;  %v1649_v20 = vadd.f32 %v1648_v58, %v5154_v53  ;;  %v3388_v24 = vld [vmem:[#allocation2 + $0x188] sm:$0xf0] }
 0x25f   :  { %v1737_v3 = vpop.f32.mrf.mxu1  ;;  %1514 = vmatmul.bf16.gmra.mxu2 %v5087_v36  ;;  %v3391_v58 = vor.u32 %v3592_v5, %v3388_v24  ;;  %v5907_v36 = vld [vmem:[#allocation33_spill] sm:$0xff] }
 0x260   :  { %5903 = vst [vmem:[#allocation15_spill] sm:$0xff] %v5205_v15  ;;  %v5209_v31 = vadd.f32 %v1737_v3, %v1649_v20  ;;  %1687 = vmatmul.bf16.gmra.mxu0 %v5905_v40  ;;  %v5911_v24 = vld [vmem:[#allocation37_spill] sm:$0xff] }
 0x261   :  { %1898 = vmatpush.bf16.msrb.mxu3 %v3391_v58 }
 0x262   :  { %5904 = vst [vmem:[#allocation30_spill] sm:$0xff] %v5209_v31  ;;  %1603 = vmatmul.bf16.gmra.mxu3 %v5089_v59  ;;  %1776 = vmatmul.bf16.gmra.mxu1 %v5906_v11  ;;  %v1475_v49 = vpop.f32.mrf.mxu2 }
 0x263   :  { %v1476_v15 = vadd.f32 %v1475_v49, %v5907_v36 }
 0x265   :  { %v1564_v3 = vpop.f32.mrf.mxu3  ;;  %v1650_v40 = vpop.f32.mrf.mxu0 }
 0x266   :  { %v5215_v20 = vadd.f32 %v1564_v3, %v1476_v15  ;;  %v1651_v59 = vadd.f32 %v1650_v40, %v5154_v53 }
 0x267   :  { %v1739_v43 = vpop.f32.mrf.mxu1 }
 0x268   :  { %v5218_v31 = vadd.f32 %v1739_v43, %v1651_v59  ;;  %v5910_v59 = vld [vmem:[#allocation19_spill] sm:$0xff] }
 0x26a   :  { %v1477_v16 = vpop.f32.mrf.mxu2 }
 0x26b   :  { %v1478_v21 = vadd.f32 %v1477_v16, %v5908_v45 }
 0x26d   :  { %v1566_v11 = vpop.f32.mrf.mxu3  ;;  %v1653_v18 = vpop.f32.mrf.mxu0 }
 0x26e   :  { %v5221_v60 = vadd.f32 %v1566_v11, %v1478_v21  ;;  %v1654_v36 = vadd.f32 %v1653_v18, %v5154_v53 }
 0x26f   :  { %v1742_v5 = vpop.f32.mrf.mxu1  ;;  %1519 = vmatmul.bf16.gmra.mxu2 %v5105_v30 }
 0x270   :  { %v5225_v15 = vadd.f32 %v1742_v5, %v1654_v36  ;;  %1692 = vmatmul.bf16.gmra.mxu0 %v5909_v46 }
 0x272   :  { %1608 = vmatmul.bf16.gmra.mxu3 %v5107_v37  ;;  %1781 = vmatmul.bf16.gmra.mxu1 %v5910_v59  ;;  %v1480_v43 = vpop.f32.mrf.mxu2  ;;  %v3612_v59 = vld [vmem:[#allocation5 + $0x20] sm:$0xff] }
 0x273   :  { %v1481_v49 = vadd.f32 %v1480_v43, %v5911_v24  ;;  %v5913_v24 = vld [vmem:[#allocation20_spill] sm:$0xff]  ;;  %2403 = vmatpush.bf16.msrb.mxu0 %v3612_v59 }
 0x275   :  { %v1569_v58 = vpop.f32.mrf.mxu3  ;;  %v5233_v40 = vpop.f32.mrf.mxu0 }
 0x276   :  { %v5231_v3 = vadd.f32 %v1569_v58, %v1481_v49  ;;  %v3620_v49 = vld [vmem:[#allocation5 + $0x60] sm:$0xff]  ;;  %v5914_v58 = vld [vmem:[#allocation21_spill] sm:$0xff] }
 0x277   :  { %v5235_v16 = vpop.f32.mrf.mxu1  ;;  %2492 = vmatpush.bf16.msrb.mxu1 %v3620_v49 }
 0x27a   :  { %v1482_v45 = vpop.f32.mrf.mxu2 }
 0x27b   :  { %v1483_v21 = vadd.f32 %v1482_v45, %v4965_v7 }
 0x27d   :  { %v1571_v11 = vpop.f32.mrf.mxu3  ;;  %v1658_v36 = vpop.f32.mrf.mxu0 }
 0x27e   :  { %v5238_v18 = vadd.f32 %v1571_v11, %v1483_v21  ;;  %v1659_v5 = vadd.f32 %v1658_v36, %v5154_v53 }
 0x27f   :  { %v1747_v46 = vpop.f32.mrf.mxu1  ;;  %1524 = vmatmul.bf16.gmra.mxu2 %v5123_v26 }
 0x280   :  { %5912 = vst [vmem:[#allocation32_spill] sm:$0xff] %v5238_v18  ;;  %v5242_v43 = vadd.f32 %v1747_v46, %v1659_v5  ;;  %1697 = vmatmul.bf16.gmra.mxu0 %v5913_v24 }
 0x282   :  { %1613 = vmatmul.bf16.gmra.mxu3 %v5125_v50  ;;  %1786 = vmatmul.bf16.gmra.mxu1 %v5914_v58  ;;  %v1485_v7 = vpop.f32.mrf.mxu2 }
 0x283   :  { %v1486_v45 = vadd.f32 %v1485_v7, %v4974_v27 }
 0x285   :  { %v1574_v21 = vpop.f32.mrf.mxu3  ;;  %v5250_v36 = vpop.f32.mrf.mxu0 }
 0x286   :  { %v5248_v11 = vadd.f32 %v1574_v21, %v1486_v45 }
 0x287   :  { %v5252_v26 = vpop.f32.mrf.mxu1 }
 0x28a   :  { %v1487_v5 = vpop.f32.mrf.mxu2 }
 0x28b   :  { %v1488_v46 = vadd.f32 %v1487_v5, %v4986_v1 }
 0x28d   :  { %v1576_v50 = vpop.f32.mrf.mxu3  ;;  %v1663_v18 = vpop.f32.mrf.mxu0 }
 0x28e   :  { %v5255_v24 = vadd.f32 %v1576_v50, %v1488_v46  ;;  %v1664_v59 = vadd.f32 %v1663_v18, %v5154_v53 }
 0x28f   :  { %v1752_v58 = vpop.f32.mrf.mxu1  ;;  %1529 = vmatmul.bf16.gmra.mxu2 %v5142_v38  ;;  %v5920_v38 = vld [vmem:[#allocation23_spill] sm:$0xff] }
 0x290   :  { %v5259_v27 = vadd.f32 %v1752_v58, %v1664_v59  ;;  %1702 = vmatmul.bf16.gmra.mxu0 %v4804_v54 }
 0x292   :  { %1618 = vmatmul.bf16.gmra.mxu3 %v5146_v57  ;;  %1791 = vmatmul.bf16.gmra.mxu1 %v4807_v48  ;;  %v1490_v49 = vpop.f32.mrf.mxu2  ;;  %v5917_v57 = vld [vmem:[#allocation24_spill] sm:$0xff] }
 0x293   :  { %v1491_v1 = vadd.f32 %v1490_v49, %v4992_v9  ;;  %v3611_v9 = vld [vmem:[#allocation5 + $0x18] sm:$0xff] }
 0x294   :  { %2404 = vmatpush.bf16.msrb.mxu0 %v3611_v9 }
 0x295   :  { %v1579_v7 = vpop.f32.mrf.mxu3  ;;  %v5267_v45 = vpop.f32.mrf.mxu0 }
 0x296   :  { %v5265_v50 = vadd.f32 %v1579_v7, %v1491_v1  ;;  %v5918_v1 = vld [vmem:[#allocation25_spill] sm:$0xff]  ;;  %v5919_v7 = vld [vmem:[#allocation22_spill] sm:$0xff] }
 0x297   :  { %v5269_v18 = vpop.f32.mrf.mxu1 }
 0x298   :  { %5915 = vst [vmem:[#allocation16_spill] sm:$0xff] %v5265_v50  ;;  %v3619_v50 = vld [vmem:[#allocation5 + $0x58] sm:$0xff] }
 0x299   :  { %2493 = vmatpush.bf16.msrb.mxu1 %v3619_v50  ;;  %v5924_v50 = vld [vmem:[#allocation26_spill] sm:$0xff] }
 0x29a   :  { %v1492_v21 = vpop.f32.mrf.mxu2 }
 0x29b   :  { %v1493_v5 = vadd.f32 %v1492_v21, %v5004_v55 }
 0x29d   :  { %v1581_v46 = vpop.f32.mrf.mxu3  ;;  %v1668_v58 = vpop.f32.mrf.mxu0 }
 0x29e   :  { %v5272_v59 = vadd.f32 %v1581_v46, %v1493_v5  ;;  %v1669_v54 = vadd.f32 %v1668_v58, %v5154_v53 }
 0x29f   :  { %v1757_v48 = vpop.f32.mrf.mxu1  ;;  %1810 = vmatmul.bf16.vlgmr.msrb.gmra.mxu2 %v5917_v57 }
 0x2a0   :  { %5916 = vst [vmem:[#allocation17_spill] sm:$0xff] %v5272_v59  ;;  %v5276_v49 = vadd.f32 %v1757_v48, %v1669_v54  ;;  %1707 = vmatmul.bf16.gmra.mxu0 %v5919_v7 }
 0x2a2   :  { %1899 = vmatmul.bf16.vlgmr.msrb.gmra.mxu3 %v5918_v1  ;;  %1796 = vmatmul.bf16.gmra.mxu1 %v5920_v38  ;;  %v1495_v55 = vpop.f32.mrf.mxu2 }
 0x2a3   :  { %v1496_v21 = vadd.f32 %v1495_v55, %v5010_v39 }
 0x2a5   :  { %v1584_v5 = vpop.f32.mrf.mxu3  ;;  %v5284_v58 = vpop.f32.mrf.mxu0 }
 0x2a6   :  { %v5282_v46 = vadd.f32 %v1584_v5, %v1496_v21  ;;  %v5925_v21 = vld [vmem:[#allocation44_spill] sm:$0xff] }
 0x2a7   :  { %v5286_v57 = vpop.f32.mrf.mxu1 }
 0x2a8   :  { %5921 = vst [vmem:[#allocation33_spill] sm:$0xff] %v5282_v46 }
 0x2a9   :  { %5922 = vst [vmem:[#allocation36_spill] sm:$0xff] %v5286_v57 }
 0x2aa   :  { %v1497_v54 = vpop.f32.mrf.mxu2 }
 0x2ab   :  { %v1498_v48 = vadd.f32 %v1497_v54, %v5022_v44 }
 0x2ad   :  { %v1586_v1 = vpop.f32.mrf.mxu3  ;;  %v1673_v59 = vpop.f32.mrf.mxu0 }
 0x2ae   :  { %v5289_v7 = vadd.f32 %v1586_v1, %v1498_v48  ;;  %v1674_v38 = vadd.f32 %v1673_v59, %v5154_v53 }
 0x2af   :  { %v1762_v9 = vpop.f32.mrf.mxu1  ;;  %1815 = vmatmul.bf16.gmra.mxu2 %v4874_v51 }
 0x2b0   :  { %5923 = vst [vmem:[#allocation18_spill] sm:$0xff] %v5289_v7  ;;  %v5293_v39 = vadd.f32 %v1762_v9, %v1674_v38 }
 0x2b2   :  { %1904 = vmatmul.bf16.gmra.mxu3 %v5924_v50  ;;  %v1500_v55 = vpop.f32.mrf.mxu2  ;;  %v5928_v50 = vld [vmem:[#allocation27_spill] sm:$0xff] }
 0x2b3   :  { %v1501_v5 = vadd.f32 %v1500_v55, %v5925_v21  ;;  %v3610_v55 = vld [vmem:[#allocation5 + $0x10] sm:$0xff] }
 0x2b4   :  { %2405 = vmatpush.bf16.msrb.mxu0 %v3610_v55 }
 0x2b5   :  { %v1589_v46 = vpop.f32.mrf.mxu3  ;;  %v5299_v44 = vpop.f32.mrf.mxu0 }
 0x2b6   :  { %v5297_v57 = vadd.f32 %v1589_v46, %v1501_v5  ;;  %v5930_v46 = vld [vmem:[#allocation28_spill] sm:$0xff] }
 0x2b7   :  { %v5301_v54 = vpop.f32.mrf.mxu1  ;;  %v3618_v5 = vld [vmem:[#allocation5 + $0x50] sm:$0xff] }
 0x2b8   :  { %5926 = vst [vmem:[#allocation19_spill] sm:$0xff] %v5297_v57  ;;  %2494 = vmatpush.bf16.msrb.mxu1 %v3618_v5 }
 0x2ba   :  { %v1502_v48 = vpop.f32.mrf.mxu2 }
 0x2bb   :  { %v1503_v59 = vadd.f32 %v1502_v48, %v5040_v17 }
 0x2bd   :  { %v1591_v1 = vpop.f32.mrf.mxu3  ;;  %v1678_v51 = vpop.f32.mrf.mxu0 }
 0x2be   :  { %v5304_v7 = vadd.f32 %v1591_v1, %v1503_v59  ;;  %v1679_v38 = vadd.f32 %v1678_v51, %v5154_v53 }
 0x2bf   :  { %v1767_v9 = vpop.f32.mrf.mxu1  ;;  %1820 = vmatmul.bf16.gmra.mxu2 %v5928_v50 }
 0x2c0   :  { %5927 = vst [vmem:[#allocation37_spill] sm:$0xff] %v5304_v7  ;;  %v5308_v21 = vadd.f32 %v1767_v9, %v1679_v38 }
 0x2c2   :  { %5929 = vst [vmem:[#allocation20_spill] sm:$0xff] %v5308_v21  ;;  %1909 = vmatmul.bf16.gmra.mxu3 %v5930_v46  ;;  %v1505_v57 = vpop.f32.mrf.mxu2 }
 0x2c3   :  { %v1506_v17 = vadd.f32 %v1505_v57, %v5046_v29  ;;  %v5934_v57 = vld [vmem:[#allocation31_spill] sm:$0xff] }
 0x2c5   :  { %v1594_v48 = vpop.f32.mrf.mxu3  ;;  %v5314_v1 = vpop.f32.mrf.mxu0 }
 0x2c6   :  { %v5312_v59 = vadd.f32 %v1594_v48, %v1506_v17  ;;  %v5935_v17 = vld [vmem:[#allocation46_spill] sm:$0xff] }
 0x2c7   :  { %v5316_v51 = vpop.f32.mrf.mxu1 }
 0x2c8   :  { %5931 = vst [vmem:[#allocation21_spill] sm:$0xff] %v5312_v59 }
 0x2c9   :  { %5932 = vst [vmem:[#allocation24_spill] sm:$0xff] %v5316_v51 }
 0x2ca   :  { %v1507_v7 = vpop.f32.mrf.mxu2 }
 0x2cb   :  { %v1508_v50 = vadd.f32 %v1507_v7, %v5058_v62 }
 0x2cd   :  { %v1596_v38 = vpop.f32.mrf.mxu3  ;;  %v1683_v46 = vpop.f32.mrf.mxu0 }
 0x2ce   :  { %v5319_v9 = vadd.f32 %v1596_v38, %v1508_v50  ;;  %v1684_v55 = vadd.f32 %v1683_v46, %v5154_v53 }
 0x2cf   :  { %v1772_v21 = vpop.f32.mrf.mxu1  ;;  %1825 = vmatmul.bf16.gmra.mxu2 %v4916_v35 }
 0x2d0   :  { %5933 = vst [vmem:[#allocation25_spill] sm:$0xff] %v5319_v9  ;;  %v5323_v29 = vadd.f32 %v1772_v21, %v1684_v55 }
 0x2d2   :  { %1914 = vmatmul.bf16.gmra.mxu3 %v5934_v57  ;;  %v1510_v5 = vpop.f32.mrf.mxu2  ;;  %v5938_v57 = vld [vmem:[#allocation34_spill] sm:$0xff] }
 0x2d3   :  { %v1511_v48 = vadd.f32 %v1510_v5, %v5935_v17  ;;  %v3609_v5 = vld [vmem:[#allocation5 + $0x8] sm:$0xff] }
 0x2d4   :  { %2406 = vmatpush.bf16.msrb.mxu0 %v3609_v5 }
 0x2d5   :  { %v1599_v59 = vpop.f32.mrf.mxu3  ;;  %v5329_v62 = vpop.f32.mrf.mxu0 }
 0x2d6   :  { %v5327_v51 = vadd.f32 %v1599_v59, %v1511_v48  ;;  %v5940_v59 = vld [vmem:[#allocation35_spill] sm:$0xff] }
 0x2d7   :  { %v5331_v7 = vpop.f32.mrf.mxu1  ;;  %v3617_v48 = vld [vmem:[#allocation5 + $0x48] sm:$0xff] }
 0x2d8   :  { %5936 = vst [vmem:[#allocation22_spill] sm:$0xff] %v5327_v51  ;;  %2495 = vmatpush.bf16.msrb.mxu1 %v3617_v48 }
 0x2da   :  { %v1512_v50 = vpop.f32.mrf.mxu2 }
 0x2db   :  { %v1513_v38 = vadd.f32 %v1512_v50, %v5076_v61 }
 0x2dd   :  { %v1601_v46 = vpop.f32.mrf.mxu3  ;;  %v1688_v35 = vpop.f32.mrf.mxu0 }
 0x2de   :  { %v5334_v9 = vadd.f32 %v1601_v46, %v1513_v38  ;;  %v1689_v21 = vadd.f32 %v1688_v35, %v5154_v53 }
 0x2df   :  { %v1777_v55 = vpop.f32.mrf.mxu1  ;;  %1830 = vmatmul.bf16.gmra.mxu2 %v5938_v57 }
 0x2e0   :  { %5937 = vst [vmem:[#allocation23_spill] sm:$0xff] %v5334_v9  ;;  %v5338_v17 = vadd.f32 %v1777_v55, %v1689_v21 }
 0x2e2   :  { %5939 = vst [vmem:[#allocation26_spill] sm:$0xff] %v5338_v17  ;;  %1919 = vmatmul.bf16.gmra.mxu3 %v5940_v59  ;;  %v1515_v51 = vpop.f32.mrf.mxu2 }
 0x2e3   :  { %v1516_v61 = vadd.f32 %v1515_v51, %v5082_v42  ;;  %v5944_v51 = vld [vmem:[#allocation38_spill] sm:$0xff] }
 0x2e5   :  { %v1604_v50 = vpop.f32.mrf.mxu3  ;;  %v5344_v46 = vpop.f32.mrf.mxu0 }
 0x2e6   :  { %v5342_v38 = vadd.f32 %v1604_v50, %v1516_v61  ;;  %v5945_v61 = vld [vmem:[#allocation51_spill] sm:$0xff] }
 0x2e7   :  { %v5346_v35 = vpop.f32.mrf.mxu1 }
 0x2e8   :  { %5941 = vst [vmem:[#allocation44_spill] sm:$0xff] %v5342_v38 }
 0x2e9   :  { %5942 = vst [vmem:[#allocation27_spill] sm:$0xff] %v5346_v35 }
 0x2ea   :  { %v1517_v9 = vpop.f32.mrf.mxu2 }
 0x2eb   :  { %v1518_v57 = vadd.f32 %v1517_v9, %v5094_v13 }
 0x2ed   :  { %v1606_v21 = vpop.f32.mrf.mxu3  ;;  %v1693_v59 = vpop.f32.mrf.mxu0 }
 0x2ee   :  { %v5349_v55 = vadd.f32 %v1606_v21, %v1518_v57  ;;  %v1694_v5 = vadd.f32 %v1693_v59, %v5154_v53 }
 0x2ef   :  { %v1782_v17 = vpop.f32.mrf.mxu1  ;;  %1835 = vmatmul.bf16.gmra.mxu2 %v4958_v10 }
 0x2f0   :  { %5943 = vst [vmem:[#allocation28_spill] sm:$0xff] %v5349_v55  ;;  %v5353_v42 = vadd.f32 %v1782_v17, %v1694_v5 }
 0x2f2   :  { %1924 = vmatmul.bf16.gmra.mxu3 %v5944_v51  ;;  %v1520_v48 = vpop.f32.mrf.mxu2  ;;  %v5948_v51 = vld [vmem:[#allocation39_spill] sm:$0xff] }
 0x2f3   :  { %v1521_v50 = vadd.f32 %v1520_v48, %v5945_v61  ;;  %v3608_v48 = vld [vmem:[#allocation5] sm:$0xff] }
 0x2f4   :  { %2407 = vmatpush.bf16.msrb.mxu0 %v3608_v48 }
 0x2f5   :  { %v1609_v38 = vpop.f32.mrf.mxu3  ;;  %v5359_v13 = vpop.f32.mrf.mxu0 }
 0x2f6   :  { %v5357_v35 = vadd.f32 %v1609_v38, %v1521_v50  ;;  %v5950_v38 = vld [vmem:[#allocation40_spill] sm:$0xff]  ;;  %v3616_v50 = vld [vmem:[#allocation5 + $0x40] sm:$0xff] }
 0x2f7   :  { %v5361_v9 = vpop.f32.mrf.mxu1  ;;  %2496 = vmatpush.bf16.msrb.mxu1 %v3616_v50 }
 0x2f8   :  { %5946 = vst [vmem:[#allocation31_spill] sm:$0xff] %v5357_v35 }
 0x2fa   :  { %v1522_v57 = vpop.f32.mrf.mxu2 }
 0x2fb   :  { %v1523_v21 = vadd.f32 %v1522_v57, %v5112_v0 }
 0x2fd   :  { %v1611_v59 = vpop.f32.mrf.mxu3  ;;  %v1698_v10 = vpop.f32.mrf.mxu0 }
 0x2fe   :  { %v5364_v55 = vadd.f32 %v1611_v59, %v1523_v21  ;;  %v1699_v17 = vadd.f32 %v1698_v10, %v5154_v53 }
 0x2ff   :  { %v1787_v5 = vpop.f32.mrf.mxu1  ;;  %1840 = vmatmul.bf16.gmra.mxu2 %v5948_v51 }
 0x300   :  { %5947 = vst [vmem:[#allocation46_spill] sm:$0xff] %v5364_v55  ;;  %v5368_v61 = vadd.f32 %v1787_v5, %v1699_v17 }
 0x302   :  { %5949 = vst [vmem:[#allocation34_spill] sm:$0xff] %v5368_v61  ;;  %1929 = vmatmul.bf16.gmra.mxu3 %v5950_v38  ;;  %v1525_v35 = vpop.f32.mrf.mxu2 }
 0x303   :  { %v1526_v0 = vadd.f32 %v1525_v35, %v5118_v4  ;;  %v5953_v35 = vld [vmem:[#allocation41_spill] sm:$0xff] }
 0x305   :  { %v1614_v57 = vpop.f32.mrf.mxu3  ;;  %v5374_v59 = vpop.f32.mrf.mxu0 }
 0x306   :  { %v5372_v21 = vadd.f32 %v1614_v57, %v1526_v0 }
 0x307   :  { %v5376_v10 = vpop.f32.mrf.mxu1 }
 0x308   :  { %5951 = vst [vmem:[#allocation35_spill] sm:$0xff] %v5372_v21 }
 0x30a   :  { %v1527_v55 = vpop.f32.mrf.mxu2 }
 0x30b   :  { %v1528_v51 = vadd.f32 %v1527_v55, %v5130_v14 }
 0x30d   :  { %v1616_v17 = vpop.f32.mrf.mxu3  ;;  %v1703_v38 = vpop.f32.mrf.mxu0 }
 0x30e   :  { %v5379_v5 = vadd.f32 %v1616_v17, %v1528_v51  ;;  %v1704_v48 = vadd.f32 %v1703_v38, %v5154_v53 }
 0x30f   :  { %v1792_v61 = vpop.f32.mrf.mxu1  ;;  %1845 = vmatmul.bf16.gmra.mxu2 %v4997_v34 }
 0x310   :  { %5952 = vst [vmem:[#allocation38_spill] sm:$0xff] %v5379_v5  ;;  %v5383_v4 = vadd.f32 %v1792_v61, %v1704_v48 }
 0x312   :  { %1934 = vmatmul.bf16.gmra.mxu3 %v5953_v35  ;;  %v1530_v50 = vpop.f32.mrf.mxu2  ;;  %v5957_v35 = vld [vmem:[#allocation42_spill] sm:$0xff] }
 0x313   :  { %v1531_v0 = vadd.f32 %v1530_v50, %v5136_v23  ;;  %v5958_v50 = vld [vmem:[#allocation43_spill] sm:$0xff] }
 0x315   :  { %v1619_v57 = vpop.f32.mrf.mxu3  ;;  %v5389_v14 = vpop.f32.mrf.mxu0 }
 0x316   :  { %v5387_v21 = vadd.f32 %v1619_v57, %v1531_v0 }
 0x317   :  { %v5391_v55 = vpop.f32.mrf.mxu1 }
 0x318   :  { %5954 = vst [vmem:[#allocation51_spill] sm:$0xff] %v5387_v21 }
 0x319   :  { %5955 = vst [vmem:[#allocation39_spill] sm:$0xff] %v5391_v55 }
 0x31a   :  { %v1532_v51 = vpop.f32.mrf.mxu2 }
 0x31b   :  { %v1533_v17 = vadd.f32 %v1532_v51, %v5149_v12 }
 0x31d   :  { %v1621_v38 = vpop.f32.mrf.mxu3  ;;  %v1708_v34 = vpop.f32.mrf.mxu0 }
 0x31e   :  { %v5394_v5 = vadd.f32 %v1621_v38, %v1533_v17  ;;  %v1709_v61 = vadd.f32 %v1708_v34, %v5154_v53  ;;  %v3993_v38 = vpop.eup %3992 }
 0x31f   :  { %v1797_v48 = vpop.f32.mrf.mxu1  ;;  %1850 = vmatmul.bf16.gmra.mxu2 %v5957_v35 }
 0x320   :  { %5956 = vst [vmem:[#allocation40_spill] sm:$0xff] %v5394_v5  ;;  %v5398_v23 = vadd.f32 %v1797_v48, %v1709_v61 }
 0x322   :  { %1939 = vmatmul.bf16.gmra.mxu3 %v5958_v50  ;;  %v1811_v0 = vpop.f32.mrf.mxu2 }
 0x323   :  { %v1812_v57 = vadd.f32 %v1811_v0, %v5161_v8 }
 0x325   :  { %v1900_v21 = vpop.f32.mrf.mxu3 }
 0x326   :  { %v1901_v55 = vadd.f32 %v1900_v21, %v1812_v57 }
 0x328   :  { %3994 = vtanh.f32 %v1901_v55 }
 0x329   :  { %3996 = vtanh.f32 %v5157_v63 }
 0x32a   :  { %v1813_v12 = vpop.f32.mrf.mxu2 }
 0x32b   :  { %v1814_v51 = vadd.f32 %v1813_v12, %v5170_v41 }
 0x32d   :  { %v1902_v17 = vpop.f32.mrf.mxu3 }
 0x32e   :  { %v3995_v34 = vpop.eup %3994  ;;  %v1903_v5 = vadd.f32 %v1902_v17, %v1814_v51 }
 0x32f   :  { %v2044_v61 = vpack.c.bf16 %v3995_v34, %v3993_v38  ;;  %1855 = vmatmul.bf16.gmra.mxu2 %v5033_v56  ;;  %v3997_v55 = vpop.eup %3996  ;;  %v5959_v34 = vld [vmem:[#allocation45_spill] sm:$0xff] }
 0x330   :  { %3998 = vtanh.f32 %v1903_v5 }
 0x331   :  { %2076 = vst [vmem:[#allocation8] sm:$0xff] %v2044_v61  ;;  %4000 = vtanh.f32 %v5167_v25  ;;  %v2176_v50 = vunpack.c.l.b16 %v2044_v61  ;;  %v2177_v63 = vunpack.c.h.b16 %v2044_v61 }
 0x332   :  { %1944 = vmatmul.bf16.gmra.mxu3 %v5035_v2  ;;  %v1816_v8 = vpop.f32.mrf.mxu2 }
 0x333   :  { %v1817_v22 = vadd.f32 %v1816_v8, %v5177_v32 }
 0x335   :  { %v1905_v21 = vpop.f32.mrf.mxu3 }
 0x336   :  { %v3999_v48 = vpop.eup %3998  ;;  %v1906_v41 = vadd.f32 %v1905_v21, %v1817_v22 }
 0x337   :  { %v2045_v35 = vpack.c.bf16 %v3999_v48, %v3997_v55  ;;  %v4001_v32 = vpop.eup %4000 }
 0x338   :  { %4002 = vtanh.f32 %v1906_v41 }
 0x339   :  { %2077 = vst [vmem:[#allocation8 + $0x8] sm:$0xff] %v2045_v35  ;;  %v2178_v5 = vunpack.c.l.b16 %v2045_v35  ;;  %v2179_v0 = vunpack.c.h.b16 %v2045_v35  ;;  %4004 = vtanh.f32 %v5173_v52 }
 0x33a   :  { %v1818_v56 = vpop.f32.mrf.mxu2 }
 0x33b   :  { %v2240_v57 = vpack.c.b16 %v2178_v5, %v2176_v50  ;;  %v2241_v12 = vpack.c.b16 %v2179_v0, %v2177_v63  ;;  %v1819_v2 = vadd.f32 %v1818_v56, %v5186_v33 }
 0x33d   :  { %v1907_v51 = vpop.f32.mrf.mxu3  ;;  %2408 = vmatmul.bf16.vlgmr.msrb.gmra.mxu0 %v2240_v57  ;;  %2497 = vmatmul.bf16.vlgmr.msrb.gmra.mxu1 %v2241_v12 }
 0x33e   :  { %v4003_v17 = vpop.eup %4002  ;;  %v1908_v38 = vadd.f32 %v1907_v51, %v1819_v2  ;;  %v5960_v2 = vld [vmem:[#allocation29_spill] sm:$0xff]  ;;  %v5961_v51 = vld [vmem:[#allocation47_spill] sm:$0xff] }
 0x33f   :  { %v2046_v25 = vpack.c.bf16 %v4003_v17, %v4001_v32  ;;  %1860 = vmatmul.bf16.gmra.mxu2 %v5051_v19  ;;  %v4005_v33 = vpop.eup %4004  ;;  %v5962_v32 = vld [vmem:[#allocation48_spill] sm:$0xff] }
 0x340   :  { %4006 = vtanh.f32 %v1908_v38  ;;  %v5963_v38 = vld [vmem:[#allocation30_spill] sm:$0xff] }
 0x341   :  { %2078 = vst [vmem:[#allocation8 + $0x10] sm:$0xff] %v2046_v25  ;;  %4008 = vtanh.f32 %v5183_v28  ;;  %v2180_v52 = vunpack.c.l.b16 %v2046_v25  ;;  %v2181_v35 = vunpack.c.h.b16 %v2046_v25 }
 0x342   :  { %1949 = vmatmul.bf16.gmra.mxu3 %v5959_v34  ;;  %v1821_v61 = vpop.f32.mrf.mxu2 }
 0x343   :  { %v1822_v8 = vadd.f32 %v1821_v61, %v5193_v6 }
 0x345   :  { %v1910_v22 = vpop.f32.mrf.mxu3 }
 0x346   :  { %v4007_v21 = vpop.eup %4006  ;;  %v1911_v55 = vadd.f32 %v1910_v22, %v1822_v8  ;;  %v5964_v22 = vld [vmem:[#allocation14_spill] sm:$0xff] }
 0x347   :  { %v2047_v48 = vpack.c.bf16 %v4007_v21, %v4005_v33  ;;  %v4009_v6 = vpop.eup %4008 }
 0x348   :  { %4010 = vtanh.f32 %v1911_v55 }
 0x349   :  { %2079 = vst [vmem:[#allocation8 + $0x18] sm:$0xff] %v2047_v48  ;;  %v2182_v41 = vunpack.c.l.b16 %v2047_v48  ;;  %v2183_v50 = vunpack.c.h.b16 %v2047_v48  ;;  %4012 = vtanh.f32 %v5960_v2  ;;  %v5967_v2 = vld [vmem:[#allocation50_spill] sm:$0xff] }
 0x34a   :  { %v1823_v19 = vpop.f32.mrf.mxu2 }
 0x34b   :  { %v2242_v63 = vpack.c.b16 %v2182_v41, %v2180_v52  ;;  %v2243_v5 = vpack.c.b16 %v2183_v50, %v2181_v35  ;;  %v1824_v0 = vadd.f32 %v1823_v19, %v5202_v47 }
 0x34d   :  { %v1912_v56 = vpop.f32.mrf.mxu3  ;;  %2413 = vmatmul.bf16.gmra.mxu0 %v2242_v63  ;;  %2502 = vmatmul.bf16.gmra.mxu1 %v2243_v5 }
 0x34e   :  { %v4011_v57 = vpop.eup %4010  ;;  %v1913_v12 = vadd.f32 %v1912_v56, %v1824_v0 }
 0x34f   :  { %v2048_v28 = vpack.c.bf16 %v4011_v57, %v4009_v6  ;;  %1865 = vmatmul.bf16.gmra.mxu2 %v5961_v51  ;;  %v4013_v47 = vpop.eup %4012  ;;  %v5965_v6 = vld [vmem:[#allocation15_spill] sm:$0xff] }
 0x350   :  { %4014 = vtanh.f32 %v1913_v12  ;;  %v5966_v12 = vld [vmem:[#allocation49_spill] sm:$0xff] }
 0x351   :  { %2080 = vst [vmem:[#allocation8 + $0x20] sm:$0xff] %v2048_v28  ;;  %4016 = vtanh.f32 %v5964_v22  ;;  %v2184_v21 = vunpack.c.l.b16 %v2048_v28  ;;  %v2185_v48 = vunpack.c.h.b16 %v2048_v28 }
 0x352   :  { %1954 = vmatmul.bf16.gmra.mxu3 %v5962_v32  ;;  %v1826_v17 = vpop.f32.mrf.mxu2 }
 0x353   :  { %v1827_v25 = vadd.f32 %v1826_v17, %v5963_v38  ;;  %v1656_v38 = vadd.f32 %v5233_v40, %v5154_v53 }
 0x355   :  { %v1915_v34 = vpop.f32.mrf.mxu3 }
 0x356   :  { %v4015_v61 = vpop.eup %4014  ;;  %v1916_v8 = vadd.f32 %v1915_v34, %v1827_v25 }
 0x357   :  { %v2049_v33 = vpack.c.bf16 %v4015_v61, %v4013_v47  ;;  %v4017_v5 = vpop.eup %4016 }
 0x358   :  { %4018 = vtanh.f32 %v1916_v8 }
 0x359   :  { %2081 = vst [vmem:[#allocation8 + $0x28] sm:$0xff] %v2049_v33  ;;  %v2186_v55 = vunpack.c.l.b16 %v2049_v33  ;;  %v2187_v52 = vunpack.c.h.b16 %v2049_v33  ;;  %4020 = vtanh.f32 %v5965_v6  ;;  %v1745_v33 = vadd.f32 %v5235_v16, %v1656_v38 }
 0x35a   :  { %v1828_v41 = vpop.f32.mrf.mxu2 }
 0x35b   :  { %v2244_v35 = vpack.c.b16 %v2186_v55, %v2184_v21  ;;  %v2245_v50 = vpack.c.b16 %v2187_v52, %v2185_v48  ;;  %v1829_v19 = vadd.f32 %v1828_v41, %v5218_v31 }
 0x35d   :  { %v1917_v63 = vpop.f32.mrf.mxu3  ;;  %2418 = vmatmul.bf16.gmra.mxu0 %v2244_v35  ;;  %2507 = vmatmul.bf16.gmra.mxu1 %v2245_v50 }
 0x35e   :  { %v4019_v0 = vpop.eup %4018  ;;  %v1918_v56 = vadd.f32 %v1917_v63, %v1829_v19 }
 0x35f   :  { %v2050_v57 = vpack.c.bf16 %v4019_v0, %v4017_v5  ;;  %1870 = vmatmul.bf16.gmra.mxu2 %v5966_v12  ;;  %v4021_v31 = vpop.eup %4020  ;;  %v1661_v0 = vadd.f32 %v5250_v36, %v5154_v53 }
 0x360   :  { %4022 = vtanh.f32 %v1918_v56 }
 0x361   :  { %2082 = vst [vmem:[#allocation8 + $0x30] sm:$0xff] %v2050_v57  ;;  %4024 = vtanh.f32 %v5215_v20  ;;  %v2188_v47 = vunpack.c.l.b16 %v2050_v57  ;;  %v2189_v8 = vunpack.c.h.b16 %v2050_v57 }
 0x362   :  { %1959 = vmatmul.bf16.gmra.mxu3 %v5967_v2  ;;  %v1831_v28 = vpop.f32.mrf.mxu2 }
 0x363   :  { %v1832_v51 = vadd.f32 %v1831_v28, %v5225_v15 }
 0x365   :  { %v1920_v32 = vpop.f32.mrf.mxu3 }
 0x366   :  { %v4023_v17 = vpop.eup %4022  ;;  %v1921_v25 = vadd.f32 %v1920_v32, %v1832_v51 }
 0x367   :  { %v2051_v34 = vpack.c.bf16 %v4023_v17, %v4021_v31  ;;  %v4025_v41 = vpop.eup %4024 }
 0x368   :  { %4026 = vtanh.f32 %v1921_v25  ;;  %v5969_v25 = vld [vmem:[#allocation52_spill] sm:$0xff] }
 0x369   :  { %2083 = vst [vmem:[#allocation8 + $0x38] sm:$0xff] %v2051_v34  ;;  %v2190_v61 = vunpack.c.l.b16 %v2051_v34  ;;  %v2191_v22 = vunpack.c.h.b16 %v2051_v34  ;;  %4028 = vtanh.f32 %v5221_v60  ;;  %v5970_v34 = vld [vmem:[#allocation53_spill] sm:$0xff] }
 0x36a   :  { %v1833_v21 = vpop.f32.mrf.mxu2 }
 0x36b   :  { %v2246_v15 = vpack.c.b16 %v2190_v61, %v2188_v47  ;;  %v2247_v55 = vpack.c.b16 %v2191_v22, %v2189_v8  ;;  %v1834_v48 = vadd.f32 %v1833_v21, %v1745_v33  ;;  %v1666_v33 = vadd.f32 %v5267_v45, %v5154_v53 }
 0x36d   :  { %v1922_v52 = vpop.f32.mrf.mxu3  ;;  %2423 = vmatmul.bf16.gmra.mxu0 %v2246_v15  ;;  %2512 = vmatmul.bf16.gmra.mxu1 %v2247_v55 }
 0x36e   :  { %v4027_v40 = vpop.eup %4026  ;;  %v1923_v35 = vadd.f32 %v1922_v52, %v1834_v48 }
 0x36f   :  { %v2052_v20 = vpack.c.bf16 %v4027_v40, %v4025_v41  ;;  %1875 = vmatmul.bf16.gmra.mxu2 %v5105_v30  ;;  %v4029_v63 = vpop.eup %4028  ;;  %v1755_v40 = vadd.f32 %v5269_v18, %v1666_v33 }
 0x370   :  { %4030 = vtanh.f32 %v1923_v35 }
 0x371   :  { %2084 = vst [vmem:[#allocation8 + $0x40] sm:$0xff] %v2052_v20  ;;  %4032 = vtanh.f32 %v5231_v3  ;;  %v2192_v6 = vunpack.c.l.b16 %v2052_v20  ;;  %v2193_v57 = vunpack.c.h.b16 %v2052_v20  ;;  %v5968_v3 = vld [vmem:[#allocation32_spill] sm:$0xff] }
 0x372   :  { %1964 = vmatmul.bf16.gmra.mxu3 %v5107_v37  ;;  %v1836_v16 = vpop.f32.mrf.mxu2  ;;  %v1750_v37 = vadd.f32 %v5252_v26, %v1661_v0  ;;  %v5972_v0 = vld [vmem:[#allocation55_spill] sm:$0xff] }
 0x373   :  { %v1837_v50 = vadd.f32 %v1836_v16, %v5242_v43 }
 0x375   :  { %v1925_v19 = vpop.f32.mrf.mxu3 }
 0x376   :  { %v4031_v5 = vpop.eup %4030  ;;  %v1926_v56 = vadd.f32 %v1925_v19, %v1837_v50 }
 0x377   :  { %v2053_v60 = vpack.c.bf16 %v4031_v5, %v4029_v63  ;;  %v4033_v31 = vpop.eup %4032  ;;  %v5971_v5 = vld [vmem:[#allocation54_spill] sm:$0xff] }
 0x378   :  { %4034 = vtanh.f32 %v1926_v56 }
 0x379   :  { %2085 = vst [vmem:[#allocation8 + $0x48] sm:$0xff] %v2053_v60  ;;  %v2194_v30 = vunpack.c.l.b16 %v2053_v60  ;;  %v2195_v12 = vunpack.c.h.b16 %v2053_v60  ;;  %4036 = vtanh.f32 %v5968_v3 }
 0x37a   :  { %v1838_v2 = vpop.f32.mrf.mxu2 }
 0x37b   :  { %v2248_v43 = vpack.c.b16 %v2194_v30, %v2192_v6  ;;  %v2249_v28 = vpack.c.b16 %v2195_v12, %v2193_v57  ;;  %v1839_v51 = vadd.f32 %v1838_v2, %v1750_v37  ;;  %v1671_v57 = vadd.f32 %v5284_v58, %v5154_v53  ;;  %v5973_v37 = vld [vmem:[#allocation16_spill] sm:$0xff] }
 0x37d   :  { %v1927_v32 = vpop.f32.mrf.mxu3  ;;  %2428 = vmatmul.bf16.gmra.mxu0 %v2248_v43  ;;  %2517 = vmatmul.bf16.gmra.mxu1 %v2249_v28 }
 0x37e   :  { %v4035_v36 = vpop.eup %4034  ;;  %v1928_v17 = vadd.f32 %v1927_v32, %v1839_v51  ;;  %v5974_v32 = vld [vmem:[#allocation36_spill] sm:$0xff] }
 0x37f   :  { %v2054_v38 = vpack.c.bf16 %v4035_v36, %v4033_v31  ;;  %1880 = vmatmul.bf16.gmra.mxu2 %v5969_v25  ;;  %v4037_v8 = vpop.eup %4036  ;;  %v1760_v31 = vadd.f32 %v5974_v32, %v1671_v57 }
 0x380   :  { %4038 = vtanh.f32 %v1928_v17 }
 0x381   :  { %2086 = vst [vmem:[#allocation8 + $0x50] sm:$0xff] %v2054_v38  ;;  %4040 = vtanh.f32 %v5248_v11  ;;  %v2196_v55 = vunpack.c.l.b16 %v2054_v38  ;;  %v2197_v52 = vunpack.c.h.b16 %v2054_v38 }
 0x382   :  { %1969 = vmatmul.bf16.gmra.mxu3 %v5970_v34  ;;  %v1841_v26 = vpop.f32.mrf.mxu2 }
 0x383   :  { %v1842_v47 = vadd.f32 %v1841_v26, %v5259_v27  ;;  %v5975_v26 = vld [vmem:[#allocation17_spill] sm:$0xff] }
 0x385   :  { %v1930_v61 = vpop.f32.mrf.mxu3 }
 0x386   :  { %v4039_v22 = vpop.eup %4038  ;;  %v1931_v21 = vadd.f32 %v1930_v61, %v1842_v47 }
 0x387   :  { %v2055_v15 = vpack.c.bf16 %v4039_v22, %v4037_v8  ;;  %v4041_v19 = vpop.eup %4040 }
 0x388   :  { %4042 = vtanh.f32 %v1931_v21 }
 0x389   :  { %2087 = vst [vmem:[#allocation8 + $0x58] sm:$0xff] %v2055_v15  ;;  %v2198_v48 = vunpack.c.l.b16 %v2055_v15  ;;  %v2199_v41 = vunpack.c.h.b16 %v2055_v15  ;;  %4044 = vtanh.f32 %v5255_v24  ;;  %v1676_v15 = vadd.f32 %v5299_v44, %v5154_v53 }
 0x38a   :  { %v1843_v35 = vpop.f32.mrf.mxu2 }
 0x38b   :  { %v2250_v27 = vpack.c.b16 %v2198_v48, %v2196_v55  ;;  %v2251_v20 = vpack.c.b16 %v2199_v41, %v2197_v52  ;;  %v1844_v16 = vadd.f32 %v1843_v35, %v1755_v40  ;;  %v5976_v48 = vld [vmem:[#allocation33_spill] sm:$0xff] }
 0x38d   :  { %v1932_v50 = vpop.f32.mrf.mxu3  ;;  %2433 = vmatmul.bf16.gmra.mxu0 %v2250_v27  ;;  %2522 = vmatmul.bf16.gmra.mxu1 %v2251_v20  ;;  %v1765_v20 = vadd.f32 %v5301_v54, %v1676_v15 }
 0x38e   :  { %v4043_v45 = vpop.eup %4042  ;;  %v1933_v63 = vadd.f32 %v1932_v50, %v1844_v16 }
 0x38f   :  { %v2056_v11 = vpack.c.bf16 %v4043_v45, %v4041_v19  ;;  %1885 = vmatmul.bf16.gmra.mxu2 %v5971_v5  ;;  %v4045_v6 = vpop.eup %4044  ;;  %v5977_v5 = vld [vmem:[#allocation18_spill] sm:$0xff] }
 0x390   :  { %4046 = vtanh.f32 %v1933_v63 }
 0x391   :  { %2088 = vst [vmem:[#allocation8 + $0x60] sm:$0xff] %v2056_v11  ;;  %4048 = vtanh.f32 %v5973_v37  ;;  %v2200_v2 = vunpack.c.l.b16 %v2056_v11  ;;  %v2201_v28 = vunpack.c.h.b16 %v2056_v11  ;;  %v1681_v37 = vadd.f32 %v5314_v1, %v5154_v53 }
 0x392   :  { %1974 = vmatmul.bf16.gmra.mxu3 %v5972_v0  ;;  %v1846_v18 = vpop.f32.mrf.mxu2 }
 0x393   :  { %v1847_v56 = vadd.f32 %v1846_v18, %v5276_v49  ;;  %v5461_v18 = vpop.f32.mrf.mxu0 }
 0x395   :  { %v1935_v60 = vpop.f32.mrf.mxu3 }
 0x396   :  { %v4047_v30 = vpop.eup %4046  ;;  %v1936_v12 = vadd.f32 %v1935_v60, %v1847_v56  ;;  %v5463_v56 = vpop.f32.mrf.mxu1  ;;  %v5978_v60 = vld [vmem:[#allocation20_spill] sm:$0xff] }
 0x397   :  { %v2057_v24 = vpack.c.bf16 %v4047_v30, %v4045_v6  ;;  %v4049_v25 = vpop.eup %4048 }
 0x398   :  { %4050 = vtanh.f32 %v1936_v12 }
 0x399   :  { %2089 = vst [vmem:[#allocation8 + $0x68] sm:$0xff] %v2057_v24  ;;  %v2202_v43 = vunpack.c.l.b16 %v2057_v24  ;;  %v2203_v51 = vunpack.c.h.b16 %v2057_v24  ;;  %4052 = vtanh.f32 %v5975_v26 }
 0x39a   :  { %v1848_v36 = vpop.f32.mrf.mxu2 }
 0x39b   :  { %v2252_v49 = vpack.c.b16 %v2202_v43, %v2200_v2  ;;  %v2253_v17 = vpack.c.b16 %v2203_v51, %v2201_v28  ;;  %v1849_v3 = vadd.f32 %v1848_v36, %v1760_v31  ;;  %v5979_v2 = vld [vmem:[#allocation19_spill] sm:$0xff]  ;;  %v5472_v28 = vld [vmem:[%s5818_s6] ss:$0 sm:$0xff]  ;;  %s4366_s6 = smov [#allocation8]  }
 0x39c   :  { %s2979_s30 = sshll.u32 %s4366_s6, 4  ;;  %s2980_s30 = int_to_ptr.vmem [resolvable:$true] %s2979_s30 }
 0x39d   :  { %v1937_v38 = vpop.f32.mrf.mxu3  ;;  %2438 = vmatmul.bf16.gmra.mxu0 %v2252_v49  ;;  %2527 = vmatmul.bf16.gmra.mxu1 %v2253_v17  ;;  %v5980_v49 = vld [vmem:[#allocation24_spill] sm:$0xff] }
 0x39e   :  { %v4051_v58 = vpop.eup %4050  ;;  %v1938_v34 = vadd.f32 %v1937_v38, %v1849_v3  ;;  %v1770_v17 = vadd.f32 %v5980_v49, %v1681_v37 }
 0x39f   :  { %v2058_v47 = vpack.c.bf16 %v4051_v58, %v4049_v25  ;;  %v4053_v33 = vpop.eup %4052 }
 0x3a0   :  { %4054 = vtanh.f32 %v1938_v34 }
 0x3a1   :  { %2090 = vst [vmem:[#allocation8 + $0x70] sm:$0xff] %v2058_v47  ;;  %4056 = vtanh.f32 %v5976_v48  ;;  %v2204_v41 = vunpack.c.l.b16 %v2058_v47  ;;  %v2205_v35 = vunpack.c.h.b16 %v2058_v47 }
 0x3a2   :  { %v1851_v61 = vpop.f32.mrf.mxu2 }
 0x3a3   :  { %v1852_v8 = vadd.f32 %v1851_v61, %v5293_v39 }
 0x3a5   :  { %v1940_v22 = vpop.f32.mrf.mxu3 }
 0x3a6   :  { %v4055_v21 = vpop.eup %4054  ;;  %v1941_v55 = vadd.f32 %v1940_v22, %v1852_v8 }
 0x3a7   :  { %v2059_v52 = vpack.c.bf16 %v4055_v21, %v4053_v33  ;;  %v4057_v63 = vpop.eup %4056  ;;  %v5981_v21 = vld [vmem:[#allocation37_spill] sm:$0xff] }
 0x3a8   :  { %4058 = vtanh.f32 %v1941_v55 }
 0x3a9   :  { %2091 = vst [vmem:[#allocation8 + $0x78] sm:$0xff] %v2059_v52  ;;  %v2206_v40 = vunpack.c.l.b16 %v2059_v52  ;;  %v2207_v27 = vunpack.c.h.b16 %v2059_v52  ;;  %4060 = vtanh.f32 %v5977_v5 }
 0x3aa   :  { %v1853_v16 = vpop.f32.mrf.mxu2 }
 0x3ab   :  { %v2254_v39 = vpack.c.b16 %v2206_v40, %v2204_v41  ;;  %v2255_v50 = vpack.c.b16 %v2207_v27, %v2205_v35  ;;  %v1854_v19 = vadd.f32 %v1853_v16, %v1765_v20 }
 0x3ad   :  { %v1942_v45 = vpop.f32.mrf.mxu3  ;;  %2443 = vmatmul.bf16.gmra.mxu0 %v2254_v39  ;;  %2532 = vmatmul.bf16.gmra.mxu1 %v2255_v50  ;;  %v1686_v39 = vadd.f32 %v5329_v62, %v5154_v53 }
 0x3ae   :  { %v4059_v44 = vpop.eup %4058  ;;  %v1943_v11 = vadd.f32 %v1942_v45, %v1854_v19  ;;  %v5982_v19 = vld [vmem:[#allocation21_spill] sm:$0xff] }
 0x3af   :  { %v2060_v0 = vpack.c.bf16 %v4059_v44, %v4057_v63  ;;  %v4061_v57 = vpop.eup %4060  ;;  %v1775_v5 = vadd.f32 %v5331_v7, %v1686_v39 }
 0x3b0   :  { %4062 = vtanh.f32 %v1943_v11 }
 0x3b1   :  { %2092 = vst [vmem:[#allocation8 + $0x80] sm:$0xff] %v2060_v0  ;;  %4064 = vtanh.f32 %v5979_v2  ;;  %v2208_v51 = vunpack.c.l.b16 %v2060_v0  ;;  %v2209_v31 = vunpack.c.h.b16 %v2060_v0 }
 0x3b2   :  { %v1856_v54 = vpop.f32.mrf.mxu2 }
 0x3b3   :  { %v1857_v6 = vadd.f32 %v1856_v54, %v5978_v60 }
 0x3b5   :  { %v1945_v30 = vpop.f32.mrf.mxu3 }
 0x3b6   :  { %v4063_v12 = vpop.eup %4062  ;;  %v1946_v24 = vadd.f32 %v1945_v30, %v1857_v6 }
 0x3b7   :  { %v2061_v43 = vpack.c.bf16 %v4063_v12, %v4061_v57  ;;  %v4065_v61 = vpop.eup %4064 }
 0x3b8   :  { %4066 = vtanh.f32 %v1946_v24 }
 0x3b9   :  { %2093 = vst [vmem:[#allocation8 + $0x88] sm:$0xff] %v2061_v43  ;;  %v2210_v32 = vunpack.c.l.b16 %v2061_v43  ;;  %v2211_v36 = vunpack.c.h.b16 %v2061_v43  ;;  %4068 = vtanh.f32 %v5981_v21 }
 0x3ba   :  { %v2409_v3 = vpop.f32.mrf.mxu0  ;;  %v2498_v38 = vpop.f32.mrf.mxu1 }
 0x3bb   :  { %v2410_v1 = vadd.f32 %v5472_v28, %v2409_v3  ;;  %v1858_v25 = vpop.f32.mrf.mxu2  ;;  %v2256_v58 = vpack.c.b16 %v2210_v32, %v2208_v51  ;;  %v2257_v34 = vpack.c.b16 %v2211_v36, %v2209_v31  ;;  %v5983_v51 = vld [vmem:[#allocation25_spill] sm:$0xff] }
 0x3bc   :  { %v1859_v26 = vadd.f32 %v1858_v25, %v1770_v17  ;;  %v5984_v17 = vld [vmem:[#allocation26_spill] sm:$0xff] }
 0x3bd   :  { %v1947_v47 = vpop.f32.mrf.mxu3  ;;  %v5476_v8 = vadd.f32 %v2498_v38, %v2410_v1  ;;  %2448 = vmatmul.bf16.gmra.mxu0 %v2256_v58  ;;  %2537 = vmatmul.bf16.gmra.mxu1 %v2257_v34  ;;  %v1691_v34 = vadd.f32 %v5344_v46, %v5154_v53 }
 0x3be   :  { %v4067_v22 = vpop.eup %4066  ;;  %v1948_v33 = vadd.f32 %v1947_v47, %v1859_v26  ;;  %v5985_v47 = vld [vmem:[#allocation22_spill] sm:$0xff] }
 0x3bf   :  { %v2062_v15 = vpack.c.bf16 %v4067_v22, %v4065_v61  ;;  %2578 = vmax.xlane.f32.xlu0 %v5476_v8  ;;  %v4069_v27 = vpop.eup %4068 }
 0x3c0   :  { %4070 = vtanh.f32 %v1948_v33 }
 0x3c1   :  { %2094 = vst [vmem:[#allocation8 + $0x90] sm:$0xff] %v2062_v15  ;;  %4072 = vtanh.f32 %v5982_v19  ;;  %v2212_v63 = vunpack.c.l.b16 %v2062_v15  ;;  %v2213_v11 = vunpack.c.h.b16 %v2062_v15 }
 0x3c2   :  { %v2411_v55 = vpop.f32.mrf.mxu0  ;;  %v2500_v48 = vpop.f32.mrf.mxu1 }
 0x3c3   :  { %v2412_v52 = vadd.f32 %v5472_v28, %v2411_v55  ;;  %v1861_v41 = vpop.f32.mrf.mxu2  ;;  %v5986_v55 = vld [vmem:[#allocation27_spill] sm:$0xff] }
 0x3c4   :  { %v1862_v40 = vadd.f32 %v1861_v41, %v5323_v29 }
 0x3c5   :  { %v1950_v35 = vpop.f32.mrf.mxu3  ;;  %v5482_v20 = vadd.f32 %v2500_v48, %v2412_v52  ;;  %v1780_v48 = vadd.f32 %v5986_v55, %v1691_v34 }
 0x3c6   :  { %v4071_v16 = vpop.eup %4070  ;;  %v1951_v50 = vadd.f32 %v1950_v35, %v1862_v40 }
 0x3c7   :  { %v2063_v45 = vpack.c.bf16 %v4071_v16, %v4069_v27  ;;  %2580 = vmax.xlane.f32.xlu0 %v5482_v20  ;;  %v4073_v37 = vpop.eup %4072 }
 0x3c8   :  { %4074 = vtanh.f32 %v1951_v50 }
 0x3c9   :  { %2095 = vst [vmem:[#allocation8 + $0x98] sm:$0xff] %v2063_v45  ;;  %v2214_v44 = vunpack.c.l.b16 %v2063_v45  ;;  %v2215_v29 = vunpack.c.h.b16 %v2063_v45  ;;  %4076 = vtanh.f32 %v5983_v51 }
 0x3ca   :  { %v2414_v0 = vpop.f32.mrf.mxu0  ;;  %v2503_v54 = vpop.f32.mrf.mxu1 }
 0x3cb   :  { %v2415_v60 = vadd.f32 %v5472_v28, %v2414_v0  ;;  %v1863_v6 = vpop.f32.mrf.mxu2  ;;  %v2258_v62 = vpack.c.b16 %v2214_v44, %v2212_v63  ;;  %v2259_v30 = vpack.c.b16 %v2215_v29, %v2213_v11  ;;  %v5987_v44 = vld [vmem:[#allocation23_spill] sm:$0xff] }
 0x3cc   :  { %v1864_v57 = vadd.f32 %v1863_v6, %v1775_v5 }
 0x3cd   :  { %v1952_v12 = vpop.f32.mrf.mxu3  ;;  %v5490_v24 = vadd.f32 %v2503_v54, %v2415_v60  ;;  %2453 = vmatmul.bf16.gmra.mxu0 %v2258_v62  ;;  %2542 = vmatmul.bf16.gmra.mxu1 %v2259_v30 }
 0x3ce   :  { %v4075_v2 = vpop.eup %4074  ;;  %v1953_v43 = vadd.f32 %v1952_v12, %v1864_v57  ;;  %v1696_v12 = vadd.f32 %v5359_v13, %v5154_v53 }
 0x3cf   :  { %v2064_v32 = vpack.c.bf16 %v4075_v2, %v4073_v37  ;;  %2582 = vmax.xlane.f32.xlu1 %v5490_v24  ;;  %v4077_v1 = vpop.eup %4076  ;;  %v5988_v2 = vld [vmem:[#allocation44_spill] sm:$0xff] }
 0x3d0   :  { %4078 = vtanh.f32 %v1953_v43 }
 0x3d1   :  { %2096 = vst [vmem:[#allocation8 + $0xa0] sm:$0xff] %v2064_v32  ;;  %4080 = vtanh.f32 %v5985_v47  ;;  %v2216_v22 = vunpack.c.l.b16 %v2064_v32  ;;  %v2217_v21 = vunpack.c.h.b16 %v2064_v32 }
 0x3d2   :  { %v2416_v7 = vpop.f32.mrf.mxu0  ;;  %v2505_v31 = vpop.f32.mrf.mxu1 }
 0x3d3   :  { %v2417_v36 = vadd.f32 %v5472_v28, %v2416_v7  ;;  %v1866_v49 = vpop.f32.mrf.mxu2 }
 0x3d4   :  { %v1867_v3 = vadd.f32 %v1866_v49, %v5984_v17 }
 0x3d5   :  { %v1955_v38 = vpop.f32.mrf.mxu3  ;;  %v5496_v25 = vadd.f32 %v2505_v31, %v2417_v36  ;;  %v1785_v31 = vadd.f32 %v5361_v9, %v1696_v12 }
 0x3d6   :  { %v4079_v58 = vpop.eup %4078  ;;  %v1956_v26 = vadd.f32 %v1955_v38, %v1867_v3 }
 0x3d7   :  { %v2065_v61 = vpack.c.bf16 %v4079_v58, %v4077_v1  ;;  %2584 = vmax.xlane.f32.xlu1 %v5496_v25  ;;  %v4081_v50 = vpop.eup %4080 }
 0x3d8   :  { %4082 = vtanh.f32 %v1956_v26 }
 0x3d9   :  { %2097 = vst [vmem:[#allocation8 + $0xa8] sm:$0xff] %v2065_v61  ;;  %v2218_v33 = vunpack.c.l.b16 %v2065_v61  ;;  %v2219_v15 = vunpack.c.h.b16 %v2065_v61  ;;  %4084 = vtanh.f32 %v5987_v44 }
 0x3da   :  { %v2419_v52 = vpop.f32.mrf.mxu0  ;;  %v2508_v41 = vpop.f32.mrf.mxu1 }
 0x3db   :  { %v2420_v40 = vadd.f32 %v5472_v28, %v2419_v52  ;;  %v1868_v35 = vpop.f32.mrf.mxu2  ;;  %v2260_v46 = vpack.c.b16 %v2218_v33, %v2216_v22  ;;  %v2261_v27 = vpack.c.b16 %v2219_v15, %v2217_v21  ;;  %v5989_v22 = vld [vmem:[#allocation28_spill] sm:$0xff] }
 0x3dc   :  { %v1869_v16 = vadd.f32 %v1868_v35, %v1780_v48  ;;  %v5990_v48 = vld [vmem:[#allocation34_spill] sm:$0xff] }
 0x3dd   :  { %v1957_v39 = vpop.f32.mrf.mxu3  ;;  %v5504_v19 = vadd.f32 %v2508_v41, %v2420_v40  ;;  %2458 = vmatmul.bf16.gmra.mxu0 %v2260_v46  ;;  %2547 = vmatmul.bf16.gmra.mxu1 %v2261_v27  ;;  %v1701_v27 = vadd.f32 %v5374_v59, %v5154_v53 }
 0x3de   :  { %v4083_v45 = vpop.eup %4082  ;;  %v1958_v63 = vadd.f32 %v1957_v39, %v1869_v16  ;;  %v5991_v39 = vld [vmem:[#allocation31_spill] sm:$0xff] }
 0x3df   :  { %v2066_v11 = vpack.c.bf16 %v4083_v45, %v4081_v50  ;;  %2586 = vmax.xlane.f32.xlu2 %v5504_v19  ;;  %v4085_v62 = vpop.eup %4084 }
 0x3e0   :  { %4086 = vtanh.f32 %v1958_v63 }
 0x3e1   :  { %2098 = vst [vmem:[#allocation8 + $0xb0] sm:$0xff] %v2066_v11  ;;  %4088 = vtanh.f32 %v5988_v2  ;;  %v2220_v51 = vunpack.c.l.b16 %v2066_v11  ;;  %v2221_v7 = vunpack.c.h.b16 %v2066_v11 }
 0x3e2   :  { %v2421_v29 = vpop.f32.mrf.mxu0  ;;  %v2510_v5 = vpop.f32.mrf.mxu1 }
 0x3e3   :  { %v2422_v0 = vadd.f32 %v5472_v28, %v2421_v29  ;;  %v1871_v54 = vpop.f32.mrf.mxu2  ;;  %v1790_v29 = vadd.f32 %v5376_v10, %v1701_v27 }
 0x3e4   :  { %v1872_v60 = vadd.f32 %v1871_v54, %v5353_v42 }
 0x3e5   :  { %v1960_v6 = vpop.f32.mrf.mxu3  ;;  %v5510_v30 = vadd.f32 %v2510_v5, %v2422_v0 }
 0x3e6   :  { %v4087_v57 = vpop.eup %4086  ;;  %v1961_v37 = vadd.f32 %v1960_v6, %v1872_v60 }
 0x3e7   :  { %v2067_v43 = vpack.c.bf16 %v4087_v57, %v4085_v62  ;;  %2588 = vmax.xlane.f32.xlu2 %v5510_v30  ;;  %v4089_v34 = vpop.eup %4088 }
 0x3e8   :  { %4090 = vtanh.f32 %v1961_v37 }
 0x3e9   :  { %2099 = vst [vmem:[#allocation8 + $0xb8] sm:$0xff] %v2067_v43  ;;  %v2222_v32 = vunpack.c.l.b16 %v2067_v43  ;;  %v2223_v42 = vunpack.c.h.b16 %v2067_v43  ;;  %4092 = vtanh.f32 %v5989_v22 }
 0x3ea   :  { %v2424_v36 = vpop.f32.mrf.mxu0  ;;  %v2513_v49 = vpop.f32.mrf.mxu1 }
 0x3eb   :  { %v2425_v17 = vadd.f32 %v5472_v28, %v2424_v36  ;;  %v1873_v3 = vpop.f32.mrf.mxu2  ;;  %v2262_v13 = vpack.c.b16 %v2222_v32, %v2220_v51  ;;  %v2263_v38 = vpack.c.b16 %v2223_v42, %v2221_v7  ;;  %v5992_v51 = vld [vmem:[#allocation46_spill] sm:$0xff] }
 0x3ec   :  { %v1874_v1 = vadd.f32 %v1873_v3, %v1785_v31 }
 0x3ed   :  { %v1962_v58 = vpop.f32.mrf.mxu3  ;;  %v5518_v26 = vadd.f32 %v2513_v49, %v2425_v17  ;;  %2463 = vmatmul.bf16.gmra.mxu0 %v2262_v13  ;;  %2552 = vmatmul.bf16.gmra.mxu1 %v2263_v38  ;;  %v1706_v38 = vadd.f32 %v5389_v14, %v5154_v53 }
 0x3ee   :  { %v4091_v47 = vpop.eup %4090  ;;  %v1963_v61 = vadd.f32 %v1962_v58, %v1874_v1  ;;  %v5993_v58 = vld [vmem:[#allocation35_spill] sm:$0xff] }
 0x3ef   :  { %v2068_v33 = vpack.c.bf16 %v4091_v47, %v4089_v34  ;;  %2590 = vmax.xlane.f32.xlu0 %v5518_v26  ;;  %v4093_v40 = vpop.eup %4092 }
 0x3f0   :  { %4094 = vtanh.f32 %v1963_v61 }
 0x3f1   :  { %2100 = vst [vmem:[#allocation8 + $0xc0] sm:$0xff] %v2068_v33  ;;  %4096 = vtanh.f32 %v5991_v39  ;;  %v2224_v45 = vunpack.c.l.b16 %v2068_v33  ;;  %v2225_v44 = vunpack.c.h.b16 %v2068_v33  ;;  %v5994_v33 = vld [vmem:[#allocation39_spill] sm:$0xff] }
 0x3f2   :  { %v2426_v9 = vpop.f32.mrf.mxu0  ;;  %v2515_v21 = vpop.f32.mrf.mxu1 }
 0x3f3   :  { %v2427_v15 = vadd.f32 %v5472_v28, %v2426_v9  ;;  %v1876_v55 = vpop.f32.mrf.mxu2  ;;  %v1795_v9 = vadd.f32 %v5994_v33, %v1706_v38 }
 0x3f4   :  { %v1877_v52 = vadd.f32 %v1876_v55, %v5990_v48 }
 0x3f5   :  { %v1965_v41 = vpop.f32.mrf.mxu3  ;;  %v5524_v35 = vadd.f32 %v2515_v21, %v2427_v15 }
 0x3f6   :  { %v4095_v46 = vpop.eup %4094  ;;  %v1966_v16 = vadd.f32 %v1965_v41, %v1877_v52 }
 0x3f7   :  { %v2069_v50 = vpack.c.bf16 %v4095_v46, %v4093_v40  ;;  %2592 = vmax.xlane.f32.xlu1 %v5524_v35  ;;  %v4097_v12 = vpop.eup %4096 }
 0x3f8   :  { %4098 = vtanh.f32 %v1966_v16 }
 0x3f9   :  { %2101 = vst [vmem:[#allocation8 + $0xc8] sm:$0xff] %v2069_v50  ;;  %v2226_v63 = vunpack.c.l.b16 %v2069_v50  ;;  %v2227_v11 = vunpack.c.h.b16 %v2069_v50  ;;  %4100 = vtanh.f32 %v5992_v51  ;;  %v5995_v50 = vld [vmem:[#allocation38_spill] sm:$0xff] }
 0x3fa   :  { %v2429_v5 = vpop.f32.mrf.mxu0  ;;  %v2518_v0 = vpop.f32.mrf.mxu1 }
 0x3fb   :  { %v2430_v54 = vadd.f32 %v5472_v28, %v2429_v5  ;;  %v1878_v60 = vpop.f32.mrf.mxu2  ;;  %v2264_v59 = vpack.c.b16 %v2226_v63, %v2224_v45  ;;  %v2265_v6 = vpack.c.b16 %v2227_v11, %v2225_v44 }
 0x3fc   :  { %v1879_v62 = vadd.f32 %v1878_v60, %v1790_v29 }
 0x3fd   :  { %v1967_v57 = vpop.f32.mrf.mxu3  ;;  %v5532_v37 = vadd.f32 %v2518_v0, %v2430_v54  ;;  %2468 = vmatmul.bf16.gmra.mxu0 %v2264_v59  ;;  %2557 = vmatmul.bf16.gmra.mxu1 %v2265_v6  ;;  %v1711_v6 = vadd.f32 %v5461_v18, %v5154_v53 }
 0x3fe   :  { %v4099_v2 = vpop.eup %4098  ;;  %v1968_v43 = vadd.f32 %v1967_v57, %v1879_v62  ;;  %v5996_v57 = vld [vmem:[#allocation51_spill] sm:$0xff] }
 0x3ff   :  { %v2070_v32 = vpack.c.bf16 %v4099_v2, %v4097_v12  ;;  %2594 = vmax.xlane.f32.xlu2 %v5532_v37  ;;  %v4101_v17 = vpop.eup %4100 }
 0x400   :  { %4102 = vtanh.f32 %v1968_v43 }
 0x401   :  { %2102 = vst [vmem:[#allocation8 + $0xd0] sm:$0xff] %v2070_v32  ;;  %4104 = vtanh.f32 %v5993_v58  ;;  %v2228_v47 = vunpack.c.l.b16 %v2070_v32  ;;  %v2229_v22 = vunpack.c.h.b16 %v2070_v32  ;;  %v1800_v32 = vadd.f32 %v5463_v56, %v1711_v6  ;;  %v5997_v58 = vld [vmem:[#allocation40_spill] sm:$0xff] }
 0x402   :  { %v2431_v10 = vpop.f32.mrf.mxu0  ;;  %v2520_v7 = vpop.f32.mrf.mxu1 }
 0x403   :  { %v2432_v42 = vadd.f32 %v5472_v28, %v2431_v10  ;;  %v1881_v31 = vpop.f32.mrf.mxu2 }
 0x404   :  { %v1882_v36 = vadd.f32 %v1881_v31, %v5383_v4 }
 0x405   :  { %v1970_v49 = vpop.f32.mrf.mxu3  ;;  %v5538_v3 = vadd.f32 %v2520_v7, %v2432_v42 }
 0x406   :  { %v4103_v13 = vpop.eup %4102  ;;  %v1971_v1 = vadd.f32 %v1970_v49, %v1882_v36 }
 0x407   :  { %v2071_v34 = vpack.c.bf16 %v4103_v13, %v4101_v17  ;;  %2596 = vmax.xlane.f32.xlu0 %v5538_v3  ;;  %v4105_v46 = vpop.eup %4104 }
 0x408   :  { %4106 = vtanh.f32 %v1971_v1 }
 0x409   :  { %2103 = vst [vmem:[#allocation8 + $0xd8] sm:$0xff] %v2071_v34  ;;  %v2230_v61 = vunpack.c.l.b16 %v2071_v34  ;;  %v2231_v4 = vunpack.c.h.b16 %v2071_v34  ;;  %4108 = vtanh.f32 %v5995_v50 }
 0x40a   :  { %v2434_v21 = vpop.f32.mrf.mxu0  ;;  %v2523_v15 = vpop.f32.mrf.mxu1 }
 0x40b   :  { %v2435_v55 = vadd.f32 %v5472_v28, %v2434_v21  ;;  %v1883_v48 = vpop.f32.mrf.mxu2  ;;  %v2266_v14 = vpack.c.b16 %v2230_v61, %v2228_v47  ;;  %v2267_v52 = vpack.c.b16 %v2231_v4, %v2229_v22 }
 0x40c   :  { %v1884_v41 = vadd.f32 %v1883_v48, %v1795_v9 }
 0x40d   :  { %v1972_v40 = vpop.f32.mrf.mxu3  ;;  %v5546_v27 = vadd.f32 %v2523_v15, %v2435_v55  ;;  %2473 = vmatmul.bf16.gmra.mxu0 %v2266_v14  ;;  %2562 = vmatmul.bf16.gmra.mxu1 %v2267_v52 }
 0x40e   :  { %v4107_v16 = vpop.eup %4106  ;;  %v1973_v39 = vadd.f32 %v1972_v40, %v1884_v41 }
 0x40f   :  { %v2072_v45 = vpack.c.bf16 %v4107_v16, %v4105_v46  ;;  %2598 = vmax.xlane.f32.xlu1 %v5546_v27  ;;  %v4109_v54 = vpop.eup %4108 }
 0x410   :  { %4110 = vtanh.f32 %v1973_v39 }
 0x411   :  { %2104 = vst [vmem:[#allocation8 + $0xe0] sm:$0xff] %v2072_v45  ;;  %4112 = vtanh.f32 %v5996_v57  ;;  %v2232_v2 = vunpack.c.l.b16 %v2072_v45  ;;  %v2233_v51 = vunpack.c.h.b16 %v2072_v45 }
 0x412   :  { %v2436_v63 = vpop.f32.mrf.mxu0  ;;  %v2525_v44 = vpop.f32.mrf.mxu1 }
 0x413   :  { %v2437_v11 = vadd.f32 %v5472_v28, %v2436_v63  ;;  %v1886_v29 = vpop.f32.mrf.mxu2 }
 0x414   :  { %v1887_v5 = vadd.f32 %v1886_v29, %v5398_v23 }
 0x415   :  { %v1975_v0 = vpop.f32.mrf.mxu3  ;;  %v5552_v60 = vadd.f32 %v2525_v44, %v2437_v11 }
 0x416   :  { %v4111_v59 = vpop.eup %4110  ;;  %v1976_v62 = vadd.f32 %v1975_v0, %v1887_v5 }
 0x417   :  { %v2073_v12 = vpack.c.bf16 %v4111_v59, %v4109_v54  ;;  %2600 = vmax.xlane.f32.xlu2 %v5552_v60  ;;  %v4113_v49 = vpop.eup %4112 }
 0x418   :  { %4114 = vtanh.f32 %v1976_v62 }
 0x419   :  { %2105 = vst [vmem:[#allocation8 + $0xe8] sm:$0xff] %v2073_v12  ;;  %v2234_v43 = vunpack.c.l.b16 %v2073_v12  ;;  %v2235_v23 = vunpack.c.h.b16 %v2073_v12  ;;  %4116 = vtanh.f32 %v5997_v58 }
 0x41a   :  { %v2439_v10 = vpop.f32.mrf.mxu0  ;;  %v2528_v7 = vpop.f32.mrf.mxu1 }
 0x41b   :  { %v2440_v42 = vadd.f32 %v5472_v28, %v2439_v10  ;;  %v1888_v31 = vpop.f32.mrf.mxu2  ;;  %v2268_v53 = vpack.c.b16 %v2234_v43, %v2232_v2  ;;  %v2269_v18 = vpack.c.b16 %v2235_v23, %v2233_v51 }
 0x41c   :  { %v1889_v36 = vadd.f32 %v1888_v31, %v1800_v32 }
 0x41d   :  { %v5560_v17 = vadd.f32 %v2528_v7, %v2440_v42  ;;  %v1977_v13 = vpop.f32.mrf.mxu3  ;;  %2478 = vmatmul.bf16.gmra.mxu0 %v2268_v53  ;;  %2567 = vmatmul.bf16.gmra.mxu1 %v2269_v18 }
 0x41e   :  { %v4115_v38 = vpop.eup %4114  ;;  %v1978_v1 = vadd.f32 %v1977_v13, %v1889_v36 }
 0x41f   :  { %v2074_v34 = vpack.c.bf16 %v4115_v38, %v4113_v49  ;;  %2602 = vmax.xlane.f32.xlu0 %v5560_v17  ;;  %v4117_v22 = vpop.eup %4116 }
 0x420   :  { %4118 = vtanh.f32 %v1978_v1 }
 0x421   :  { %2106 = vst [vmem:[#allocation8 + $0xf0] sm:$0xff] %v2074_v34  ;;  %v2236_v21 = vunpack.c.l.b16 %v2074_v34  ;;  %v2237_v55 = vunpack.c.h.b16 %v2074_v34 }
 0x422   :  { %v2441_v56 = vpop.f32.mrf.mxu0  ;;  %v2530_v47 = vpop.f32.mrf.mxu1 }
 0x423   :  { %v2442_v61 = vadd.f32 %v5472_v28, %v2441_v56 }
 0x425   :  { %v5565_v4 = vadd.f32 %v2530_v47, %v2442_v61 }
 0x426   :  { %v4119_v33 = vpop.eup %4118 }
 0x427   :  { %v2075_v9 = vpack.c.bf16 %v4119_v33, %v4117_v22  ;;  %2604 = vmax.xlane.f32.xlu1 %v5565_v4 }
 0x429   :  { %2107 = vst [vmem:[#allocation8 + $0xf8] sm:$0xff] %v2075_v9  ;;  %v2238_v15 = vunpack.c.l.b16 %v2075_v9  ;;  %v2239_v48 = vunpack.c.h.b16 %v2075_v9 }
 0x42a   :  { %v2444_v14 = vpop.f32.mrf.mxu0  ;;  %v2533_v52 = vpop.f32.mrf.mxu1  ;;  %2987 = dma.vmem_to_hbm [thread:$0]  %s2980_s30, 4096, %s2982_s11, [#allocation9], %s4361_s13, %s4361_s13, %s4362_s14  }
 0x42b   :  { %v2445_v41 = vadd.f32 %v5472_v28, %v2444_v14  ;;  %v2270_v40 = vpack.c.b16 %v2238_v15, %v2236_v21  ;;  %v2271_v46 = vpack.c.b16 %v2239_v48, %v2237_v55  ;;  %s2966_s13 = sshll.u32 %s4367_s8, 4  ;;  %s2967_s13 = int_to_ptr.vmem [resolvable:$true] %s2966_s13 }
 0x42d   :  { %v5569_v16 = vadd.f32 %v2533_v52, %v2445_v41  ;;  %2483 = vmatmul.bf16.gmra.mxu0 %v2270_v40  ;;  %2572 = vmatmul.bf16.gmra.mxu1 %v2271_v46 }
 0x42f   :  { %2606 = vmax.xlane.f32.xlu2 %v5569_v16 }
 0x432   :  { %v2446_v39 = vpop.f32.mrf.mxu0  ;;  %v2535_v50 = vpop.f32.mrf.mxu1 }
 0x433   :  { %v2447_v45 = vadd.f32 %v5472_v28, %v2446_v39  ;;  %v2579_v63 = vpop.xlane.xlu0 %2578 }
 0x434   :  { %v5574_v44 = vsub.f32 %v5476_v8, %v2579_v63 }
 0x435   :  { %v5576_v11 = vadd.f32 %v2535_v50, %v2447_v45 }
 0x436   :  { %v2674_v29 = vmul.f32 1.442695, %v5574_v44 }
 0x437   :  { %2608 = vmax.xlane.f32.xlu0 %v5576_v11 }
 0x438   :  { %4120 = vpow2.f32 %v2674_v29 }
 0x43a   :  { %v2449_v5 = vpop.f32.mrf.mxu0  ;;  %v2538_v0 = vpop.f32.mrf.mxu1 }
 0x43b   :  { %v2450_v54 = vadd.f32 %v5472_v28, %v2449_v5  ;;  %v2581_v59 = vpop.xlane.xlu0 %2580 }
 0x43c   :  { %v5582_v6 = vsub.f32 %v5482_v20, %v2581_v59 }
 0x43d   :  { %v5584_v62 = vadd.f32 %v2538_v0, %v2450_v54 }
 0x43e   :  { %v4121_v57 = vpop.eup %4120  ;;  %v2676_v8 = vmul.f32 1.442695, %v5582_v6 }
 0x43f   :  { %2738 = vadd.xlane.f32.xlu2 %v4121_v57  ;;  %2610 = vmax.xlane.f32.xlu1 %v5584_v62 }
 0x440   :  { %4122 = vpow2.f32 %v2676_v8 }
 0x442   :  { %v2451_v12 = vpop.f32.mrf.mxu0  ;;  %v2540_v2 = vpop.f32.mrf.mxu1 }
 0x443   :  { %v2452_v43 = vadd.f32 %v5472_v28, %v2451_v12  ;;  %v2583_v51 = vpop.xlane.xlu1 %2582 }
 0x444   :  { %v5590_v23 = vsub.f32 %v5490_v24, %v2583_v51 }
 0x445   :  { %v5592_v32 = vadd.f32 %v2540_v2, %v2452_v43 }
 0x446   :  { %v4123_v20 = vpop.eup %4122  ;;  %v2678_v10 = vmul.f32 1.442695, %v5590_v23 }
 0x447   :  { %2740 = vadd.xlane.f32.xlu0 %v4123_v20  ;;  %2612 = vmax.xlane.f32.xlu2 %v5592_v32 }
 0x448   :  { %4124 = vpow2.f32 %v2678_v10 }
 0x44a   :  { %v2454_v7 = vpop.f32.mrf.mxu0  ;;  %v2543_v42 = vpop.f32.mrf.mxu1 }
 0x44b   :  { %v2455_v31 = vadd.f32 %v5472_v28, %v2454_v7  ;;  %v2585_v53 = vpop.xlane.xlu1 %2584 }
 0x44c   :  { %v5598_v18 = vsub.f32 %v5496_v25, %v2585_v53 }
 0x44d   :  { %v5600_v36 = vadd.f32 %v2543_v42, %v2455_v31 }
 0x44e   :  { %v4125_v24 = vpop.eup %4124  ;;  %v2680_v49 = vmul.f32 1.442695, %v5598_v18 }
 0x44f   :  { %2742 = vadd.xlane.f32.xlu1 %v4125_v24  ;;  %2614 = vmax.xlane.f32.xlu0 %v5600_v36 }
 0x450   :  { %4126 = vpow2.f32 %v2680_v49 }
 0x452   :  { %v2456_v13 = vpop.f32.mrf.mxu0  ;;  %v2545_v38 = vpop.f32.mrf.mxu1 }
 0x453   :  { %v2457_v1 = vadd.f32 %v5472_v28, %v2456_v13  ;;  %v2587_v58 = vpop.xlane.xlu2 %2586 }
 0x454   :  { %v5606_v34 = vsub.f32 %v5504_v19, %v2587_v58 }
 0x455   :  { %v5608_v56 = vadd.f32 %v2545_v38, %v2457_v1 }
 0x456   :  { %v4127_v25 = vpop.eup %4126  ;;  %v2682_v47 = vmul.f32 1.442695, %v5606_v34 }
 0x457   :  { %2744 = vadd.xlane.f32.xlu2 %v4127_v25  ;;  %2616 = vmax.xlane.f32.xlu1 %v5608_v56 }
 0x458   :  { %4128 = vpow2.f32 %v2682_v47 }
 0x45a   :  { %v2459_v61 = vpop.f32.mrf.mxu0  ;;  %v2548_v22 = vpop.f32.mrf.mxu1 }
 0x45b   :  { %v2460_v33 = vadd.f32 %v5472_v28, %v2459_v61  ;;  %v2589_v9 = vpop.xlane.xlu2 %2588 }
 0x45c   :  { %v5614_v21 = vsub.f32 %v5510_v30, %v2589_v9 }
 0x45d   :  { %v5616_v15 = vadd.f32 %v2548_v22, %v2460_v33 }
 0x45e   :  { %v4129_v19 = vpop.eup %4128  ;;  %v2684_v55 = vmul.f32 1.442695, %v5614_v21 }
 0x45f   :  { %2746 = vadd.xlane.f32.xlu0 %v4129_v19  ;;  %2618 = vmax.xlane.f32.xlu2 %v5616_v15 }
 0x460   :  { %4130 = vpow2.f32 %v2684_v55 }
 0x462   :  { %v2461_v48 = vpop.f32.mrf.mxu0  ;;  %v2550_v14 = vpop.f32.mrf.mxu1 }
 0x463   :  { %v2462_v52 = vadd.f32 %v5472_v28, %v2461_v48  ;;  %v2591_v41 = vpop.xlane.xlu0 %2590 }
 0x464   :  { %v5622_v40 = vsub.f32 %v5518_v26, %v2591_v41 }
 0x465   :  { %v5624_v46 = vadd.f32 %v2550_v14, %v2462_v52 }
 0x466   :  { %v4131_v30 = vpop.eup %4130  ;;  %v2686_v39 = vmul.f32 1.442695, %v5622_v40 }
 0x467   :  { %2748 = vadd.xlane.f32.xlu1 %v4131_v30  ;;  %2620 = vmax.xlane.f32.xlu0 %v5624_v46 }
 0x468   :  { %4132 = vpow2.f32 %v2686_v39 }
 0x46a   :  { %v2464_v50 = vpop.f32.mrf.mxu0  ;;  %v2553_v45 = vpop.f32.mrf.mxu1 }
 0x46b   :  { %v2465_v63 = vadd.f32 %v5472_v28, %v2464_v50  ;;  %v2593_v29 = vpop.xlane.xlu1 %2592 }
 0x46c   :  { %v5630_v5 = vsub.f32 %v5524_v35, %v2593_v29 }
 0x46d   :  { %v5632_v0 = vadd.f32 %v2553_v45, %v2465_v63 }
 0x46e   :  { %v4133_v26 = vpop.eup %4132  ;;  %v2688_v54 = vmul.f32 1.442695, %v5630_v5 }
 0x46f   :  { %2750 = vadd.xlane.f32.xlu2 %v4133_v26  ;;  %2622 = vmax.xlane.f32.xlu1 %v5632_v0 }
 0x470   :  { %4134 = vpow2.f32 %v2688_v54 }
 0x472   :  { %v2466_v59 = vpop.f32.mrf.mxu0  ;;  %v2555_v57 = vpop.f32.mrf.mxu1 }
 0x473   :  { %v2467_v8 = vadd.f32 %v5472_v28, %v2466_v59  ;;  %v2595_v12 = vpop.xlane.xlu2 %2594 }
 0x474   :  { %v5638_v2 = vsub.f32 %v5532_v37, %v2595_v12 }
 0x475   :  { %v5640_v43 = vadd.f32 %v2555_v57, %v2467_v8 }
 0x476   :  { %v4135_v35 = vpop.eup %4134  ;;  %v2690_v51 = vmul.f32 1.442695, %v5638_v2 }
 0x477   :  { %2752 = vadd.xlane.f32.xlu0 %v4135_v35  ;;  %2624 = vmax.xlane.f32.xlu2 %v5640_v43 }
 0x478   :  { %4136 = vpow2.f32 %v2690_v51 }
 0x47a   :  { %v2469_v20 = vpop.f32.mrf.mxu0  ;;  %v2558_v10 = vpop.f32.mrf.mxu1 }
 0x47b   :  { %v2470_v7 = vadd.f32 %v5472_v28, %v2469_v20  ;;  %v2597_v42 = vpop.xlane.xlu0 %2596 }
 0x47c   :  { %v5646_v31 = vsub.f32 %v5538_v3, %v2597_v42 }
 0x47d   :  { %v5648_v53 = vadd.f32 %v2558_v10, %v2470_v7 }
 0x47e   :  { %v4137_v37 = vpop.eup %4136  ;;  %v2692_v24 = vmul.f32 1.442695, %v5646_v31 }
 0x47f   :  { %2754 = vadd.xlane.f32.xlu1 %v4137_v37  ;;  %2626 = vmax.xlane.f32.xlu0 %v5648_v53 }
 0x480   :  { %4138 = vpow2.f32 %v2692_v24 }
 0x482   :  { %v2471_v49 = vpop.f32.mrf.mxu0  ;;  %v2560_v13 = vpop.f32.mrf.mxu1 }
 0x483   :  { %v2472_v38 = vadd.f32 %v5472_v28, %v2471_v49  ;;  %v2599_v1 = vpop.xlane.xlu1 %2598 }
 0x484   :  { %v5654_v58 = vsub.f32 %v5546_v27, %v2599_v1 }
 0x485   :  { %v5656_v25 = vadd.f32 %v2560_v13, %v2472_v38 }
 0x486   :  { %v4139_v3 = vpop.eup %4138  ;;  %v2694_v47 = vmul.f32 1.442695, %v5654_v58 }
 0x487   :  { %2756 = vadd.xlane.f32.xlu2 %v4139_v3  ;;  %2628 = vmax.xlane.f32.xlu1 %v5656_v25 }
 0x488   :  { %4140 = vpow2.f32 %v2694_v47 }
 0x48a   :  { %v2474_v61 = vpop.f32.mrf.mxu0  ;;  %v2563_v22 = vpop.f32.mrf.mxu1 }
 0x48b   :  { %v2475_v33 = vadd.f32 %v5472_v28, %v2474_v61  ;;  %v2601_v26 = vpop.xlane.xlu2 %2600 }
 0x48d   :  { %v5661_v9 = vadd.f32 %v2563_v22, %v2475_v33 }
 0x48e   :  { %v4141_v19 = vpop.eup %4140 }
 0x48f   :  { %2758 = vadd.xlane.f32.xlu0 %v4141_v19  ;;  %2630 = vmax.xlane.f32.xlu2 %v5661_v9 }
 0x492   :  { %v2476_v27 = vpop.f32.mrf.mxu0  ;;  %v2565_v55 = vpop.f32.mrf.mxu1 }
 0x493   :  { %v2477_v48 = vadd.f32 %v5472_v28, %v2476_v27  ;;  %v2603_v39 = vpop.xlane.xlu0 %2602 }
 0x494   :  { %v5673_v45 = vsub.f32 %v5560_v17, %v2603_v39 }
 0x495   :  { %v5665_v14 = vadd.f32 %v2565_v55, %v2477_v48 }
 0x496   :  { %v2698_v59 = vmul.f32 1.442695, %v5673_v45 }
 0x497   :  { %2632 = vmax.xlane.f32.xlu0 %v5665_v14 }
 0x498   :  { %4142 = vpow2.f32 %v2698_v59 }
 0x49a   :  { %v2479_v52 = vpop.f32.mrf.mxu0  ;;  %v2568_v41 = vpop.f32.mrf.mxu1 }
 0x49b   :  { %v2480_v30 = vadd.f32 %v5472_v28, %v2479_v52  ;;  %v2605_v57 = vpop.xlane.xlu1 %2604 }
 0x49c   :  { %v5680_v12 = vsub.f32 %v5565_v4, %v2605_v57  ;;  %v5691_v4 = vsub.f32 %v5552_v60, %v2601_v26 }
 0x49d   :  { %v5669_v50 = vadd.f32 %v2568_v41, %v2480_v30 }
 0x49e   :  { %v2700_v17 = vmul.f32 1.442695, %v5680_v12  ;;  %v4143_v24 = vpop.eup %4142  ;;  %v2696_v13 = vmul.f32 1.442695, %v5691_v4 }
 0x49f   :  { %2634 = vmax.xlane.f32.xlu1 %v5669_v50 }
 0x4a0   :  { %4144 = vpow2.f32 %v2700_v17 }
 0x4a2   :  { %v2481_v63 = vpop.f32.mrf.mxu0  ;;  %v2570_v29 = vpop.f32.mrf.mxu1 }
 0x4a3   :  { %v2482_v54 = vadd.f32 %v5472_v28, %v2481_v63  ;;  %v2607_v20 = vpop.xlane.xlu2 %2606 }
 0x4a4   :  { %v5705_v27 = vsub.f32 %v5569_v16, %v2607_v20 }
 0x4a5   :  { %v5677_v8 = vadd.f32 %v2570_v29, %v2482_v54 }
 0x4a6   :  { %v4145_v60 = vpop.eup %4144  ;;  %v2702_v55 = vmul.f32 1.442695, %v5705_v27 }
 0x4a7   :  { %2636 = vmax.xlane.f32.xlu2 %v5677_v8 }
 0x4aa   :  { %v2484_v35 = vpop.f32.mrf.mxu0  ;;  %v2573_v51 = vpop.f32.mrf.mxu1 }
 0x4ab   :  { %v2485_v10 = vadd.f32 %v5472_v28, %v2484_v35  ;;  %v2609_v7 = vpop.xlane.xlu0 %2608 }
 0x4ac   :  { %v5686_v42 = vsub.f32 %v5576_v11, %v2609_v7 }
 0x4ad   :  { %v5688_v37 = vadd.f32 %v2573_v51, %v2485_v10 }
 0x4ae   :  { %v2704_v49 = vmul.f32 1.442695, %v5686_v42 }
 0x4af   :  { %2638 = vmax.xlane.f32.xlu0 %v5688_v37  ;;  %2762 = vadd.xlane.f32.xlu2 %v4143_v24 }
 0x4b0   :  { %4146 = vpow2.f32 %v2704_v49 }
 0x4b1   :  { %4148 = vpow2.f32 %v2696_v13 }
 0x4b2   :  { %v2486_v38 = vpop.f32.mrf.mxu0  ;;  %v2739_v1 = vpop.xlane.xlu2 %2738 }
 0x4b3   :  { %v2487_v11 = vadd.f32 %v5472_v28, %v2486_v38  ;;  %v2611_v3 = vpop.xlane.xlu1 %2610  ;;  %v2575_v47 = vpop.f32.mrf.mxu1  ;;  %4150 = vlog2.f32 %v2739_v1 }
 0x4b4   :  { %v5698_v61 = vsub.f32 %v5584_v62, %v2611_v3 }
 0x4b5   :  { %v5700_v22 = vadd.f32 %v2575_v47, %v2487_v11 }
 0x4b6   :  { %v4147_v33 = vpop.eup %4146  ;;  %v2706_v19 = vmul.f32 1.442695, %v5698_v61 }
 0x4b7   :  { %2640 = vmax.xlane.f32.xlu1 %v5700_v22  ;;  %2764 = vadd.xlane.f32.xlu0 %v4145_v60  ;;  %v4149_v62 = vpop.eup %4148 }
 0x4b8   :  { %4152 = vpow2.f32 %v2706_v19  ;;  %2768 = vadd.xlane.f32.xlu2 %v4147_v33 }
 0x4b9   :  { %v4151_v48 = vpop.eup %4150 }
 0x4ba   :  { %v2741_v28 = vpop.xlane.xlu0 %2740  ;;  %v2613_v52 = vpop.xlane.xlu2 %2612  ;;  %v2803_v30 = vmul.f32 0.6931472, %v4151_v48 }
 0x4bb   :  { %4154 = vlog2.f32 %v2741_v28  ;;  %v5709_v39 = vsub.f32 %v5592_v32, %v2613_v52 }
 0x4bc   :  { %4156 = vpow2.f32 %v2702_v55  ;;  %v2866_v59 = vsub.f32 %v5574_v44, %v2803_v30 }
 0x4bd   :  { %v2708_v35 = vmul.f32 1.442695, %v5709_v39 }
 0x4be   :  { %v4153_v41 = vpop.eup %4152 }
 0x4bf   :  { %2760 = vadd.xlane.f32.xlu1 %v4149_v62  ;;  %2770 = vadd.xlane.f32.xlu0 %v4153_v41 }
 0x4c1   :  { %v4155_v63 = vpop.eup %4154 }
 0x4c2   :  { %v2805_v16 = vmul.f32 0.6931472, %v4155_v63  ;;  %v2743_v29 = vpop.xlane.xlu1 %2742  ;;  %v2615_v26 = vpop.xlane.xlu0 %2614 }
 0x4c3   :  { %v5712_v54 = vsub.f32 %v5600_v36, %v2615_v26  ;;  %v4157_v17 = vpop.eup %4156  ;;  %4158 = vlog2.f32 %v2743_v29 }
 0x4c4   :  { %v2867_v57 = vsub.f32 %v5582_v6, %v2805_v16 }
 0x4c5   :  { %v2710_v51 = vmul.f32 1.442695, %v5712_v54 }
 0x4c6   :  { %v3627_v20 = vpack.c.bf16 %v2867_v57, %v2866_v59 }
 0x4c7   :  { %4160 = vpow2.f32 %v2710_v51  ;;  %2766 = vadd.xlane.f32.xlu1 %v4157_v17 }
 0x4c8   :  { %3628 = vst [vmem:[#allocation7] sm:$0xff] %v3627_v20   ;;  %4162 = vpow2.f32 %v2708_v35 }
 0x4c9   :  { %v4159_v44 = vpop.eup %4158 }
 0x4ca   :  { %v2745_v32 = vpop.xlane.xlu2 %2744  ;;  %v2617_v10 = vpop.xlane.xlu1 %2616  ;;  %v2807_v49 = vmul.f32 0.6931472, %v4159_v44 }
 0x4cb   :  { %4164 = vlog2.f32 %v2745_v32  ;;  %v5719_v36 = vsub.f32 %v5608_v56, %v2617_v10 }
 0x4cc   :  { %v2868_v47 = vsub.f32 %v5590_v23, %v2807_v49 }
 0x4cd   :  { %v4161_v7 = vpop.eup %4160  ;;  %v2712_v6 = vmul.f32 1.442695, %v5719_v36 }
 0x4ce   :  { %v4163_v24 = vpop.eup %4162  ;;  %2774 = vadd.xlane.f32.xlu2 %v4161_v7 }
 0x4cf   :  { %4166 = vpow2.f32 %v2712_v6  ;;  %2772 = vadd.xlane.f32.xlu1 %v4163_v24 }
 0x4d1   :  { %v4165_v13 = vpop.eup %4164 }
 0x4d2   :  { %v2809_v38 = vmul.f32 0.6931472, %v4165_v13  ;;  %v2747_v1 = vpop.xlane.xlu0 %2746  ;;  %v2619_v11 = vpop.xlane.xlu2 %2618 }
 0x4d3   :  { %v5723_v3 = vsub.f32 %v5616_v15, %v2619_v11  ;;  %4168 = vlog2.f32 %v2747_v1 }
 0x4d4   :  { %v2869_v56 = vsub.f32 %v5598_v18, %v2809_v38 }
 0x4d5   :  { %v4167_v60 = vpop.eup %4166  ;;  %v2714_v33 = vmul.f32 1.442695, %v5723_v3 }
 0x4d6   :  { %v3632_v19 = vpack.c.bf16 %v2869_v56, %v2868_v47  ;;  %2776 = vadd.xlane.f32.xlu0 %v4167_v60 }
 0x4d7   :  { %4170 = vpow2.f32 %v2714_v33 }
 0x4d8   :  { %3704 = vst [vmem:[#allocation7 + $0x8] sm:$0xff] %v3632_v19  }
 0x4d9   :  { %v4169_v15 = vpop.eup %4168 }
 0x4da   :  { %v2749_v28 = vpop.xlane.xlu1 %2748  ;;  %v2621_v62 = vpop.xlane.xlu0 %2620  ;;  %v2811_v18 = vmul.f32 0.6931472, %v4169_v15 }
 0x4db   :  { %4172 = vlog2.f32 %v2749_v28  ;;  %v5729_v55 = vsub.f32 %v5624_v46, %v2621_v62 }
 0x4dc   :  { %v2870_v29 = vsub.f32 %v5606_v34, %v2811_v18 }
 0x4dd   :  { %v4171_v48 = vpop.eup %4170  ;;  %v2716_v23 = vmul.f32 1.442695, %v5729_v55 }
 0x4de   :  { %2778 = vadd.xlane.f32.xlu1 %v4171_v48 }
 0x4df   :  { %4174 = vpow2.f32 %v2716_v23 }
 0x4e1   :  { %v4173_v52 = vpop.eup %4172 }
 0x4e2   :  { %v2813_v41 = vmul.f32 0.6931472, %v4173_v52  ;;  %v2751_v30 = vpop.xlane.xlu2 %2750  ;;  %v2623_v63 = vpop.xlane.xlu1 %2622 }
 0x4e3   :  { %v5733_v16 = vsub.f32 %v5632_v0, %v2623_v63  ;;  %4176 = vlog2.f32 %v2751_v30 }
 0x4e4   :  { %v2871_v26 = vsub.f32 %v5614_v21, %v2813_v41 }
 0x4e5   :  { %v4175_v46 = vpop.eup %4174  ;;  %v2718_v59 = vmul.f32 1.442695, %v5733_v16 }
 0x4e6   :  { %v3637_v57 = vpack.c.bf16 %v2871_v26, %v2870_v29  ;;  %2780 = vadd.xlane.f32.xlu2 %v4175_v46 }
 0x4e7   :  { %4178 = vpow2.f32 %v2718_v59 }
 0x4e8   :  { %3705 = vst [vmem:[#allocation7 + $0x10] sm:$0xff] %v3637_v57  }
 0x4e9   :  { %v4177_v0 = vpop.eup %4176 }
 0x4ea   :  { %v2753_v35 = vpop.xlane.xlu0 %2752  ;;  %v2625_v51 = vpop.xlane.xlu2 %2624  ;;  %v2815_v21 = vmul.f32 0.6931472, %v4177_v0 }
 0x4eb   :  { %4180 = vlog2.f32 %v2753_v35  ;;  %v5739_v17 = vsub.f32 %v5640_v43, %v2625_v51 }
 0x4ec   :  { %v2872_v24 = vsub.f32 %v5622_v40, %v2815_v21 }
 0x4ed   :  { %v4179_v20 = vpop.eup %4178  ;;  %v2720_v34 = vmul.f32 1.442695, %v5739_v17 }
 0x4ee   :  { %2782 = vadd.xlane.f32.xlu0 %v4179_v20 }
 0x4ef   :  { %4182 = vpow2.f32 %v2720_v34 }
 0x4f1   :  { %v4181_v32 = vpop.eup %4180 }
 0x4f2   :  { %v2817_v10 = vmul.f32 0.6931472, %v4181_v32  ;;  %v2755_v44 = vpop.xlane.xlu1 %2754  ;;  %v2627_v7 = vpop.xlane.xlu0 %2626 }
 0x4f3   :  { %v5743_v6 = vsub.f32 %v5648_v53, %v2627_v7  ;;  %4184 = vlog2.f32 %v2755_v44 }
 0x4f4   :  { %v2873_v49 = vsub.f32 %v5630_v5, %v2817_v10 }
 0x4f5   :  { %v4183_v43 = vpop.eup %4182  ;;  %v2722_v13 = vmul.f32 1.442695, %v5743_v6 }
 0x4f6   :  { %v3642_v38 = vpack.c.bf16 %v2873_v49, %v2872_v24  ;;  %2784 = vadd.xlane.f32.xlu1 %v4183_v43 }
 0x4f7   :  { %4186 = vpow2.f32 %v2722_v13 }
 0x4f8   :  { %3706 = vst [vmem:[#allocation7 + $0x18] sm:$0xff] %v3642_v38  }
 0x4f9   :  { %v4185_v53 = vpop.eup %4184 }
 0x4fa   :  { %v2757_v1 = vpop.xlane.xlu2 %2756  ;;  %v2629_v11 = vpop.xlane.xlu1 %2628  ;;  %v2819_v5 = vmul.f32 0.6931472, %v4185_v53 }
 0x4fb   :  { %4188 = vlog2.f32 %v2757_v1  ;;  %v5749_v47 = vsub.f32 %v5656_v25, %v2629_v11 }
 0x4fc   :  { %v2874_v15 = vsub.f32 %v5638_v2, %v2819_v5 }
 0x4fd   :  { %v4187_v56 = vpop.eup %4186  ;;  %v2724_v40 = vmul.f32 1.442695, %v5749_v47 }
 0x4fe   :  { %2786 = vadd.xlane.f32.xlu2 %v4187_v56 }
 0x4ff   :  { %4190 = vpow2.f32 %v2724_v40 }
 0x501   :  { %v4189_v60 = vpop.eup %4188 }
 0x502   :  { %v2821_v33 = vmul.f32 0.6931472, %v4189_v60  ;;  %v2759_v19 = vpop.xlane.xlu0 %2758  ;;  %v2631_v28 = vpop.xlane.xlu2 %2630 }
 0x503   :  { %v5753_v62 = vsub.f32 %v5661_v9, %v2631_v28 }
 0x504   :  { %v2875_v48 = vsub.f32 %v5646_v31, %v2821_v33 }
 0x505   :  { %v4191_v25 = vpop.eup %4190  ;;  %v2726_v23 = vmul.f32 1.442695, %v5753_v62 }
 0x506   :  { %v3647_v18 = vpack.c.bf16 %v2875_v48, %v2874_v15  ;;  %2788 = vadd.xlane.f32.xlu0 %v4191_v25 }
 0x507   :  { %4192 = vpow2.f32 %v2726_v23 }
 0x508   :  { %3707 = vst [vmem:[#allocation7 + $0x20] sm:$0xff] %v3647_v18  }
 0x50a   :  { %v2633_v52 = vpop.xlane.xlu0 %2632 }
 0x50b   :  { %v5759_v41 = vsub.f32 %v5665_v14, %v2633_v52 }
 0x50d   :  { %v4193_v30 = vpop.eup %4192  ;;  %v2728_v63 = vmul.f32 1.442695, %v5759_v41 }
 0x50e   :  { %2790 = vadd.xlane.f32.xlu1 %v4193_v30 }
 0x50f   :  { %4194 = vpow2.f32 %v2728_v63 }
 0x512   :  { %v2635_v9 = vpop.xlane.xlu1 %2634 }
 0x513   :  { %v5763_v2 = vsub.f32 %v5669_v50, %v2635_v9 }
 0x515   :  { %v4195_v31 = vpop.eup %4194  ;;  %v2730_v29 = vmul.f32 1.442695, %v5763_v2 }
 0x516   :  { %2792 = vadd.xlane.f32.xlu2 %v4195_v31 }
 0x517   :  { %4196 = vpow2.f32 %v2730_v29 }
 0x51a   :  { %v2637_v26 = vpop.xlane.xlu2 %2636 }
 0x51b   :  { %v5767_v46 = vsub.f32 %v5677_v8, %v2637_v26 }
 0x51d   :  { %v4197_v14 = vpop.eup %4196  ;;  %v2732_v59 = vmul.f32 1.442695, %v5767_v46 }
 0x51e   :  { %2794 = vadd.xlane.f32.xlu0 %v4197_v14 }
 0x51f   :  { %4198 = vpow2.f32 %v2732_v59 }
 0x522   :  { %v2639_v57 = vpop.xlane.xlu0 %2638  ;;  %v2763_v35 = vpop.xlane.xlu2 %2762 }
 0x523   :  { %v5771_v51 = vsub.f32 %v5688_v37, %v2639_v57  ;;  %4200 = vlog2.f32 %v2763_v35 }
 0x525   :  { %v4199_v50 = vpop.eup %4198  ;;  %v2734_v0 = vmul.f32 1.442695, %v5771_v51 }
 0x526   :  { %2796 = vadd.xlane.f32.xlu1 %v4199_v50 }
 0x527   :  { %4202 = vpow2.f32 %v2734_v0 }
 0x529   :  { %v4201_v21 = vpop.eup %4200 }
 0x52a   :  { %v2641_v20 = vpop.xlane.xlu1 %2640  ;;  %v2765_v34 = vpop.xlane.xlu0 %2764  ;;  %v2827_v37 = vmul.f32 0.6931472, %v4201_v21 }
 0x52b   :  { %v5775_v8 = vsub.f32 %v5700_v22, %v2641_v20  ;;  %4204 = vlog2.f32 %v2765_v34  ;;  %v2769_v13 = vpop.xlane.xlu2 %2768 }
 0x52c   :  { %4206 = vlog2.f32 %v2759_v19  ;;  %v2878_v43 = vsub.f32 %v5673_v45, %v2827_v37 }
 0x52d   :  { %v4203_v32 = vpop.eup %4202  ;;  %v2736_v10 = vmul.f32 1.442695, %v5775_v8 }
 0x52e   :  { %2798 = vadd.xlane.f32.xlu2 %v4203_v32 }
 0x52f   :  { %4208 = vpow2.f32 %v2736_v10 }
 0x531   :  { %v4205_v44 = vpop.eup %4204 }
 0x532   :  { %v2829_v7 = vmul.f32 0.6931472, %v4205_v44  ;;  %v2761_v24 = vpop.xlane.xlu1 %2760  ;;  %v4207_v49 = vpop.eup %4206 }
 0x533   :  { %4210 = vlog2.f32 %v2761_v24  ;;  %v2823_v11 = vmul.f32 0.6931472, %v4207_v49  ;;  %v2771_v5 = vpop.xlane.xlu0 %2770 }
 0x534   :  { %v2879_v22 = vsub.f32 %v5680_v12, %v2829_v7  ;;  %4212 = vlog2.f32 %v2769_v13 }
 0x535   :  { %v4209_v38 = vpop.eup %4208  ;;  %v2876_v45 = vsub.f32 %v5654_v58, %v2823_v11 }
 0x536   :  { %v3657_v1 = vpack.c.bf16 %v2879_v22, %v2878_v43  ;;  %2800 = vadd.xlane.f32.xlu0 %v4209_v38 }
 0x538   :  { %3709 = vst [vmem:[#allocation7 + $0x30] sm:$0xff] %v3657_v1  }
 0x539   :  { %v4211_v53 = vpop.eup %4210 }
 0x53a   :  { %v2825_v56 = vmul.f32 0.6931472, %v4211_v53  ;;  %v2767_v40 = vpop.xlane.xlu1 %2766  ;;  %v4213_v60 = vpop.eup %4212 }
 0x53b   :  { %4214 = vlog2.f32 %v2767_v40  ;;  %v2833_v19 = vmul.f32 0.6931472, %v4213_v60 }
 0x53c   :  { %v2877_v12 = vsub.f32 %v5691_v4, %v2825_v56  ;;  %4216 = vlog2.f32 %v2771_v5 }
 0x53d   :  { %v2881_v23 = vsub.f32 %v5686_v42, %v2833_v19 }
 0x53e   :  { %v3652_v33 = vpack.c.bf16 %v2877_v12, %v2876_v45 }
 0x540   :  { %3708 = vst [vmem:[#allocation7 + $0x28] sm:$0xff] %v3652_v33  }
 0x541   :  { %v4215_v28 = vpop.eup %4214  ;;  %v2775_v25 = vpop.xlane.xlu2 %2774 }
 0x542   :  { %v2831_v15 = vmul.f32 0.6931472, %v4215_v28  ;;  %v2773_v48 = vpop.xlane.xlu1 %2772  ;;  %v4217_v52 = vpop.eup %4216 }
 0x543   :  { %4218 = vlog2.f32 %v2773_v48  ;;  %v2835_v58 = vmul.f32 0.6931472, %v4217_v52 }
 0x544   :  { %v2880_v18 = vsub.f32 %v5705_v27, %v2831_v15  ;;  %4220 = vlog2.f32 %v2775_v25 }
 0x545   :  { %v2882_v29 = vsub.f32 %v5698_v61, %v2835_v58 }
 0x546   :  { %v3662_v30 = vpack.c.bf16 %v2881_v23, %v2880_v18 }
 0x548   :  { %3710 = vst [vmem:[#allocation7 + $0x38] sm:$0xff] %v3662_v30  }
 0x549   :  { %v4219_v4 = vpop.eup %4218  ;;  %v2777_v63 = vpop.xlane.xlu0 %2776 }
 0x54a   :  { %v2837_v9 = vmul.f32 0.6931472, %v4219_v4  ;;  %4222 = vlog2.f32 %v2777_v63  ;;  %v4221_v31 = vpop.eup %4220 }
 0x54b   :  { %v2839_v59 = vmul.f32 0.6931472, %v4221_v31 }
 0x54c   :  { %v2883_v26 = vsub.f32 %v5709_v39, %v2837_v9 }
 0x54d   :  { %v2884_v27 = vsub.f32 %v5712_v54, %v2839_v59 }
 0x54e   :  { %v3667_v14 = vpack.c.bf16 %v2883_v26, %v2882_v29 }
 0x550   :  { %v4223_v57 = vpop.eup %4222  ;;  %3711 = vst [vmem:[#allocation7 + $0x40] sm:$0xff] %v3667_v14  }
 0x551   :  { %v2841_v42 = vmul.f32 0.6931472, %v4223_v57  ;;  %v2779_v50 = vpop.xlane.xlu1 %2778 }
 0x552   :  { %4224 = vlog2.f32 %v2779_v50 }
 0x553   :  { %v2885_v35 = vsub.f32 %v5719_v36, %v2841_v42 }
 0x555   :  { %v3672_v0 = vpack.c.bf16 %v2885_v35, %v2884_v27 }
 0x557   :  { %3712 = vst [vmem:[#allocation7 + $0x48] sm:$0xff] %v3672_v0  }
 0x558   :  { %v4225_v34 = vpop.eup %4224 }
 0x559   :  { %v2781_v20 = vpop.xlane.xlu2 %2780  ;;  %v2843_v21 = vmul.f32 0.6931472, %v4225_v34 }
 0x55a   :  { %4226 = vlog2.f32 %v2781_v20 }
 0x55b   :  { %v2886_v39 = vsub.f32 %v5723_v3, %v2843_v21 }
 0x560   :  { %v4227_v61 = vpop.eup %4226 }
 0x561   :  { %v2845_v32 = vmul.f32 0.6931472, %v4227_v61  ;;  %v2783_v37 = vpop.xlane.xlu0 %2782 }
 0x562   :  { %4228 = vlog2.f32 %v2783_v37 }
 0x563   :  { %v2887_v10 = vsub.f32 %v5729_v55, %v2845_v32 }
 0x565   :  { %v3677_v44 = vpack.c.bf16 %v2887_v10, %v2886_v39 }
 0x567   :  { %3713 = vst [vmem:[#allocation7 + $0x50] sm:$0xff] %v3677_v44  }
 0x568   :  { %v4229_v36 = vpop.eup %4228 }
 0x569   :  { %v2785_v54 = vpop.xlane.xlu1 %2784  ;;  %v2847_v7 = vmul.f32 0.6931472, %v4229_v36 }
 0x56a   :  { %4230 = vlog2.f32 %v2785_v54 }
 0x56b   :  { %v2888_v43 = vsub.f32 %v5733_v16, %v2847_v7 }
 0x570   :  { %v4231_v24 = vpop.eup %4230 }
 0x571   :  { %v2849_v49 = vmul.f32 0.6931472, %v4231_v24  ;;  %v2787_v22 = vpop.xlane.xlu2 %2786 }
 0x572   :  { %4232 = vlog2.f32 %v2787_v22 }
 0x573   :  { %v2889_v13 = vsub.f32 %v5739_v17, %v2849_v49 }
 0x575   :  { %v3682_v38 = vpack.c.bf16 %v2889_v13, %v2888_v43 }
 0x577   :  { %3714 = vst [vmem:[#allocation7 + $0x58] sm:$0xff] %v3682_v38  }
 0x578   :  { %v4233_v55 = vpop.eup %4232 }
 0x579   :  { %v2789_v3 = vpop.xlane.xlu0 %2788  ;;  %v2851_v1 = vmul.f32 0.6931472, %v4233_v55 }
 0x57a   :  { %4234 = vlog2.f32 %v2789_v3 }
 0x57b   :  { %v2890_v56 = vsub.f32 %v5743_v6, %v2851_v1 }
 0x580   :  { %v4235_v11 = vpop.eup %4234 }
 0x581   :  { %v2853_v53 = vmul.f32 0.6931472, %v4235_v11  ;;  %v2791_v45 = vpop.xlane.xlu1 %2790 }
 0x582   :  { %4236 = vlog2.f32 %v2791_v45 }
 0x583   :  { %v2891_v40 = vsub.f32 %v5749_v47, %v2853_v53 }
 0x585   :  { %v3687_v12 = vpack.c.bf16 %v2891_v40, %v2890_v56 }
 0x587   :  { %3715 = vst [vmem:[#allocation7 + $0x60] sm:$0xff] %v3687_v12  }
 0x588   :  { %v4237_v17 = vpop.eup %4236 }
 0x589   :  { %v2793_v16 = vpop.xlane.xlu2 %2792  ;;  %v2855_v5 = vmul.f32 0.6931472, %v4237_v17 }
 0x58a   :  { %4238 = vlog2.f32 %v2793_v16 }
 0x58b   :  { %v2892_v19 = vsub.f32 %v5753_v62, %v2855_v5 }
 0x590   :  { %v4239_v60 = vpop.eup %4238 }
 0x591   :  { %v2857_v33 = vmul.f32 0.6931472, %v4239_v60  ;;  %v2795_v15 = vpop.xlane.xlu0 %2794 }
 0x592   :  { %4240 = vlog2.f32 %v2795_v15 }
 0x593   :  { %v2893_v28 = vsub.f32 %v5759_v41, %v2857_v33 }
 0x595   :  { %v3692_v48 = vpack.c.bf16 %v2893_v28, %v2892_v19 }
 0x597   :  { %3716 = vst [vmem:[#allocation7 + $0x68] sm:$0xff] %v3692_v48  }
 0x598   :  { %v4241_v47 = vpop.eup %4240 }
 0x599   :  { %v2797_v6 = vpop.xlane.xlu1 %2796  ;;  %v2859_v25 = vmul.f32 0.6931472, %v4241_v47 }
 0x59a   :  { %4242 = vlog2.f32 %v2797_v6 }
 0x59b   :  { %v2894_v52 = vsub.f32 %v5763_v2, %v2859_v25 }
 0x5a0   :  { %v4243_v23 = vpop.eup %4242 }
 0x5a1   :  { %v2861_v18 = vmul.f32 0.6931472, %v4243_v23  ;;  %v2799_v58 = vpop.xlane.xlu2 %2798 }
 0x5a2   :  { %4244 = vlog2.f32 %v2799_v58 }
 0x5a3   :  { %v2895_v30 = vsub.f32 %v5767_v46, %v2861_v18 }
 0x5a5   :  { %v3697_v4 = vpack.c.bf16 %v2895_v30, %v2894_v52 }
 0x5a7   :  { %3717 = vst [vmem:[#allocation7 + $0x70] sm:$0xff] %v3697_v4  }
 0x5a8   :  { %v4245_v41 = vpop.eup %4244 }
 0x5a9   :  { %v2801_v62 = vpop.xlane.xlu0 %2800  ;;  %v2863_v63 = vmul.f32 0.6931472, %v4245_v41 }
 0x5aa   :  { %4246 = vlog2.f32 %v2801_v62 }
 0x5ab   :  { %v2896_v2 = vsub.f32 %v5771_v51, %v2863_v63 }
 0x5b0   :  { %v4247_v9 = vpop.eup %4246 }
 0x5b1   :  { %v2865_v31 = vmul.f32 0.6931472, %v4247_v9 }
 0x5b3   :  { %v2897_v46 = vsub.f32 %v5775_v8, %v2865_v31 }
 0x5b5   :  { %v3702_v29 = vpack.c.bf16 %v2897_v46, %v2896_v2 }
 0x5b7   :  { %3718 = vst [vmem:[#allocation7 + $0x78] sm:$0xff] %v3702_v29  }
 0x5b8   :  { %2974 = dma.vmem_to_hbm [thread:$0]  %s2967_s13, 2048, %s2969_s12, [#allocation4], %s4364_s17, %s4364_s17, %s4365_s3  }
 0x5b9   :  { %4356 = dma.done.wait [#allocation4], 2048  }
 0x5ba   :  { %4357 = vsyncadd [#allocation4], 4294965248 }
 0x5bb   :  { %4358 = dma.done.wait [#allocation9], 4096  }
 0x5bc   :  { %4359 = vsyncadd [#allocation9], 4294963200 }
 0x5bd   :  { %2996 = vsyncpa [#allocation3], 1 }
 0x5be   :  { %2997 = vsyncpa [#allocation6], 1 }
 0x5bf   :  { %2998 = vsyncpa [#allocation4], 1 }
 0x5c0   :  { %2999 = vsyncpa [#allocation9], 1 }

</bundles_post_ra>
